<compile_context>
chip_gen: v7x
topology: tpu7x:2x2x1
jax: 0.10.0
libtpu: 0.0.40
codegen_flags: <defaults>
</compile_context>

<pallas_src>
import math
from functools import partial

import jax
import jax.numpy as jnp
from jax.experimental import pallas as pl
from jax.experimental.pallas import tpu as pltpu


# --------------------------------- kernel ----------------------------------

def _msgaconv_kernel(x_ref, mask_ref, wpw_ref, w1_ref, wdw_ref, b_ref,
                     o_ref, xpad_ref, cat_ref,
                     *, c1, c2, min_ch, ch, Wp, PAD, Npad):
    """Fused MSGAConv forward on a channel-major, geometrically padded lane grid.

    Lane axis   : B*(H+4)*(W+4) flattened, rounded up to a multiple of 128.
    Sublane axis: channels.  All intermediates live in VMEM / vregs.
    """
    Cd = min_ch + c1              # merged depthwise channels: [x1 (min_ch); x (c1)]
    f32 = jnp.float32
    bf16 = jnp.bfloat16

    def silu(v):
        return v * jax.nn.sigmoid(v)      # logistic -> EUP slot, not a VALU divide

    # packed bias column: [cv1 | dw3 | dw5 | dw_shortcut | 1x1 | shortcut_pw]
    b_cv1 = b_ref[0:min_ch]
    b_dwa = b_ref[min_ch:min_ch + ch]
    b_dwb = b_ref[min_ch + ch:2 * min_ch]
    b_dwc = b_ref[2 * min_ch:2 * min_ch + c1]
    b_1x1 = b_ref[2 * min_ch + c1:2 * min_ch + c1 + c2]
    b_sc = b_ref[2 * min_ch + c1 + c2:2 * min_ch + c1 + 2 * c2]

    # ---- cv1: 1x1 conv (BN folded into weight) + SiLU.  bf16 MXU, f32 accumulate ----
    x = x_ref[...]                                                   # (c1, Npad) f32
    x1 = silu(jnp.dot(wpw_ref[0:min_ch, :], x.astype(bf16),
                      preferred_element_type=f32) + b_cv1)           # (min_ch, Npad)
    # Zero the geometric-halo lanes (the folded bias makes them nonzero) so the
    # depthwise below sees true 'same' zero padding.  One hoisted multiply total.
    x1 = x1 * mask_ref[...]

    # first half of the conv1x1 input cat([x1, branch]) -- adjacent sublane range
    cat_ref[0:min_ch, :] = x1

    # ---- depthwise slab fill: 128-lane-aligned center writes, fringe-only zeroing ----
    xpad_ref[:, 0:PAD] = jnp.zeros((Cd, PAD), f32)
    xpad_ref[:, PAD + Npad:PAD + Npad + PAD] = jnp.zeros((Cd, PAD), f32)
    xpad_ref[0:min_ch, PAD:PAD + Npad] = x1          # branch input channels
    xpad_ref[min_ch:Cd, PAD:PAD + Npad] = x          # shortcut-DWConv input channels

    # ---- merged depthwise: 3x3 branch + 5x5 branch + 3x3 shortcut ----
    # Geometric padding => each tap is one VMEM slice + mul + add; no boundary mask.
    # Only the 5x5-branch channels [ch:min_ch] see the 16 outer-ring taps.
    acc_a = jnp.zeros((ch, Npad), f32)       # 3x3 branch channels
    acc_b = jnp.zeros((ch, Npad), f32)       # 5x5 branch channels
    acc_c = jnp.zeros((c1, Npad), f32)       # shortcut DWConv channels
    for ki in range(5):                      # statically unrolled taps
        for kj in range(5):
            off = PAD + (ki - 2) * Wp + (kj - 2)     # static lane offset
            t = ki * 5 + kj
            acc_b = acc_b + (xpad_ref[ch:min_ch, off:off + Npad]
                             * wdw_ref[ch:min_ch, t:t + 1])
            if abs(ki - 2) <= 1 and abs(kj - 2) <= 1:      # center 3x3 taps only
                acc_a = acc_a + (xpad_ref[0:ch, off:off + Npad]
                                 * wdw_ref[0:ch, t:t + 1])
                acc_c = acc_c + (xpad_ref[min_ch:Cd, off:off + Npad]
                                 * wdw_ref[min_ch:Cd, t:t + 1])

    # branch outputs (SiLU) -> second half of the conv1x1 input (8-row-aligned stores)
    cat_ref[min_ch:min_ch + ch, :] = silu(acc_a + b_dwa)
    cat_ref[min_ch + ch:2 * min_ch, :] = silu(acc_b + b_dwb)
    y_sc = acc_c + b_dwc                             # shortcut DWConv (no activation)

    # ---- conv1x1 over cat([x1, branch]): ONE (c2, 2*min_ch) MXU matmul + SiLU ----
    y = silu(jnp.dot(w1_ref[...], cat_ref[...].astype(bf16),
                     preferred_element_type=f32) + b_1x1)            # (c2, Npad)

    # ---- shortcut 1x1 (no act) + fused residual add ----
    sc = jnp.dot(wpw_ref[min_ch:min_ch + c2, :], y_sc.astype(bf16),
                 preferred_element_type=f32) + b_sc
    o_ref[...] = (y + sc).astype(o_ref.dtype)


def msgaconv_forward(x_nchw, kp, *, c1, c2):
    """Fused MSGAConv forward. x_nchw: (B, c1, H, W) float32 -> (B, c2, H, W)."""
    B, c1_in, H, W = x_nchw.shape
    assert c1_in == c1 and c1 != c2           # only the conv-shortcut path (add=True)
    min_ch = c2 // 2
    ch = min_ch // 2
    Cd = min_ch + c1
    Hp, Wp = H + 4, W + 4                     # geometric 'same' halo for the 5x5 taps
    Nv = B * Hp * Wp
    Npad = ((Nv + 127) // 128) * 128          # lane-dense extent (multiple of 128)
    PAD = 128                                 # aligned slab fringe
    assert PAD >= 2 * Wp + 2                  # every tap slice stays inside the slab

    # Channel-major, geometrically padded lane layout: (c1, B*(H+4)*(W+4)) with zeros
    # in the halo / slack lanes.
    xp = jnp.pad(x_nchw, ((0, 0), (0, 0), (2, 2), (2, 2)))
    x_cm = jnp.transpose(xp, (1, 0, 2, 3)).reshape(c1, Nv)
    x_cm = jnp.pad(x_cm, ((0, 0), (0, Npad - Nv)))

    # validity mask of the padded lane grid (1 inside each image, 0 on halo / slack)
    m = jnp.zeros((B, Hp, Wp), jnp.float32).at[:, 2:2 + H, 2:2 + W].set(1.0)
    mask = jnp.pad(m.reshape(1, Nv), ((0, 0), (0, Npad - Nv)))

    out_cm = pl.pallas_call(
        partial(_msgaconv_kernel, c1=c1, c2=c2, min_ch=min_ch, ch=ch,
                Wp=Wp, PAD=PAD, Npad=Npad),
        out_shape=jax.ShapeDtypeStruct((c2, Npad), jnp.float32),
        scratch_shapes=[pltpu.VMEM((Cd, PAD + Npad + PAD), jnp.float32),  # dw slab
                        pltpu.VMEM((2 * min_ch, Npad), jnp.float32)],     # cat buffer
    )(x_cm, mask, kp['w_pw'], kp['w_1x1'], kp['w_dw'], kp['bias'])

    out = out_cm[:, :Nv].reshape(c2, B, Hp, Wp)[:, :, 2:2 + H, 2:2 + W]
    return jnp.transpose(out, (1, 0, 2, 3))   # back to NCHW


# -------------------- parameter init (eval-mode BN folded) ------------------

def _fold_bn(key, cout):
    k1, k2, k3, k4 = jax.random.split(key, 4)
    gamma = 1.0 + 0.1 * jax.random.normal(k1, (cout,), jnp.float32)
    beta = 0.05 * jax.random.normal(k2, (cout,), jnp.float32)
    mean = 0.05 * jax.random.normal(k3, (cout,), jnp.float32)
    var = 0.5 + 0.1 * jnp.abs(jax.random.normal(k4, (cout,), jnp.float32))
    scale = gamma / jnp.sqrt(var + 1e-5)
    return scale, beta - mean * scale


def _init_pw(key, cin, cout):
    kw, kb = jax.random.split(key)
    w = jax.random.normal(kw, (cout, cin), jnp.float32) / math.sqrt(cin)
    scale, bias = _fold_bn(kb, cout)
    return scale[:, None] * w, bias              # BN scale pre-folded into weight


def _init_dw(key, c, k):
    kw, kb = jax.random.split(key)
    w = jax.random.normal(kw, (c, k, k), jnp.float32) / (k * k)
    scale, bias = _fold_bn(kb, c)
    return scale[:, None, None] * w, bias


def init_msgaconv_params(key, c1, c2):
    min_ch = c2 // 2
    ch = min_ch // 2
    ks = jax.random.split(key, 6)
    w_cv1, b_cv1 = _init_pw(ks[0], c1, min_ch)     # cv1: 1x1 + BN + SiLU
    w_dw3, b_dw3 = _init_dw(ks[1], ch, 3)          # convs[0]: depthwise 3x3
    w_dw5, b_dw5 = _init_dw(ks[2], ch, 5)          # convs[1]: depthwise 5x5
    w_1x1, b_1x1 = _init_pw(ks[3], c2, c2)         # conv1x1
    w_scdw, b_scdw = _init_dw(ks[4], c1, 3)        # shortcut DWConv (act=False)
    w_scpw, b_scpw = _init_pw(ks[5], c1, c2)       # shortcut 1x1 (act=False)
    return dict(w_cv1=w_cv1, b_cv1=b_cv1, w_dw3=w_dw3, b_dw3=b_dw3,
                w_dw5=w_dw5, b_dw5=b_dw5, w_1x1=w_1x1, b_1x1=b_1x1,
                w_scdw=w_scdw, b_scdw=b_scdw, w_scpw=w_scpw, b_scpw=b_scpw)


def pack_kernel_params(p, c1, c2):
    """Merge the 3 depthwise convs into one 5x5, stack pointwise weights, pack biases."""
    min_ch = c2 // 2
    ch = min_ch // 2
    Cd = min_ch + c1
    # merged depthwise weight (Cd, 5, 5): 3x3 kernels centered inside a 5x5 window
    w_dw = jnp.zeros((Cd, 5, 5), jnp.float32)
    w_dw = w_dw.at[:ch, 1:4, 1:4].set(p['w_dw3'])        # 3x3 branch
    w_dw = w_dw.at[ch:min_ch].set(p['w_dw5'])            # 5x5 branch
    w_dw = w_dw.at[min_ch:, 1:4, 1:4].set(p['w_scdw'])   # shortcut 3x3
    # both c1-wide pointwise weights stacked into one input (bf16 MXU operands)
    w_pw = jnp.concatenate([p['w_cv1'], p['w_scpw']], axis=0).astype(jnp.bfloat16)
    # every bias packed into a single column vector (8-row-aligned segments)
    bias = jnp.concatenate([p['b_cv1'], p['b_dw3'], p['b_dw5'], p['b_scdw'],
                            p['b_1x1'], p['b_scpw']]).reshape(-1, 1)
    return dict(w_pw=w_pw,
                w_1x1=p['w_1x1'].astype(jnp.bfloat16),
                w_dw=w_dw.reshape(Cd, 25),
                bias=bias)


# ------------------------------ pure-JAX reference ---------------------------

def msgaconv_reference(x, p, *, c1, c2):
    min_ch = c2 // 2
    ch = min_ch // 2

    def silu(v):
        return v * jax.nn.sigmoid(v)

    def pw(v, w, b, act):
        y = jnp.einsum('oc,bchw->bohw', w, v) + b.reshape(1, -1, 1, 1)
        return silu(y) if act else y

    def dw(v, w, b, act):
        C, K, _ = w.shape
        pad = K // 2
        y = jax.lax.conv_general_dilated(
            v, w.reshape(C, 1, K, K), (1, 1), [(pad, pad), (pad, pad)],
            dimension_numbers=('NCHW', 'OIHW', 'NCHW'), feature_group_count=C)
        y = y + b.reshape(1, -1, 1, 1)
        return silu(y) if act else y

    x1 = pw(x, p['w_cv1'], p['b_cv1'], True)               # cv1
    y0 = dw(x1[:, :ch], p['w_dw3'], p['b_dw3'], True)      # convs[0] on group 0
    y1 = dw(x1[:, ch:], p['w_dw5'], p['b_dw5'], True)      # convs[1] on group 1
    cat = jnp.concatenate([x1, y0, y1], axis=1)            # cat([x1, x2], dim=1)
    out = pw(cat, p['w_1x1'], p['b_1x1'], True)            # conv1x1
    sc = dw(x, p['w_scdw'], p['b_scdw'], False)            # shortcut DWConv (no act)
    sc = pw(sc, p['w_scpw'], p['b_scpw'], False)           # shortcut 1x1   (no act)
    return out + sc


# ------------------------------------ main -----------------------------------

if __name__ == "__main__":
    key = jax.random.PRNGKey(0)
    kx, kp = jax.random.split(key)

    B, C1, H, W = 2, 8, 16, 16
    C2 = 32                       # min_ch = 16, ch = 8, add = (C1 != C2)

    x = jax.random.normal(kx, (B, C1, H, W), jnp.float32)   # PyTorch-style NCHW

    params = init_msgaconv_params(kp, C1, C2)
    kparams = pack_kernel_params(params, C1, C2)

    fwd = jax.jit(partial(msgaconv_forward, c1=C1, c2=C2))
    out = jax.block_until_ready(fwd(x, kparams))
    assert out.shape == (B, C2, H, W)

    ref = jax.block_until_ready(msgaconv_reference(x, params, c1=C1, c2=C2))
    max_err = float(jnp.max(jnp.abs(out - ref)))
    mean_err = float(jnp.mean(jnp.abs(out - ref)))
    # Tolerances account for bf16 MXU operands in the kernel (f32 reference).
    assert max_err < 5e-2, f"Pallas vs reference max err: {max_err}"
    assert mean_err < 1e-2, f"Pallas vs reference mean err: {mean_err}"

    print("KERNEL_OK")
</pallas_src>

<mosaic_0001>
module attributes {stable_mosaic.version = 11 : i64} {
  func.func @_msgaconv_kernel(%arg0: memref<8x896xf32, #tpu.memory_space<vmem>>, %arg1: memref<1x896xf32, #tpu.memory_space<vmem>>, %arg2: memref<48x8xbf16, #tpu.memory_space<vmem>>, %arg3: memref<32x32xbf16, #tpu.memory_space<vmem>>, %arg4: memref<24x25xf32, #tpu.memory_space<vmem>>, %arg5: memref<104x1xf32, #tpu.memory_space<vmem>>, %arg6: memref<32x896xf32, #tpu.memory_space<vmem>>, %arg7: memref<24x1152xf32, #tpu.memory_space<vmem>>, %arg8: memref<32x896xf32, #tpu.memory_space<vmem>>) attributes {dimension_semantics = [], scalar_prefetch = 0 : i64, scratch_operands = 2 : i64, tpu.core_type = #tpu.core_type<tc>} {
    %c0 = arith.constant 0 : index
    %c0_0 = arith.constant 0 : index
    %0 = vector.load %arg5[%c0, %c0_0] : memref<104x1xf32, #tpu.memory_space<vmem>>, vector<16x1xf32>
    %c16 = arith.constant 16 : index
    %c0_1 = arith.constant 0 : index
    %1 = vector.load %arg5[%c16, %c0_1] : memref<104x1xf32, #tpu.memory_space<vmem>>, vector<8x1xf32>
    %c24 = arith.constant 24 : index
    %c0_2 = arith.constant 0 : index
    %2 = vector.load %arg5[%c24, %c0_2] : memref<104x1xf32, #tpu.memory_space<vmem>>, vector<8x1xf32>
    %c32 = arith.constant 32 : index
    %c0_3 = arith.constant 0 : index
    %3 = vector.load %arg5[%c32, %c0_3] : memref<104x1xf32, #tpu.memory_space<vmem>>, vector<8x1xf32>
    %c40 = arith.constant 40 : index
    %c0_4 = arith.constant 0 : index
    %4 = vector.load %arg5[%c40, %c0_4] : memref<104x1xf32, #tpu.memory_space<vmem>>, vector<32x1xf32>
    %c72 = arith.constant 72 : index
    %c0_5 = arith.constant 0 : index
    %5 = vector.load %arg5[%c72, %c0_5] : memref<104x1xf32, #tpu.memory_space<vmem>>, vector<32x1xf32>
    %c0_6 = arith.constant 0 : index
    %c0_7 = arith.constant 0 : index
    %6 = vector.load %arg0[%c0_6, %c0_7] : memref<8x896xf32, #tpu.memory_space<vmem>>, vector<8x896xf32>
    %c0_8 = arith.constant 0 : index
    %c0_9 = arith.constant 0 : index
    %7 = vector.load %arg2[%c0_8, %c0_9] : memref<48x8xbf16, #tpu.memory_space<vmem>>, vector<16x8xbf16>
    %8 = arith.truncf %6 : vector<8x896xf32> to vector<8x896xbf16>
    %cst = arith.constant dense<0.000000e+00> : vector<16x896xf32>
    %9 = tpu.matmul %7, %8, %cst {dimension_numbers = #tpu.dot_dimension_numbers<[1], [0], [0], [1], [0, 0, 1, 1], [], []>} : vector<16x8xbf16>, vector<8x896xbf16>, vector<16x896xf32> -> vector<16x896xf32>
    %10 = vector.broadcast %0 : vector<16x1xf32> to vector<16x896xf32>
    %11 = arith.addf %9, %10 : vector<16x896xf32>
    %12 = arith.negf %11 : vector<16x896xf32>
    %13 = math.exp %12 : vector<16x896xf32>
    %cst_10 = arith.constant 1.000000e+00 : f32
    %14 = vector.broadcast %cst_10 : f32 to vector<16x896xf32>
    %15 = arith.addf %14, %13 : vector<16x896xf32>
    %16 = arith.divf %14, %15 : vector<16x896xf32>
    %17 = arith.mulf %11, %16 : vector<16x896xf32>
    %c0_11 = arith.constant 0 : index
    %c0_12 = arith.constant 0 : index
    %18 = vector.load %arg1[%c0_11, %c0_12] : memref<1x896xf32, #tpu.memory_space<vmem>>, vector<1x896xf32>
    %19 = vector.broadcast %18 : vector<1x896xf32> to vector<16x896xf32>
    %20 = arith.mulf %17, %19 : vector<16x896xf32>
    %c0_13 = arith.constant 0 : index
    %c0_14 = arith.constant 0 : index
    %21 = vector.load %arg8[%c0_13, %c0_14] : memref<32x896xf32, #tpu.memory_space<vmem>>, vector<16x896xf32>
    tpu.vector_store %arg8[%c0_13, %c0_14], %20 {strides = array<i32>} : memref<32x896xf32, #tpu.memory_space<vmem>>, vector<16x896xf32>,
    %cst_15 = arith.constant 0.000000e+00 : f32
    %22 = vector.broadcast %cst_15 : f32 to vector<24x128xf32>
    %c0_16 = arith.constant 0 : index
    %c0_17 = arith.constant 0 : index
    %23 = vector.load %arg7[%c0_16, %c0_17] : memref<24x1152xf32, #tpu.memory_space<vmem>>, vector<24x128xf32>
    tpu.vector_store %arg7[%c0_16, %c0_17], %22 {strides = array<i32>} : memref<24x1152xf32, #tpu.memory_space<vmem>>, vector<24x128xf32>,
    %cst_18 = arith.constant 0.000000e+00 : f32
    %24 = vector.broadcast %cst_18 : f32 to vector<24x128xf32>
    %c0_19 = arith.constant 0 : index
    %c1024 = arith.constant 1024 : index
    %25 = vector.load %arg7[%c0_19, %c1024] : memref<24x1152xf32, #tpu.memory_space<vmem>>, vector<24x128xf32>
    tpu.vector_store %arg7[%c0_19, %c1024], %24 {strides = array<i32>} : memref<24x1152xf32, #tpu.memory_space<vmem>>, vector<24x128xf32>,
    %c0_20 = arith.constant 0 : index
    %c128 = arith.constant 128 : index
    %26 = vector.load %arg7[%c0_20, %c128] : memref<24x1152xf32, #tpu.memory_space<vmem>>, vector<16x896xf32>
    tpu.vector_store %arg7[%c0_20, %c128], %20 {strides = array<i32>} : memref<24x1152xf32, #tpu.memory_space<vmem>>, vector<16x896xf32>,
    %c16_21 = arith.constant 16 : index
    %c128_22 = arith.constant 128 : index
    %27 = vector.load %arg7[%c16_21, %c128_22] : memref<24x1152xf32, #tpu.memory_space<vmem>>, vector<8x896xf32>
    tpu.vector_store %arg7[%c16_21, %c128_22], %6 {strides = array<i32>} : memref<24x1152xf32, #tpu.memory_space<vmem>>, vector<8x896xf32>,
    %cst_23 = arith.constant 0.000000e+00 : f32
    %28 = vector.broadcast %cst_23 : f32 to vector<8x896xf32>
    %cst_24 = arith.constant 0.000000e+00 : f32
    %29 = vector.broadcast %cst_24 : f32 to vector<8x896xf32>
    %cst_25 = arith.constant 0.000000e+00 : f32
    %30 = vector.broadcast %cst_25 : f32 to vector<8x896xf32>
    %c8 = arith.constant 8 : index
    %c86 = arith.constant 86 : index
    %31 = vector.load %arg7[%c8, %c86] : memref<24x1152xf32, #tpu.memory_space<vmem>>, vector<8x896xf32>
    %c8_26 = arith.constant 8 : index
    %c0_27 = arith.constant 0 : index
    %32 = vector.load %arg4[%c8_26, %c0_27] : memref<24x25xf32, #tpu.memory_space<vmem>>, vector<8x1xf32>
    %33 = vector.broadcast %32 : vector<8x1xf32> to vector<8x896xf32>
    %34 = arith.mulf %31, %33 : vector<8x896xf32>
    %35 = arith.addf %29, %34 : vector<8x896xf32>
    %c8_28 = arith.constant 8 : index
    %c87 = arith.constant 87 : index
    %36 = vector.load %arg7[%c8_28, %c87] : memref<24x1152xf32, #tpu.memory_space<vmem>>, vector<8x896xf32>
    %c8_29 = arith.constant 8 : index
    %c1 = arith.constant 1 : index
    %37 = vector.load %arg4[%c8_29, %c1] : memref<24x25xf32, #tpu.memory_space<vmem>>, vector<8x1xf32>
    %38 = vector.broadcast %37 : vector<8x1xf32> to vector<8x896xf32>
    %39 = arith.mulf %36, %38 : vector<8x896xf32>
    %40 = arith.addf %35, %39 : vector<8x896xf32>
    %c8_30 = arith.constant 8 : index
    %c88 = arith.constant 88 : index
    %41 = vector.load %arg7[%c8_30, %c88] : memref<24x1152xf32, #tpu.memory_space<vmem>>, vector<8x896xf32>
    %c8_31 = arith.constant 8 : index
    %c2 = arith.constant 2 : index
    %42 = vector.load %arg4[%c8_31, %c2] : memref<24x25xf32, #tpu.memory_space<vmem>>, vector<8x1xf32>
    %43 = vector.broadcast %42 : vector<8x1xf32> to vector<8x896xf32>
    %44 = arith.mulf %41, %43 : vector<8x896xf32>
    %45 = arith.addf %40, %44 : vector<8x896xf32>
    %c8_32 = arith.constant 8 : index
    %c89 = arith.constant 89 : index
    %46 = vector.load %arg7[%c8_32, %c89] : memref<24x1152xf32, #tpu.memory_space<vmem>>, vector<8x896xf32>
    %c8_33 = arith.constant 8 : index
    %c3 = arith.constant 3 : index
    %47 = vector.load %arg4[%c8_33, %c3] : memref<24x25xf32, #tpu.memory_space<vmem>>, vector<8x1xf32>
    %48 = vector.broadcast %47 : vector<8x1xf32> to vector<8x896xf32>
    %49 = arith.mulf %46, %48 : vector<8x896xf32>
    %50 = arith.addf %45, %49 : vector<8x896xf32>
    %c8_34 = arith.constant 8 : index
    %c90 = arith.constant 90 : index
    %51 = vector.load %arg7[%c8_34, %c90] : memref<24x1152xf32, #tpu.memory_space<vmem>>, vector<8x896xf32>
    %c8_35 = arith.constant 8 : index
    %c4 = arith.constant 4 : index
    %52 = vector.load %arg4[%c8_35, %c4] : memref<24x25xf32, #tpu.memory_space<vmem>>, vector<8x1xf32>
    %53 = vector.broadcast %52 : vector<8x1xf32> to vector<8x896xf32>
    %54 = arith.mulf %51, %53 : vector<8x896xf32>
    %55 = arith.addf %50, %54 : vector<8x896xf32>
    %c8_36 = arith.constant 8 : index
    %c106 = arith.constant 106 : index
    %56 = vector.load %arg7[%c8_36, %c106] : memref<24x1152xf32, #tpu.memory_space<vmem>>, vector<8x896xf32>
    %c8_37 = arith.constant 8 : index
    %c5 = arith.constant 5 : index
    %57 = vector.load %arg4[%c8_37, %c5] : memref<24x25xf32, #tpu.memory_space<vmem>>, vector<8x1xf32>
    %58 = vector.broadcast %57 : vector<8x1xf32> to vector<8x896xf32>
    %59 = arith.mulf %56, %58 : vector<8x896xf32>
    %60 = arith.addf %55, %59 : vector<8x896xf32>
    %c8_38 = arith.constant 8 : index
    %c107 = arith.constant 107 : index
    %61 = vector.load %arg7[%c8_38, %c107] : memref<24x1152xf32, #tpu.memory_space<vmem>>, vector<8x896xf32>
    %c8_39 = arith.constant 8 : index
    %c6 = arith.constant 6 : index
    %62 = vector.load %arg4[%c8_39, %c6] : memref<24x25xf32, #tpu.memory_space<vmem>>, vector<8x1xf32>
    %63 = vector.broadcast %62 : vector<8x1xf32> to vector<8x896xf32>
    %64 = arith.mulf %61, %63 : vector<8x896xf32>
    %65 = arith.addf %60, %64 : vector<8x896xf32>
    %c0_40 = arith.constant 0 : index
    %c107_41 = arith.constant 107 : index
    %66 = vector.load %arg7[%c0_40, %c107_41] : memref<24x1152xf32, #tpu.memory_space<vmem>>, vector<8x896xf32>
    %c0_42 = arith.constant 0 : index
    %c6_43 = arith.constant 6 : index
    %67 = vector.load %arg4[%c0_42, %c6_43] : memref<24x25xf32, #tpu.memory_space<vmem>>, vector<8x1xf32>
    %68 = vector.broadcast %67 : vector<8x1xf32> to vector<8x896xf32>
    %69 = arith.mulf %66, %68 : vector<8x896xf32>
    %70 = arith.addf %28, %69 : vector<8x896xf32>
    %c16_44 = arith.constant 16 : index
    %c107_45 = arith.constant 107 : index
    %71 = vector.load %arg7[%c16_44, %c107_45] : memref<24x1152xf32, #tpu.memory_space<vmem>>, vector<8x896xf32>
    %c16_46 = arith.constant 16 : index
    %c6_47 = arith.constant 6 : index
    %72 = vector.load %arg4[%c16_46, %c6_47] : memref<24x25xf32, #tpu.memory_space<vmem>>, vector<8x1xf32>
    %73 = vector.broadcast %72 : vector<8x1xf32> to vector<8x896xf32>
    %74 = arith.mulf %71, %73 : vector<8x896xf32>
    %75 = arith.addf %30, %74 : vector<8x896xf32>
    %c8_48 = arith.constant 8 : index
    %c108 = arith.constant 108 : index
    %76 = vector.load %arg7[%c8_48, %c108] : memref<24x1152xf32, #tpu.memory_space<vmem>>, vector<8x896xf32>
    %c8_49 = arith.constant 8 : index
    %c7 = arith.constant 7 : index
    %77 = vector.load %arg4[%c8_49, %c7] : memref<24x25xf32, #tpu.memory_space<vmem>>, vector<8x1xf32>
    %78 = vector.broadcast %77 : vector<8x1xf32> to vector<8x896xf32>
    %79 = arith.mulf %76, %78 : vector<8x896xf32>
    %80 = arith.addf %65, %79 : vector<8x896xf32>
    %c0_50 = arith.constant 0 : index
    %c108_51 = arith.constant 108 : index
    %81 = vector.load %arg7[%c0_50, %c108_51] : memref<24x1152xf32, #tpu.memory_space<vmem>>, vector<8x896xf32>
    %c0_52 = arith.constant 0 : index
    %c7_53 = arith.constant 7 : index
    %82 = vector.load %arg4[%c0_52, %c7_53] : memref<24x25xf32, #tpu.memory_space<vmem>>, vector<8x1xf32>
    %83 = vector.broadcast %82 : vector<8x1xf32> to vector<8x896xf32>
    %84 = arith.mulf %81, %83 : vector<8x896xf32>
    %85 = arith.addf %70, %84 : vector<8x896xf32>
    %c16_54 = arith.constant 16 : index
    %c108_55 = arith.constant 108 : index
    %86 = vector.load %arg7[%c16_54, %c108_55] : memref<24x1152xf32, #tpu.memory_space<vmem>>, vector<8x896xf32>
    %c16_56 = arith.constant 16 : index
    %c7_57 = arith.constant 7 : index
    %87 = vector.load %arg4[%c16_56, %c7_57] : memref<24x25xf32, #tpu.memory_space<vmem>>, vector<8x1xf32>
    %88 = vector.broadcast %87 : vector<8x1xf32> to vector<8x896xf32>
    %89 = arith.mulf %86, %88 : vector<8x896xf32>
    %90 = arith.addf %75, %89 : vector<8x896xf32>
    %c8_58 = arith.constant 8 : index
    %c109 = arith.constant 109 : index
    %91 = vector.load %arg7[%c8_58, %c109] : memref<24x1152xf32, #tpu.memory_space<vmem>>, vector<8x896xf32>
    %c8_59 = arith.constant 8 : index
    %c8_60 = arith.constant 8 : index
    %92 = vector.load %arg4[%c8_59, %c8_60] : memref<24x25xf32, #tpu.memory_space<vmem>>, vector<8x1xf32>
    %93 = vector.broadcast %92 : vector<8x1xf32> to vector<8x896xf32>
    %94 = arith.mulf %91, %93 : vector<8x896xf32>
    %95 = arith.addf %80, %94 : vector<8x896xf32>
    %c0_61 = arith.constant 0 : index
    %c109_62 = arith.constant 109 : index
    %96 = vector.load %arg7[%c0_61, %c109_62] : memref<24x1152xf32, #tpu.memory_space<vmem>>, vector<8x896xf32>
    %c0_63 = arith.constant 0 : index
    %c8_64 = arith.constant 8 : index
    %97 = vector.load %arg4[%c0_63, %c8_64] : memref<24x25xf32, #tpu.memory_space<vmem>>, vector<8x1xf32>
    %98 = vector.broadcast %97 : vector<8x1xf32> to vector<8x896xf32>
    %99 = arith.mulf %96, %98 : vector<8x896xf32>
    %100 = arith.addf %85, %99 : vector<8x896xf32>
    %c16_65 = arith.constant 16 : index
    %c109_66 = arith.constant 109 : index
    %101 = vector.load %arg7[%c16_65, %c109_66] : memref<24x1152xf32, #tpu.memory_space<vmem>>, vector<8x896xf32>
    %c16_67 = arith.constant 16 : index
    %c8_68 = arith.constant 8 : index
    %102 = vector.load %arg4[%c16_67, %c8_68] : memref<24x25xf32, #tpu.memory_space<vmem>>, vector<8x1xf32>
    %103 = vector.broadcast %102 : vector<8x1xf32> to vector<8x896xf32>
    %104 = arith.mulf %101, %103 : vector<8x896xf32>
    %105 = arith.addf %90, %104 : vector<8x896xf32>
    %c8_69 = arith.constant 8 : index
    %c110 = arith.constant 110 : index
    %106 = vector.load %arg7[%c8_69, %c110] : memref<24x1152xf32, #tpu.memory_space<vmem>>, vector<8x896xf32>
    %c8_70 = arith.constant 8 : index
    %c9 = arith.constant 9 : index
    %107 = vector.load %arg4[%c8_70, %c9] : memref<24x25xf32, #tpu.memory_space<vmem>>, vector<8x1xf32>
    %108 = vector.broadcast %107 : vector<8x1xf32> to vector<8x896xf32>
    %109 = arith.mulf %106, %108 : vector<8x896xf32>
    %110 = arith.addf %95, %109 : vector<8x896xf32>
    %c8_71 = arith.constant 8 : index
    %c126 = arith.constant 126 : index
    %111 = vector.load %arg7[%c8_71, %c126] : memref<24x1152xf32, #tpu.memory_space<vmem>>, vector<8x896xf32>
    %c8_72 = arith.constant 8 : index
    %c10 = arith.constant 10 : index
    %112 = vector.load %arg4[%c8_72, %c10] : memref<24x25xf32, #tpu.memory_space<vmem>>, vector<8x1xf32>
    %113 = vector.broadcast %112 : vector<8x1xf32> to vector<8x896xf32>
    %114 = arith.mulf %111, %113 : vector<8x896xf32>
    %115 = arith.addf %110, %114 : vector<8x896xf32>
    %c8_73 = arith.constant 8 : index
    %c127 = arith.constant 127 : index
    %116 = vector.load %arg7[%c8_73, %c127] : memref<24x1152xf32, #tpu.memory_space<vmem>>, vector<8x896xf32>
    %c8_74 = arith.constant 8 : index
    %c11 = arith.constant 11 : index
    %117 = vector.load %arg4[%c8_74, %c11] : memref<24x25xf32, #tpu.memory_space<vmem>>, vector<8x1xf32>
    %118 = vector.broadcast %117 : vector<8x1xf32> to vector<8x896xf32>
    %119 = arith.mulf %116, %118 : vector<8x896xf32>
    %120 = arith.addf %115, %119 : vector<8x896xf32>
    %c0_75 = arith.constant 0 : index
    %c127_76 = arith.constant 127 : index
    %121 = vector.load %arg7[%c0_75, %c127_76] : memref<24x1152xf32, #tpu.memory_space<vmem>>, vector<8x896xf32>
    %c0_77 = arith.constant 0 : index
    %c11_78 = arith.constant 11 : index
    %122 = vector.load %arg4[%c0_77, %c11_78] : memref<24x25xf32, #tpu.memory_space<vmem>>, vector<8x1xf32>
    %123 = vector.broadcast %122 : vector<8x1xf32> to vector<8x896xf32>
    %124 = arith.mulf %121, %123 : vector<8x896xf32>
    %125 = arith.addf %100, %124 : vector<8x896xf32>
    %c16_79 = arith.constant 16 : index
    %c127_80 = arith.constant 127 : index
    %126 = vector.load %arg7[%c16_79, %c127_80] : memref<24x1152xf32, #tpu.memory_space<vmem>>, vector<8x896xf32>
    %c16_81 = arith.constant 16 : index
    %c11_82 = arith.constant 11 : index
    %127 = vector.load %arg4[%c16_81, %c11_82] : memref<24x25xf32, #tpu.memory_space<vmem>>, vector<8x1xf32>
    %128 = vector.broadcast %127 : vector<8x1xf32> to vector<8x896xf32>
    %129 = arith.mulf %126, %128 : vector<8x896xf32>
    %130 = arith.addf %105, %129 : vector<8x896xf32>
    %c8_83 = arith.constant 8 : index
    %c128_84 = arith.constant 128 : index
    %131 = vector.load %arg7[%c8_83, %c128_84] : memref<24x1152xf32, #tpu.memory_space<vmem>>, vector<8x896xf32>
    %c8_85 = arith.constant 8 : index
    %c12 = arith.constant 12 : index
    %132 = vector.load %arg4[%c8_85, %c12] : memref<24x25xf32, #tpu.memory_space<vmem>>, vector<8x1xf32>
    %133 = vector.broadcast %132 : vector<8x1xf32> to vector<8x896xf32>
    %134 = arith.mulf %131, %133 : vector<8x896xf32>
    %135 = arith.addf %120, %134 : vector<8x896xf32>
    %c0_86 = arith.constant 0 : index
    %c128_87 = arith.constant 128 : index
    %136 = vector.load %arg7[%c0_86, %c128_87] : memref<24x1152xf32, #tpu.memory_space<vmem>>, vector<8x896xf32>
    %c0_88 = arith.constant 0 : index
    %c12_89 = arith.constant 12 : index
    %137 = vector.load %arg4[%c0_88, %c12_89] : memref<24x25xf32, #tpu.memory_space<vmem>>, vector<8x1xf32>
    %138 = vector.broadcast %137 : vector<8x1xf32> to vector<8x896xf32>
    %139 = arith.mulf %136, %138 : vector<8x896xf32>
    %140 = arith.addf %125, %139 : vector<8x896xf32>
    %c16_90 = arith.constant 16 : index
    %c128_91 = arith.constant 128 : index
    %141 = vector.load %arg7[%c16_90, %c128_91] : memref<24x1152xf32, #tpu.memory_space<vmem>>, vector<8x896xf32>
    %c16_92 = arith.constant 16 : index
    %c12_93 = arith.constant 12 : index
    %142 = vector.load %arg4[%c16_92, %c12_93] : memref<24x25xf32, #tpu.memory_space<vmem>>, vector<8x1xf32>
    %143 = vector.broadcast %142 : vector<8x1xf32> to vector<8x896xf32>
    %144 = arith.mulf %141, %143 : vector<8x896xf32>
    %145 = arith.addf %130, %144 : vector<8x896xf32>
    %c8_94 = arith.constant 8 : index
    %c129 = arith.constant 129 : index
    %146 = vector.load %arg7[%c8_94, %c129] : memref<24x1152xf32, #tpu.memory_space<vmem>>, vector<8x896xf32>
    %c8_95 = arith.constant 8 : index
    %c13 = arith.constant 13 : index
    %147 = vector.load %arg4[%c8_95, %c13] : memref<24x25xf32, #tpu.memory_space<vmem>>, vector<8x1xf32>
    %148 = vector.broadcast %147 : vector<8x1xf32> to vector<8x896xf32>
    %149 = arith.mulf %146, %148 : vector<8x896xf32>
    %150 = arith.addf %135, %149 : vector<8x896xf32>
    %c0_96 = arith.constant 0 : index
    %c129_97 = arith.constant 129 : index
    %151 = vector.load %arg7[%c0_96, %c129_97] : memref<24x1152xf32, #tpu.memory_space<vmem>>, vector<8x896xf32>
    %c0_98 = arith.constant 0 : index
    %c13_99 = arith.constant 13 : index
    %152 = vector.load %arg4[%c0_98, %c13_99] : memref<24x25xf32, #tpu.memory_space<vmem>>, vector<8x1xf32>
    %153 = vector.broadcast %152 : vector<8x1xf32> to vector<8x896xf32>
    %154 = arith.mulf %151, %153 : vector<8x896xf32>
    %155 = arith.addf %140, %154 : vector<8x896xf32>
    %c16_100 = arith.constant 16 : index
    %c129_101 = arith.constant 129 : index
    %156 = vector.load %arg7[%c16_100, %c129_101] : memref<24x1152xf32, #tpu.memory_space<vmem>>, vector<8x896xf32>
    %c16_102 = arith.constant 16 : index
    %c13_103 = arith.constant 13 : index
    %157 = vector.load %arg4[%c16_102, %c13_103] : memref<24x25xf32, #tpu.memory_space<vmem>>, vector<8x1xf32>
    %158 = vector.broadcast %157 : vector<8x1xf32> to vector<8x896xf32>
    %159 = arith.mulf %156, %158 : vector<8x896xf32>
    %160 = arith.addf %145, %159 : vector<8x896xf32>
    %c8_104 = arith.constant 8 : index
    %c130 = arith.constant 130 : index
    %161 = vector.load %arg7[%c8_104, %c130] : memref<24x1152xf32, #tpu.memory_space<vmem>>, vector<8x896xf32>
    %c8_105 = arith.constant 8 : index
    %c14 = arith.constant 14 : index
    %162 = vector.load %arg4[%c8_105, %c14] : memref<24x25xf32, #tpu.memory_space<vmem>>, vector<8x1xf32>
    %163 = vector.broadcast %162 : vector<8x1xf32> to vector<8x896xf32>
    %164 = arith.mulf %161, %163 : vector<8x896xf32>
    %165 = arith.addf %150, %164 : vector<8x896xf32>
    %c8_106 = arith.constant 8 : index
    %c146 = arith.constant 146 : index
    %166 = vector.load %arg7[%c8_106, %c146] : memref<24x1152xf32, #tpu.memory_space<vmem>>, vector<8x896xf32>
    %c8_107 = arith.constant 8 : index
    %c15 = arith.constant 15 : index
    %167 = vector.load %arg4[%c8_107, %c15] : memref<24x25xf32, #tpu.memory_space<vmem>>, vector<8x1xf32>
    %168 = vector.broadcast %167 : vector<8x1xf32> to vector<8x896xf32>
    %169 = arith.mulf %166, %168 : vector<8x896xf32>
    %170 = arith.addf %165, %169 : vector<8x896xf32>
    %c8_108 = arith.constant 8 : index
    %c147 = arith.constant 147 : index
    %171 = vector.load %arg7[%c8_108, %c147] : memref<24x1152xf32, #tpu.memory_space<vmem>>, vector<8x896xf32>
    %c8_109 = arith.constant 8 : index
    %c16_110 = arith.constant 16 : index
    %172 = vector.load %arg4[%c8_109, %c16_110] : memref<24x25xf32, #tpu.memory_space<vmem>>, vector<8x1xf32>
    %173 = vector.broadcast %172 : vector<8x1xf32> to vector<8x896xf32>
    %174 = arith.mulf %171, %173 : vector<8x896xf32>
    %175 = arith.addf %170, %174 : vector<8x896xf32>
    %c0_111 = arith.constant 0 : index
    %c147_112 = arith.constant 147 : index
    %176 = vector.load %arg7[%c0_111, %c147_112] : memref<24x1152xf32, #tpu.memory_space<vmem>>, vector<8x896xf32>
    %c0_113 = arith.constant 0 : index
    %c16_114 = arith.constant 16 : index
    %177 = vector.load %arg4[%c0_113, %c16_114] : memref<24x25xf32, #tpu.memory_space<vmem>>, vector<8x1xf32>
    %178 = vector.broadcast %177 : vector<8x1xf32> to vector<8x896xf32>
    %179 = arith.mulf %176, %178 : vector<8x896xf32>
    %180 = arith.addf %155, %179 : vector<8x896xf32>
    %c16_115 = arith.constant 16 : index
    %c147_116 = arith.constant 147 : index
    %181 = vector.load %arg7[%c16_115, %c147_116] : memref<24x1152xf32, #tpu.memory_space<vmem>>, vector<8x896xf32>
    %c16_117 = arith.constant 16 : index
    %c16_118 = arith.constant 16 : index
    %182 = vector.load %arg4[%c16_117, %c16_118] : memref<24x25xf32, #tpu.memory_space<vmem>>, vector<8x1xf32>
    %183 = vector.broadcast %182 : vector<8x1xf32> to vector<8x896xf32>
    %184 = arith.mulf %181, %183 : vector<8x896xf32>
    %185 = arith.addf %160, %184 : vector<8x896xf32>
    %c8_119 = arith.constant 8 : index
    %c148 = arith.constant 148 : index
    %186 = vector.load %arg7[%c8_119, %c148] : memref<24x1152xf32, #tpu.memory_space<vmem>>, vector<8x896xf32>
    %c8_120 = arith.constant 8 : index
    %c17 = arith.constant 17 : index
    %187 = vector.load %arg4[%c8_120, %c17] : memref<24x25xf32, #tpu.memory_space<vmem>>, vector<8x1xf32>
    %188 = vector.broadcast %187 : vector<8x1xf32> to vector<8x896xf32>
    %189 = arith.mulf %186, %188 : vector<8x896xf32>
    %190 = arith.addf %175, %189 : vector<8x896xf32>
    %c0_121 = arith.constant 0 : index
    %c148_122 = arith.constant 148 : index
    %191 = vector.load %arg7[%c0_121, %c148_122] : memref<24x1152xf32, #tpu.memory_space<vmem>>, vector<8x896xf32>
    %c0_123 = arith.constant 0 : index
    %c17_124 = arith.constant 17 : index
    %192 = vector.load %arg4[%c0_123, %c17_124] : memref<24x25xf32, #tpu.memory_space<vmem>>, vector<8x1xf32>
    %193 = vector.broadcast %192 : vector<8x1xf32> to vector<8x896xf32>
    %194 = arith.mulf %191, %193 : vector<8x896xf32>
    %195 = arith.addf %180, %194 : vector<8x896xf32>
    %c16_125 = arith.constant 16 : index
    %c148_126 = arith.constant 148 : index
    %196 = vector.load %arg7[%c16_125, %c148_126] : memref<24x1152xf32, #tpu.memory_space<vmem>>, vector<8x896xf32>
    %c16_127 = arith.constant 16 : index
    %c17_128 = arith.constant 17 : index
    %197 = vector.load %arg4[%c16_127, %c17_128] : memref<24x25xf32, #tpu.memory_space<vmem>>, vector<8x1xf32>
    %198 = vector.broadcast %197 : vector<8x1xf32> to vector<8x896xf32>
    %199 = arith.mulf %196, %198 : vector<8x896xf32>
    %200 = arith.addf %185, %199 : vector<8x896xf32>
    %c8_129 = arith.constant 8 : index
    %c149 = arith.constant 149 : index
    %201 = vector.load %arg7[%c8_129, %c149] : memref<24x1152xf32, #tpu.memory_space<vmem>>, vector<8x896xf32>
    %c8_130 = arith.constant 8 : index
    %c18 = arith.constant 18 : index
    %202 = vector.load %arg4[%c8_130, %c18] : memref<24x25xf32, #tpu.memory_space<vmem>>, vector<8x1xf32>
    %203 = vector.broadcast %202 : vector<8x1xf32> to vector<8x896xf32>
    %204 = arith.mulf %201, %203 : vector<8x896xf32>
    %205 = arith.addf %190, %204 : vector<8x896xf32>
    %c0_131 = arith.constant 0 : index
    %c149_132 = arith.constant 149 : index
    %206 = vector.load %arg7[%c0_131, %c149_132] : memref<24x1152xf32, #tpu.memory_space<vmem>>, vector<8x896xf32>
    %c0_133 = arith.constant 0 : index
    %c18_134 = arith.constant 18 : index
    %207 = vector.load %arg4[%c0_133, %c18_134] : memref<24x25xf32, #tpu.memory_space<vmem>>, vector<8x1xf32>
    %208 = vector.broadcast %207 : vector<8x1xf32> to vector<8x896xf32>
    %209 = arith.mulf %206, %208 : vector<8x896xf32>
    %210 = arith.addf %195, %209 : vector<8x896xf32>
    %c16_135 = arith.constant 16 : index
    %c149_136 = arith.constant 149 : index
    %211 = vector.load %arg7[%c16_135, %c149_136] : memref<24x1152xf32, #tpu.memory_space<vmem>>, vector<8x896xf32>
    %c16_137 = arith.constant 16 : index
    %c18_138 = arith.constant 18 : index
    %212 = vector.load %arg4[%c16_137, %c18_138] : memref<24x25xf32, #tpu.memory_space<vmem>>, vector<8x1xf32>
    %213 = vector.broadcast %212 : vector<8x1xf32> to vector<8x896xf32>
    %214 = arith.mulf %211, %213 : vector<8x896xf32>
    %215 = arith.addf %200, %214 : vector<8x896xf32>
    %c8_139 = arith.constant 8 : index
    %c150 = arith.constant 150 : index
    %216 = vector.load %arg7[%c8_139, %c150] : memref<24x1152xf32, #tpu.memory_space<vmem>>, vector<8x896xf32>
    %c8_140 = arith.constant 8 : index
    %c19 = arith.constant 19 : index
    %217 = vector.load %arg4[%c8_140, %c19] : memref<24x25xf32, #tpu.memory_space<vmem>>, vector<8x1xf32>
    %218 = vector.broadcast %217 : vector<8x1xf32> to vector<8x896xf32>
    %219 = arith.mulf %216, %218 : vector<8x896xf32>
    %220 = arith.addf %205, %219 : vector<8x896xf32>
    %c8_141 = arith.constant 8 : index
    %c166 = arith.constant 166 : index
    %221 = vector.load %arg7[%c8_141, %c166] : memref<24x1152xf32, #tpu.memory_space<vmem>>, vector<8x896xf32>
    %c8_142 = arith.constant 8 : index
    %c20 = arith.constant 20 : index
    %222 = vector.load %arg4[%c8_142, %c20] : memref<24x25xf32, #tpu.memory_space<vmem>>, vector<8x1xf32>
    %223 = vector.broadcast %222 : vector<8x1xf32> to vector<8x896xf32>
    %224 = arith.mulf %221, %223 : vector<8x896xf32>
    %225 = arith.addf %220, %224 : vector<8x896xf32>
    %c8_143 = arith.constant 8 : index
    %c167 = arith.constant 167 : index
    %226 = vector.load %arg7[%c8_143, %c167] : memref<24x1152xf32, #tpu.memory_space<vmem>>, vector<8x896xf32>
    %c8_144 = arith.constant 8 : index
    %c21 = arith.constant 21 : index
    %227 = vector.load %arg4[%c8_144, %c21] : memref<24x25xf32, #tpu.memory_space<vmem>>, vector<8x1xf32>
    %228 = vector.broadcast %227 : vector<8x1xf32> to vector<8x896xf32>
    %229 = arith.mulf %226, %228 : vector<8x896xf32>
    %230 = arith.addf %225, %229 : vector<8x896xf32>
    %c8_145 = arith.constant 8 : index
    %c168 = arith.constant 168 : index
    %231 = vector.load %arg7[%c8_145, %c168] : memref<24x1152xf32, #tpu.memory_space<vmem>>, vector<8x896xf32>
    %c8_146 = arith.constant 8 : index
    %c22 = arith.constant 22 : index
    %232 = vector.load %arg4[%c8_146, %c22] : memref<24x25xf32, #tpu.memory_space<vmem>>, vector<8x1xf32>
    %233 = vector.broadcast %232 : vector<8x1xf32> to vector<8x896xf32>
    %234 = arith.mulf %231, %233 : vector<8x896xf32>
    %235 = arith.addf %230, %234 : vector<8x896xf32>
    %c8_147 = arith.constant 8 : index
    %c169 = arith.constant 169 : index
    %236 = vector.load %arg7[%c8_147, %c169] : memref<24x1152xf32, #tpu.memory_space<vmem>>, vector<8x896xf32>
    %c8_148 = arith.constant 8 : index
    %c23 = arith.constant 23 : index
    %237 = vector.load %arg4[%c8_148, %c23] : memref<24x25xf32, #tpu.memory_space<vmem>>, vector<8x1xf32>
    %238 = vector.broadcast %237 : vector<8x1xf32> to vector<8x896xf32>
    %239 = arith.mulf %236, %238 : vector<8x896xf32>
    %240 = arith.addf %235, %239 : vector<8x896xf32>
    %c8_149 = arith.constant 8 : index
    %c170 = arith.constant 170 : index
    %241 = vector.load %arg7[%c8_149, %c170] : memref<24x1152xf32, #tpu.memory_space<vmem>>, vector<8x896xf32>
    %c8_150 = arith.constant 8 : index
    %c24_151 = arith.constant 24 : index
    %242 = vector.load %arg4[%c8_150, %c24_151] : memref<24x25xf32, #tpu.memory_space<vmem>>, vector<8x1xf32>
    %243 = vector.broadcast %242 : vector<8x1xf32> to vector<8x896xf32>
    %244 = arith.mulf %241, %243 : vector<8x896xf32>
    %245 = arith.addf %240, %244 : vector<8x896xf32>
    %246 = vector.broadcast %1 : vector<8x1xf32> to vector<8x896xf32>
    %247 = arith.addf %210, %246 : vector<8x896xf32>
    %248 = arith.negf %247 : vector<8x896xf32>
    %249 = math.exp %248 : vector<8x896xf32>
    %cst_152 = arith.constant 1.000000e+00 : f32
    %250 = vector.broadcast %cst_152 : f32 to vector<8x896xf32>
    %251 = arith.addf %250, %249 : vector<8x896xf32>
    %252 = arith.divf %250, %251 : vector<8x896xf32>
    %253 = arith.mulf %247, %252 : vector<8x896xf32>
    %c16_153 = arith.constant 16 : index
    %c0_154 = arith.constant 0 : index
    %254 = vector.load %arg8[%c16_153, %c0_154] : memref<32x896xf32, #tpu.memory_space<vmem>>, vector<8x896xf32>
    tpu.vector_store %arg8[%c16_153, %c0_154], %253 {strides = array<i32>} : memref<32x896xf32, #tpu.memory_space<vmem>>, vector<8x896xf32>,
    %255 = vector.broadcast %2 : vector<8x1xf32> to vector<8x896xf32>
    %256 = arith.addf %245, %255 : vector<8x896xf32>
    %257 = arith.negf %256 : vector<8x896xf32>
    %258 = math.exp %257 : vector<8x896xf32>
    %cst_155 = arith.constant 1.000000e+00 : f32
    %259 = vector.broadcast %cst_155 : f32 to vector<8x896xf32>
    %260 = arith.addf %259, %258 : vector<8x896xf32>
    %261 = arith.divf %259, %260 : vector<8x896xf32>
    %262 = arith.mulf %256, %261 : vector<8x896xf32>
    %c24_156 = arith.constant 24 : index
    %c0_157 = arith.constant 0 : index
    %263 = vector.load %arg8[%c24_156, %c0_157] : memref<32x896xf32, #tpu.memory_space<vmem>>, vector<8x896xf32>
    tpu.vector_store %arg8[%c24_156, %c0_157], %262 {strides = array<i32>} : memref<32x896xf32, #tpu.memory_space<vmem>>, vector<8x896xf32>,
    %264 = vector.broadcast %3 : vector<8x1xf32> to vector<8x896xf32>
    %265 = arith.addf %215, %264 : vector<8x896xf32>
    %c0_158 = arith.constant 0 : index
    %c0_159 = arith.constant 0 : index
    %266 = vector.load %arg3[%c0_158, %c0_159] : memref<32x32xbf16, #tpu.memory_space<vmem>>, vector<32x32xbf16>
    %c0_160 = arith.constant 0 : index
    %c0_161 = arith.constant 0 : index
    %267 = vector.load %arg8[%c0_160, %c0_161] : memref<32x896xf32, #tpu.memory_space<vmem>>, vector<32x896xf32>
    %268 = arith.truncf %267 : vector<32x896xf32> to vector<32x896xbf16>
    %cst_162 = arith.constant dense<0.000000e+00> : vector<32x896xf32>
    %269 = tpu.matmul %266, %268, %cst_162 {dimension_numbers = #tpu.dot_dimension_numbers<[1], [0], [0], [1], [0, 0, 1, 1], [], []>} : vector<32x32xbf16>, vector<32x896xbf16>, vector<32x896xf32> -> vector<32x896xf32>
    %270 = vector.broadcast %4 : vector<32x1xf32> to vector<32x896xf32>
    %271 = arith.addf %269, %270 : vector<32x896xf32>
    %272 = arith.negf %271 : vector<32x896xf32>
    %273 = math.exp %272 : vector<32x896xf32>
    %cst_163 = arith.constant 1.000000e+00 : f32
    %274 = vector.broadcast %cst_163 : f32 to vector<32x896xf32>
    %275 = arith.addf %274, %273 : vector<32x896xf32>
    %276 = arith.divf %274, %275 : vector<32x896xf32>
    %277 = arith.mulf %271, %276 : vector<32x896xf32>
    %c16_164 = arith.constant 16 : index
    %c0_165 = arith.constant 0 : index
    %278 = vector.load %arg2[%c16_164, %c0_165] : memref<48x8xbf16, #tpu.memory_space<vmem>>, vector<32x8xbf16>
    %279 = arith.truncf %265 : vector<8x896xf32> to vector<8x896xbf16>
    %cst_166 = arith.constant dense<0.000000e+00> : vector<32x896xf32>
    %280 = tpu.matmul %278, %279, %cst_166 {dimension_numbers = #tpu.dot_dimension_numbers<[1], [0], [0], [1], [0, 0, 1, 1], [], []>} : vector<32x8xbf16>, vector<8x896xbf16>, vector<32x896xf32> -> vector<32x896xf32>
    %281 = vector.broadcast %5 : vector<32x1xf32> to vector<32x896xf32>
    %282 = arith.addf %280, %281 : vector<32x896xf32>
    %283 = arith.addf %277, %282 : vector<32x896xf32>
    %c0_167 = arith.constant 0 : index
    %c0_168 = arith.constant 0 : index
    %284 = vector.load %arg6[%c0_167, %c0_168] : memref<32x896xf32, #tpu.memory_space<vmem>>, vector<32x896xf32>
    tpu.vector_store %arg6[%c0_167, %c0_168], %283 {strides = array<i32>} : memref<32x896xf32, #tpu.memory_space<vmem>>, vector<32x896xf32>,
    return
  }
}

</mosaic_0001>

<bundles_post_ra>
// kernel: msgaconv_forward.1
= control target key start
LH: loop header
LB: loop body
LE: loop exit
PB: predicated region body
PF: predicated region fallthrough
CT: control target
= control target key end

     0   :  { %v7884_v0 = vmov 0   ;;  %vm8070_vm0 = vcmask 1043456   ;;  %vm8069_vm1 = vcmask 64512   ;;  %v4542_v22 = vmov 0.0   ;;  %s4555_s25 = smov 127   ;;  %s4556_s26 = smov 125   ;;  %s7877_s5 = inlined_call_operand.vmem [shape: f32[104,1], index: 5, kind: input, shape index: {}]   ;;  %s7878_s0 = inlined_call_operand.vmem [shape: f32[8,896], index: 0, kind: input, shape index: {}]   ;;  %s7879_s4 = inlined_call_operand.vmem [shape: f32[24,25], index: 4, kind: input, shape index: {}]   ;;  %s7880_s2 = inlined_call_operand.vmem [shape: bf16[48,8], index: 2, kind: input, shape index: {}]   ;;  %s7881_s1 = inlined_call_operand.vmem [shape: f32[1,896], index: 1, kind: input, shape index: {}]   ;;  %s7882_s3 = inlined_call_operand.vmem [shape: bf16[32,32], index: 3, kind: input, shape index: {}]   ;;  %s7883_s6 = inlined_call_operand.vmem [shape: f32[32,896], index: 6, kind: output, shape index: {}]  }
   0x1   :  { %4208 = vset.pattern.permute.xlu0 %v7884_v0  ;;  %v24_v1 = vld [vmem:[%s7877_s5] sm:$0xff]  ;;  %v4636_v2 = vld [vmem:[%s7878_s0 + $0x8] sm:$0xff]  ;;  %v4641_v3 = vld [vmem:[%s7878_s0 + $0x18] sm:$0xff]  ;;  %126 = vmatprep.mubr.bf16.mxu0 %v7884_v0  ;;  %v4543_v24 = vmov 2   ;;  %vm4544_vm2 = vmmov 0   ;;  %v4545_v25 = vmov 1   ;;  %v364_v36 = vlaneseq }
   0x2   :  { %55 = vperm.xlu0 %4208, %v24_v1   ;;  %v47_v4 = vpack.c.bf16 %v4636_v2, %v4636_v2  ;;  %v49_v5 = vpack.c.bf16 %v4641_v3, %v4641_v3  ;;  %v4651_v6 = vld [vmem:[%s7878_s0] sm:$0xff]  ;;  %v4656_v7 = vld [vmem:[%s7878_s0 + $0x10] sm:$0xff]  ;;  %169 = vmatprep.mubr.bf16.mxu1 %v7884_v0  ;;  %v25_v10 = vld [vmem:[%s7877_s5 + $0x8] sm:$0xff]  ;;  %v4546_v26 = vmov 3   ;;  %v4547_v28 = vmov 6   ;;  %s4557_s27 = smov 124  }
   0x3   :  { %v46_v8 = vpack.c.bf16 %v4651_v6, %v4651_v6  ;;  %v48_v9 = vpack.c.bf16 %v4656_v7, %v4656_v7  ;;  %4209 = vset.pattern.permute.xlu1 %v7884_v0  ;;  %v4672_v11 = vld [vmem:[%s7879_s4 + $0x8] sm:$0xff]  ;;  %v4682_v13 = vld [vmem:[%s7878_s0 + $0x20] sm:$0xff]  ;;  %v4696_v19 = vld [vmem:[%s7878_s0 + $0x30] sm:$0xff]  ;;  %v4548_v29 = vmov 4   ;;  %v4549_v30 = vmov 7   ;;  %s4558_s28 = smov 108  }
   0x4   :  { %4037 = vmatprep.subr.msk.bf16.mxu0 %vm8070_vm0, %v47_v4  ;;  %4039 = vmatprep.subr.msk.bf16.mxu1 %vm8070_vm0, %v49_v5  ;;  %v4677_v12 = vld [vmem:[%s7878_s0 + $0x28] sm:$0xff]  ;;  %v4280_v16 = vld [vmem:[%s7880_s2] sm:$0xff]   ;;  %v50_v18 = vpack.c.bf16 %v4682_v13, %v4682_v13  ;;  %v52_v20 = vpack.c.bf16 %v4696_v19, %v4696_v19  ;;  %v882_v27 = vld [vmem:[%s7879_s4 + $0x10] sm:$0xff]  ;;  %v4550_v31 = vmov 5   ;;  %v4551_v32 = vmov 8   ;;  %s4559_s29 = smov 107  }
   0x5   :  { %v74_v14 = vsel %vm8070_vm0, %v46_v8, 0  ;;  %v80_v15 = vsel %vm8070_vm0, %v48_v9, 0  ;;  %v51_v17 = vpack.c.bf16 %v4677_v12, %v4677_v12  ;;  %465 = vperm.xlu1 %4209, %v4672_v11   ;;  %v852_v33 = vld [vmem:[%s7879_s4] sm:$0xff]  ;;  %v4552_v34 = vmov 9   ;;  %s4560_s30 = smov 106   ;;  %s4561_s7 = smov 105  }
   0x6   :  { %95 = vmatpush1.bf16.msra.mxu0 %v74_v14  ;;  %138 = vmatpush1.bf16.msra.mxu1 %v80_v15  ;;  %v86_v21 = vsel %vm8070_vm0, %v50_v18, 0  ;;  %v92_v23 = vsel %vm8070_vm0, %v52_v20, 0  ;;  %v4553_v35 = vmov 10   ;;  %v4727_v37 = vshrl.u32 %v364_v36, 7  ;;  %v4735_v40 = vld [vmem:[%s7881_s1] sm:$0xff]  ;;  %s4554_s1 = smov 126  }
   0x7   :  { %60 = vperm.xlu0 %4208, %v25_v10   ;;  %4041 = vmatprep.subr.msk.bf16.mxu0 %vm8070_vm0, %v51_v17  ;;  %s4562_s8 = smov 104   ;;  %s4563_s9 = smov 88   ;;  %vm520_vm3 = vcmask 1039360   ;;  %vm8096_vm4 = vcmask 1031168   ;;  %vm8094_vm5 = vcmask 1022976   ;;  %vm8090_vm6 = vcmask 1014784  }
   0x8   :  { %4134 = vmatprep.subr.bf16.mxu1 %v4542_v22  ;;  %v382_v39 = vsub.s32 4, %v4727_v37  ;;  %v390_v41 = vsub.s32 6, %v4727_v37  ;;  %v386_v43 = vsub.s32 5, %v4727_v37  ;;  %s4565_s12 = smov 87   ;;  %s4581_s10 = smov 84   ;;  %vm8079_vm7 = vcmask 883712  }
   0x9   :  { %4038 = vmatmul.mubr.msk.bf16.vlgmr.msra.gmra.mrb[0].mxu0 %vm8069_vm1, %v4280_v16  ;;  %4040 = vmatmul.mubr.msk.bf16.vlgmr.msra.gmra.mrb[0].mxu1 %vm8069_vm1, %v4280_v16  ;;  %s4582_s11 = smov 68   ;;  %s4583_s13 = smov 67   ;;  %vm8073_vm8 = vcmask 875520   ;;  %vm940_vm9 = vcmask 867328   ;;  %vm8072_vm10 = vcmask 859136   ;;  %vm8071_vm11 = vcmask 850944  }
   0xa   :  { %181 = vmatpush1.bf16.msra.mxu0 %v86_v21  ;;  %4135 = vmatpush3.bf16.msra.mxu1 %v92_v23  ;;  %v4739_v42 = vrot.slane %v4735_v40, %v382_v39  ;;  %v4743_v44 = vrot.slane %v4735_v40, %v390_v41  ;;  %v4748_v46 = vrot.slane %v4735_v40, %v386_v43  ;;  %s4584_s14 = smov 66   ;;  %s4585_s15 = smov 65   ;;  %vm1356_vm12 = vcmask 719872  }
   0xb   :  { %4211 = vset.pattern.permute.xlu0 %v4543_v24  ;;  %212 = vmatprep.mubr.bf16.mxu0 %v7884_v0  ;;  %s4586_s16 = smov 64   ;;  %s4588_s17 = smov 47   ;;  %vm1416_vm13 = vcmask 711680   ;;  %vm1590_vm14 = vcmask 703488   ;;  %vm8086_vm15 = vcmask 695296   ;;  %vm2079_vm0 = vcmask 547840  }
   0xc   :  { %545 = vperm.xlu0 %4211, %v4672_v11   ;;  %4136 = vmatprep.mubr.msk.bf16.mxu1 %vm4544_vm2, %v4542_v22  ;;  %s4589_s18 = smov 46   ;;  %s4590_s23 = smov 45   ;;  %vm1959_vm2 = vcmask 687104  }
   0xd   :  { %4210 = vset.pattern.permute.xlu1 %v4545_v25  ;;  %s4591_s24 = smov 44  }
   0xe   :  { %485 = vperm.xlu1 %4210, %v4672_v11  }
  0x10   :  { %4212 = vset.pattern.permute.xlu0 %v4546_v26 }
  0x11   :  { %605 = vperm.xlu0 %4212, %v4672_v11   ;;  %4042 = vmatmul.mubr.msk.bf16.vlgmr.msra.gmra.mrb[4].mxu0 %vm8069_vm1, %v4280_v16 }
  0x12   :  { %4137 = vmatmul.mubr.msk.bf16.vlgmr.msra.gmra.mrb[4].mxu1 %vm8069_vm1, %v4280_v16  ;;  %4216 = vset.pattern.permute.xlu1 %v4547_v28  ;;  %vm2019_vm1 = vcmask 556032  }
  0x13   :  { %885 = vperm.xlu1 %4216, %v882_v27   ;;  %3295 = vmatprep.mubr.bf16.mxu0 %v7884_v0 }
  0x14   :  { %3348 = vmatprep.mubr.bf16.mxu1 %v7884_v0 }
  0x15   :  { %4213 = vset.pattern.permute.xlu0 %v4548_v29 }
  0x16   :  { %665 = vperm.xlu0 %4213, %v4672_v11  }
  0x17   :  { %4218 = vset.pattern.permute.xlu1 %v4549_v30 }
  0x18   :  { %1024 = vperm.xlu1 %4218, %v882_v27  }
  0x1a   :  { %4214 = vset.pattern.permute.xlu0 %v4550_v31 }
  0x1b   :  { %725 = vperm.xlu0 %4214, %v4672_v11  }
  0x1c   :  { %4220 = vset.pattern.permute.xlu1 %v4551_v32 }
  0x1d   :  { %1202 = vperm.xlu1 %4220, %v882_v27  }
  0x1f   :  { %4215 = vset.pattern.permute.xlu0 %v4547_v28 }
  0x20   :  { %785 = vperm.xlu0 %4215, %v4672_v11  }
  0x24   :  { %855 = vperm.xlu0 %4215, %v852_v33  }
  0x28   :  { %4217 = vset.pattern.permute.xlu0 %v4549_v30 }
  0x29   :  { %905 = vperm.xlu0 %4217, %v4672_v11  }
  0x2d   :  { %965 = vperm.xlu0 %4217, %v852_v33  }
  0x31   :  { %4219 = vset.pattern.permute.xlu0 %v4551_v32 }
  0x32   :  { %1083 = vperm.xlu0 %4219, %v4672_v11  }
  0x36   :  { %1143 = vperm.xlu0 %4219, %v852_v33  }
  0x3a   :  { %4221 = vset.pattern.permute.xlu0 %v4552_v34 }
  0x3b   :  { %1261 = vperm.xlu0 %4221, %v4672_v11  }
  0x3f   :  { %4222 = vset.pattern.permute.xlu0 %v4553_v35 }
  0x40   :  { %1321 = vperm.xlu0 %4222, %v4672_v11  }
  0x81   :  { %v4729_v38 = vpop.permute.xlu0 %55 }
  0x84   :  { %v4750_v47 = vpop.permute.xlu1 %465 }
  0x85   :  { %8110 = vst [vmem:[#allocation4_spill] sm:$0xff] %v4750_v47 }
  0x86   :  { %v4745_v45 = vpop.permute.xlu0 %60 }
  0x8b   :  { %v4752_v48 = vpop.permute.xlu0 %545 }
  0x8c   :  { %v548_v49 = vmul.f32 0.0, %v4752_v48 }
  0x8d   :  { %v4755_v50 = vpop.permute.xlu1 %485 }
  0x8e   :  { %564 = vrot.lane.b32.xlu1 %v548_v49, %s4554_s1  ;;  %v488_v51 = vmul.f32 0.0, %v4755_v50 }
  0x90   :  { %v4759_v52 = vpop.permute.xlu0 %605  ;;  %504 = vrot.lane.b32.xlu0 %v488_v51, %s4555_s25 }
  0x91   :  { %v608_v53 = vmul.f32 0.0, %v4759_v52 }
  0x92   :  { %v4763_v54 = vpop.permute.xlu1 %885 }
  0x93   :  { %8111 = vst [vmem:[#allocation5_spill] sm:$0xff] %v4763_v54  ;;  %624 = vrot.lane.b32.xlu1 %v608_v53, %s4556_s26 }
  0x95   :  { %v4766_v55 = vpop.permute.xlu0 %665 }
  0x96   :  { %v668_v56 = vmul.f32 0.0, %v4766_v55 }
  0x97   :  { %v1025_v57 = vpop.permute.xlu1 %1024 }
  0x98   :  { %684 = vrot.lane.b32.xlu1 %v668_v56, %s4557_s27  ;;  %v1027_v58 = vmul.f32 0.0, %v1025_v57  ;;  %v1029_v60 = vmul.f32 %v1025_v57, %v4636_v2  ;;  %v1031_v62 = vmul.f32 %v1025_v57, %v4641_v3  ;;  %v1033_v4 = vmul.f32 %v1025_v57, %v4677_v12 }
  0x99   :  { %v1028_v18 = vmul.f32 %v1025_v57, %v4651_v6  ;;  %v1032_v21 = vmul.f32 %v1025_v57, %v4682_v13 }
  0x9a   :  { %v4770_v59 = vpop.permute.xlu0 %725  ;;  %1043 = vrot.lane.b32.xlu0 %v1027_v58, %s4555_s25 }
  0x9b   :  { %v728_v61 = vmul.f32 0.0, %v4770_v59 }
  0x9c   :  { %v1203_v8 = vpop.permute.xlu1 %1202 }
  0x9d   :  { %744 = vrot.lane.b32.xlu1 %v728_v61, %s4558_s28  ;;  %v1205_v9 = vmul.f32 0.0, %v1203_v8  ;;  %v1207_v14 = vmul.f32 %v1203_v8, %v4636_v2  ;;  %v1209_v17 = vmul.f32 %v1203_v8, %v4641_v3  ;;  %v1211_v20 = vmul.f32 %v1203_v8, %v4677_v12 }
  0x9e   :  { %1047 = vrot.lane.b32.xlu0 %v1029_v60, %s4555_s25  ;;  %v1030_v2 = vmul.f32 %v1025_v57, %v4656_v7  ;;  %v1034_v3 = vmul.f32 %v1025_v57, %v4696_v19  ;;  %v1206_v25 = vmul.f32 %v1203_v8, %v4651_v6  ;;  %v1208_v26 = vmul.f32 %v1203_v8, %v4656_v7 }
  0x9f   :  { %v4778_v63 = vpop.permute.xlu0 %785  ;;  %v1210_v27 = vmul.f32 %v1203_v8, %v4682_v13  ;;  %v1212_v29 = vmul.f32 %v1203_v8, %v4696_v19 }
  0xa0   :  { %v788_v1 = vmul.f32 0.0, %v4778_v63 }
  0xa2   :  { %804 = vrot.lane.b32.xlu1 %v788_v1, %s4559_s29  ;;  %1051 = vrot.lane.b32.xlu0 %v1031_v62, %s4555_s25 }
  0xa3   :  { %v4784_v5 = vpop.permute.xlu0 %855 }
  0xa4   :  { %8112 = vst [vmem:[#allocation6_spill] sm:$0xff] %v4784_v5 }
  0xa6   :  { %1055 = vrot.lane.b32.xlu0 %v1033_v4, %s4555_s25 }
  0xa8   :  { %v4787_v10 = vpop.permute.xlu0 %905 }
  0xa9   :  { %v908_v11 = vmul.f32 0.0, %v4787_v10 }
  0xaa   :  { %1221 = vrot.lane.b32.xlu0 %v1205_v9, %s4554_s1 }
  0xab   :  { %924 = vrot.lane.b32.xlu1 %v908_v11, %s4560_s30 }
  0xac   :  { %v4793_v15 = vpop.permute.xlu0 %965 }
  0xad   :  { %v968_v16 = vmul.f32 0.0, %v4793_v15 }
  0xae   :  { %1225 = vrot.lane.b32.xlu0 %v1207_v14, %s4554_s1 }
  0xaf   :  { %984 = vrot.lane.b32.xlu1 %v968_v16, %s4555_s25 }
  0xb1   :  { %v4807_v22 = vpop.permute.xlu0 %1083 }
  0xb2   :  { %1229 = vrot.lane.b32.xlu0 %v1209_v17, %s4554_s1  ;;  %v1086_v12 = vmul.f32 0.0, %v4807_v22 }
  0xb3   :  { %1045 = vrot.lane.b32.xlu1 %v1028_v18, %s4555_s25 }
  0xb5   :  { %v4813_v23 = vpop.permute.xlu0 %1143 }
  0xb6   :  { %1233 = vrot.lane.b32.xlu0 %v1211_v20, %s4554_s1  ;;  %v1146_v24 = vmul.f32 0.0, %v4813_v23 }
  0xb7   :  { %1049 = vrot.lane.b32.xlu1 %v1030_v2, %s4555_s25 }
  0xba   :  { %v4823_v28 = vpop.permute.xlu0 %1261 }
  0xbb   :  { %1053 = vrot.lane.b32.xlu1 %v1032_v21, %s4555_s25  ;;  %v1264_v30 = vmul.f32 0.0, %v4823_v28 }
  0xbf   :  { %1057 = vrot.lane.b32.xlu1 %v1034_v3, %s4555_s25  ;;  %v4829_v31 = vpop.permute.xlu0 %1321 }
  0xc0   :  { %v1324_v6 = vmul.f32 0.0, %v4829_v31 }
  0xc3   :  { %1102 = vrot.lane.b32.xlu1 %v1086_v12, %s4561_s7 }
  0xc7   :  { %1162 = vrot.lane.b32.xlu1 %v1146_v24, %s4554_s1 }
  0xcb   :  { %1223 = vrot.lane.b32.xlu1 %v1206_v25, %s4554_s1 }
  0xcf   :  { %1227 = vrot.lane.b32.xlu1 %v1208_v26, %s4554_s1 }
  0xd3   :  { %1231 = vrot.lane.b32.xlu1 %v1210_v27, %s4554_s1 }
  0xd7   :  { %1235 = vrot.lane.b32.xlu1 %v1212_v29, %s4554_s1 }
  0xdb   :  { %1280 = vrot.lane.b32.xlu1 %v1264_v30, %s4562_s8 }
  0xdc   :  { %v128_v7 = vpop.f32.mrb[0].mxu0  ;;  %v171_v32 = vpop.f32.mrb[0].mxu1 }
  0xdd   :  { %v4834_v13 = vadd.f32 %v128_v7, %v4729_v38  ;;  %v4837_v33 = vadd.f32 %v171_v32, %v4729_v38  ;;  %v130_v19 = vpop.f32.mrb[1].mxu0  ;;  %v173_v34 = vpop.f32.mrb[1].mxu1 }
  0xde   :  { %v4840_v35 = vadd.f32 %v130_v19, %v4729_v38  ;;  %v4843_v36 = vadd.f32 %v173_v34, %v4729_v38  ;;  %v132_v39 = vpop.f32.mrb[2].mxu0  ;;  %v175_v41 = vpop.f32.mrb[2].mxu1 }
  0xdf   :  { %v4044_v43 = vmul.f32 -1.442695, %v4834_v13  ;;  %v4046_v49 = vmul.f32 -1.442695, %v4837_v33  ;;  %v4848_v51 = vadd.f32 %v132_v39, %v4745_v45  ;;  %v4851_v53 = vadd.f32 %v175_v41, %v4745_v45  ;;  %v134_v56 = vpop.f32.mrb[3].mxu0  ;;  %v177_v57 = vpop.f32.mrb[3].mxu1  ;;  %1340 = vrot.lane.b32.xlu1 %v1324_v6, %s4563_s9 }
  0xe0   :  { %v4045_v58 = vmul.f32 -1.442695, %v4840_v35  ;;  %v4047_v60 = vmul.f32 -1.442695, %v4843_v36  ;;  %v4857_v61 = vadd.f32 %v134_v56, %v4745_v45  ;;  %v4860_v62 = vadd.f32 %v177_v57, %v4745_v45 }
  0xe1   :  { %4285 = vpow2.f32 %v4044_v43  ;;  %v4051_v1 = vmul.f32 -1.442695, %v4848_v51  ;;  %v4053_v4 = vmul.f32 -1.442695, %v4851_v53 }
  0xe2   :  { %4287 = vpow2.f32 %v4046_v49  ;;  %v4052_v8 = vmul.f32 -1.442695, %v4857_v61  ;;  %v4054_v9 = vmul.f32 -1.442695, %v4860_v62 }
  0xe3   :  { %4289 = vpow2.f32 %v4045_v58 }
  0xe4   :  { %4291 = vpow2.f32 %v4047_v60  ;;  %v214_v11 = vpop.f32.mrb[4].mxu0 }
  0xe5   :  { %4293 = vpow2.f32 %v4051_v1  ;;  %v4867_v14 = vadd.f32 %v214_v11, %v4729_v38  ;;  %v257_v16 = vpop.f32.mrb[4].mxu1  ;;  %v216_v17 = vpop.f32.mrb[5].mxu0 }
  0xe6   :  { %4295 = vpow2.f32 %v4053_v4  ;;  %v4870_v18 = vadd.f32 %v257_v16, %v4729_v38  ;;  %v4873_v20 = vadd.f32 %v216_v17, %v4729_v38  ;;  %v4138_v2 = vpop.f32.mrb[5].mxu1  ;;  %v218_v21 = vpop.f32.mrb[6].mxu0 }
  0xe7   :  { %4297 = vpow2.f32 %v4052_v8  ;;  %v4048_v3 = vmul.f32 -1.442695, %v4867_v14  ;;  %v4877_v12 = vadd.f32 %v218_v21, %v4745_v45  ;;  %v260_v24 = vpop.f32.mrb[6].mxu1  ;;  %v220_v25 = vpop.f32.mrb[7].mxu0  ;;  %v366_v8 = vsub.s32 0, %v4727_v37 }
  0xe8   :  { %4299 = vpow2.f32 %v4054_v9  ;;  %v4050_v26 = vmul.f32 -1.442695, %v4870_v18  ;;  %v4049_v27 = vmul.f32 -1.442695, %v4873_v20  ;;  %v4882_v29 = vadd.f32 %v260_v24, %v4745_v45  ;;  %v4139_v38 = vpop.f32.mrb[7].mxu1 }
  0xe9   :  { %4301 = vpow2.f32 %v4048_v3  ;;  %v4055_v30 = vmul.f32 -1.442695, %v4877_v12  ;;  %v4888_v17 = vadd.f32 %v220_v25, %v4745_v45  ;;  %v374_v24 = vsub.s32 2, %v4727_v37 }
  0xea   :  { %4303 = vpow2.f32 %v4050_v26  ;;  %v4057_v6 = vmul.f32 -1.442695, %v4882_v29  ;;  %v370_v26 = vsub.s32 1, %v4727_v37 }
  0xeb   :  { %v4286_v7 = vpop.eup %4285  ;;  %4305 = vpow2.f32 %v4049_v27  ;;  %v4056_v25 = vmul.f32 -1.442695, %v4888_v17 }
  0xec   :  { %v4288_v32 = vpop.eup %4287  ;;  %v306_v19 = vadd.f32 1.0, %v4286_v7  ;;  %4307 = vpow2.f32 %v4055_v30  ;;  %v367_v30 = vrot.slane %v4735_v40, %v366_v8 }
  0xed   :  { %v4290_v34 = vpop.eup %4289  ;;  %v308_v39 = vadd.f32 1.0, %v4288_v32  ;;  %4309 = vpow2.f32 %v4057_v6  ;;  %v378_v32 = vsub.s32 3, %v4727_v37 }
  0xee   :  { %v4292_v41 = vpop.eup %4291  ;;  %4311 = vrcp.f32 %v306_v19  ;;  %v307_v43 = vadd.f32 1.0, %v4290_v34 }
  0xef   :  { %v4294_v49 = vpop.eup %4293  ;;  %4313 = vrcp.f32 %v308_v39  ;;  %v309_v56 = vadd.f32 1.0, %v4292_v41 }
  0xf0   :  { %v4296_v57 = vpop.eup %4295  ;;  %4315 = vrcp.f32 %v307_v43  ;;  %v313_v58 = vadd.f32 1.0, %v4294_v49  ;;  %v375_v43 = vrot.slane %v4735_v40, %v374_v24  ;;  %v371_v49 = vrot.slane %v4735_v40, %v370_v26 }
  0xf1   :  { %v4298_v60 = vpop.eup %4297  ;;  %4317 = vrcp.f32 %v309_v56  ;;  %v315_v1 = vadd.f32 1.0, %v4296_v57 }
  0xf2   :  { %v4300_v4 = vpop.eup %4299  ;;  %4319 = vrcp.f32 %v313_v58  ;;  %v314_v9 = vadd.f32 1.0, %v4298_v60 }
  0xf3   :  { %v4302_v11 = vpop.eup %4301  ;;  %4321 = vrcp.f32 %v315_v1  ;;  %v316_v16 = vadd.f32 1.0, %v4300_v4  ;;  %v379_v1 = vrot.slane %v4735_v40, %v378_v32 }
  0xf4   :  { %v4304_v2 = vpop.eup %4303  ;;  %4323 = vrcp.f32 %v314_v9  ;;  %v310_v21 = vadd.f32 1.0, %v4302_v11 }
  0xf5   :  { %v4306_v3 = vpop.eup %4305  ;;  %4325 = vrcp.f32 %v316_v16  ;;  %v312_v27 = vadd.f32 1.0, %v4304_v2 }
  0xf6   :  { %v4308_v38 = vpop.eup %4307  ;;  %4327 = vrcp.f32 %v310_v21  ;;  %v311_v6 = vadd.f32 1.0, %v4306_v3 }
  0xf7   :  { %v4310_v7 = vpop.eup %4309  ;;  %4329 = vrcp.f32 %v312_v27  ;;  %v317_v45 = vadd.f32 1.0, %v4308_v38 }
  0xf8   :  { %v4312_v19 = vpop.eup %4311  ;;  %4331 = vrcp.f32 %v311_v6  ;;  %v319_v34 = vadd.f32 1.0, %v4310_v7 }
  0xf9   :  { %v4314_v39 = vpop.eup %4313  ;;  %v348_v41 = vmul.f32 %v4312_v19, %v4834_v13  ;;  %4333 = vrcp.f32 %v317_v45 }
  0xfa   :  { %v4316_v56 = vpop.eup %4315  ;;  %v350_v57 = vmul.f32 %v4314_v39, %v4837_v33  ;;  %4335 = vrcp.f32 %v319_v34 }
  0xfb   :  { %v4318_v37 = vpop.eup %4317  ;;  %v4899_v58 = vmul.f32 %v367_v30, %v348_v41  ;;  %v349_v60 = vmul.f32 %v4316_v56, %v4840_v35  ;;  %4337 = vpow2.f32 %v4056_v25 }
  0xfc   :  { %v4320_v4 = vpop.eup %4319  ;;  %v351_v13 = vmul.f32 %v4318_v37, %v4843_v36  ;;  %v4904_v9 = vmul.f32 %v375_v43, %v350_v57 }
  0xfd   :  { %v4322_v8 = vpop.eup %4321  ;;  %v4906_v11 = vmul.f32 %v371_v49, %v349_v60  ;;  %v355_v16 = vmul.f32 %v4320_v4, %v4848_v51  ;;  %v969_v33 = vmul.f32 %v4793_v15, %v4899_v58 }
  0xfe   :  { %v4324_v2 = vpop.eup %4323  ;;  %v357_v21 = vmul.f32 %v4322_v8, %v4851_v53  ;;  %v4912_v3 = vmul.f32 %v379_v1, %v351_v13  ;;  %v1149_v4 = vmul.f32 %v4813_v23, %v4904_v9 }
  0xff   :  { %v4326_v35 = vpop.eup %4325  ;;  %v356_v40 = vmul.f32 %v4324_v2, %v4857_v61  ;;  %986 = vrot.lane.b32.xlu0 %v969_v33, %s4555_s25  ;;  %v970_v36 = vmul.f32 %v4793_v15, %v4906_v11  ;;  %v4918_v26 = vmul.f32 %v367_v30, %v355_v16  ;;  %v971_v61 = vmul.f32 %v4793_v15, %v4904_v9 }
 0x100   :  { %v4328_v24 = vpop.eup %4327  ;;  %v358_v51 = vmul.f32 %v4326_v35, %v4860_v62  ;;  %v4921_v38 = vmul.f32 %v375_v43, %v357_v21  ;;  %v1147_v62 = vmul.f32 %v4813_v23, %v4899_v58  ;;  %v972_v34 = vmul.f32 %v4793_v15, %v4912_v3 }
 0x101   :  { %v4330_v27 = vpop.eup %4329  ;;  %v4923_v6 = vmul.f32 %v371_v49, %v356_v40  ;;  %v352_v53 = vmul.f32 %v4328_v24, %v4867_v14  ;;  %988 = vrot.lane.b32.xlu1 %v970_v36, %s4555_s25  ;;  %v489_v13 = vmul.f32 %v4755_v50, %v4918_v26  ;;  %v549_v40 = vmul.f32 %v4752_v48, %v4918_v26 }
 0x102   :  { %v4332_v7 = vpop.eup %4331  ;;  %v4929_v32 = vmul.f32 %v379_v1, %v358_v51  ;;  %v354_v30 = vmul.f32 %v4330_v27, %v4870_v18  ;;  %v3214_v37 = vpack.c.bf16 %v4921_v38, %v4904_v9  ;;  %v491_v2 = vmul.f32 %v4755_v50, %v4921_v38 }
 0x103   :  { %v4334_v45 = vpop.eup %4333  ;;  %v4935_v25 = vmul.f32 %v4739_v42, %v352_v53  ;;  %v353_v19 = vmul.f32 %v4332_v7, %v4873_v20  ;;  %v3213_v14 = vpack.c.bf16 %v4923_v6, %v4906_v11  ;;  %990 = vrot.lane.b32.xlu0 %v971_v61, %s4555_s25  ;;  %v3212_v20 = vpack.c.bf16 %v4918_v26, %v4899_v58 }
 0x104   :  { %v4336_v39 = vpop.eup %4335  ;;  %v4944_v18 = vmul.f32 %v4743_v44, %v354_v30  ;;  %v359_v41 = vmul.f32 %v4334_v45, %v4877_v12  ;;  %v3215_v43 = vpack.c.bf16 %v4929_v32, %v4912_v3  ;;  %v492_v8 = vmul.f32 %v4755_v50, %v4929_v32 }
 0x105   :  { %8113 = vst [vmem:[#allocation7_spill] sm:$0xff] %v4935_v25  ;;  %v4338_v49 = vpop.eup %4337  ;;  %v4952_v56 = vmul.f32 %v4748_v46, %v353_v19  ;;  %v361_v57 = vmul.f32 %v4336_v39, %v4882_v29  ;;  %3263 = vmatprep.subr.bf16.mxu0 %v3213_v14  ;;  %992 = vrot.lane.b32.xlu1 %v972_v34, %s4555_s25  ;;  %v4564_v36 = vmov 11  }
 0x106   :  { %8114 = vst [vmem:[#allocation8_spill] sm:$0xff] %v4944_v18  ;;  %v4959_v12 = vmul.f32 %v4739_v42, %v359_v41  ;;  %v318_v60 = vadd.f32 1.0, %v4338_v49  ;;  %3316 = vmatprep.subr.bf16.mxu1 %v3215_v43  ;;  %3264 = vmatpush1.bf16.msra.mxu0 %v3212_v20  ;;  %v1148_v29 = vmul.f32 %v4813_v23, %v4906_v11 }
 0x107   :  { %8115 = vst [vmem:[#allocation9_spill] sm:$0xff] %v4952_v56  ;;  %v4962_v1 = vmul.f32 %v4743_v44, %v361_v57  ;;  %3317 = vmatpush1.bf16.msra.mxu1 %v3214_v37  ;;  %1164 = vrot.lane.b32.xlu0 %v1147_v62, %s4554_s1  ;;  %v1150_v42 = vmul.f32 %v4813_v23, %v4912_v3  ;;  %v5052_v57 = vpop.permute.xlu0 %504 }
 0x108   :  { %8116 = vst [vmem:[#allocation10_spill] sm:$0xff] %v4959_v12  ;;  %4339 = vrcp.f32 %v318_v60  ;;  %v490_v44 = vmul.f32 %v4755_v50, %v4923_v6  ;;  %v550_v35 = vmul.f32 %v4752_v48, %v4923_v6  ;;  %4223 = vset.pattern.permute.xlu0 %v4564_v36  ;;  %4224 = vset.pattern.permute.xlu1 %v4564_v36 }
 0x109   :  { %8117 = vst [vmem:[#allocation11_spill] sm:$0xff] %v4962_v1  ;;  %1166 = vrot.lane.b32.xlu1 %v1148_v29, %s4554_s1  ;;  %v610_v24 = vmul.f32 %v4759_v52, %v4923_v6  ;;  %v609_v51 = vmul.f32 %v4759_v52, %v4918_v26  ;;  %v612_v27 = vmul.f32 %v4759_v52, %v4929_v32 }
 0x10a   :  { %v611_v53 = vmul.f32 %v4759_v52, %v4921_v38  ;;  %v670_v61 = vmul.f32 %v4766_v55, %v4923_v6  ;;  %v669_v7 = vmul.f32 %v4766_v55, %v4918_v26  ;;  %v672_v30 = vmul.f32 %v4766_v55, %v4929_v32 }
 0x10b   :  { %1168 = vrot.lane.b32.xlu0 %v1149_v4, %s4554_s1  ;;  %v671_v62 = vmul.f32 %v4766_v55, %v4921_v38  ;;  %v730_v45 = vmul.f32 %v4770_v59, %v4923_v6  ;;  %v729_v19 = vmul.f32 %v4770_v59, %v4918_v26  ;;  %v732_v14 = vmul.f32 %v4770_v59, %v4929_v32 }
 0x10c   :  { %v731_v34 = vmul.f32 %v4770_v59, %v4921_v38  ;;  %v790_v39 = vmul.f32 %v4778_v63, %v4923_v6  ;;  %v789_v41 = vmul.f32 %v4778_v63, %v4918_v26  ;;  %v792_v43 = vmul.f32 %v4778_v63, %v4929_v32  ;;  %v5063_v4 = vpop.permute.xlu0 %1043 }
 0x10d   :  { %1170 = vrot.lane.b32.xlu1 %v1150_v42, %s4554_s1  ;;  %v791_v20 = vmul.f32 %v4778_v63, %v4921_v38  ;;  %v910_v49 = vmul.f32 %v4787_v10, %v4923_v6  ;;  %v909_v37 = vmul.f32 %v4787_v10, %v4918_v26  ;;  %v912_v60 = vmul.f32 %v4787_v10, %v4929_v32 }
 0x10e   :  { %v911_v29 = vmul.f32 %v4787_v10, %v4921_v38  ;;  %8119 = vst [vmem:[#allocation13_spill] sm:$0xff] %v5063_v4  ;;  %v1088_v42 = vmul.f32 %v4807_v22, %v4923_v6  ;;  %v1267_v36 = vmul.f32 %v4823_v28, %v4921_v38 }
 0x10f   :  { %508 = vrot.lane.b32.xlu0 %v490_v44, %s4555_s25  ;;  %v1087_v44 = vmul.f32 %v4807_v22, %v4918_v26 }
 0x111   :  { %506 = vrot.lane.b32.xlu1 %v489_v13, %s4555_s25  ;;  %v1090_v13 = vmul.f32 %v4807_v22, %v4929_v32 }
 0x112   :  { %v4340_v16 = vpop.eup %4339 }
 0x113   :  { %v360_v33 = vmul.f32 %v4340_v16, %v4888_v17  ;;  %512 = vrot.lane.b32.xlu0 %v492_v8, %s4555_s25  ;;  %v552_v17 = vmul.f32 %v4752_v48, %v4929_v32  ;;  %v5074_v8 = vpop.permute.xlu0 %1047  ;;  %v1089_v16 = vmul.f32 %v4807_v22, %v4921_v38 }
 0x114   :  { %8120 = vst [vmem:[#allocation14_spill] sm:$0xff] %v5074_v8 }
 0x115   :  { %v4987_v21 = vmul.f32 %v4748_v46, %v360_v33  ;;  %510 = vrot.lane.b32.xlu1 %v491_v2, %s4555_s25  ;;  %v551_v46 = vmul.f32 %v4752_v48, %v4921_v38  ;;  %v1266_v33 = vmul.f32 %v4823_v28, %v4923_v6  ;;  %v1265_v2 = vmul.f32 %v4823_v28, %v4918_v26 }
 0x117   :  { %8118 = vst [vmem:[#allocation12_spill] sm:$0xff] %v4987_v21  ;;  %568 = vrot.lane.b32.xlu0 %v550_v35, %s4554_s1  ;;  %v5085_v35 = vpop.permute.xlu0 %1051 }
 0x118   :  { %8121 = vst [vmem:[#allocation15_spill] sm:$0xff] %v5085_v35 }
 0x119   :  { %566 = vrot.lane.b32.xlu1 %v549_v40, %s4554_s1  ;;  %v1268_v40 = vmul.f32 %v4823_v28, %v4929_v32 }
 0x11b   :  { %572 = vrot.lane.b32.xlu0 %v552_v17, %s4554_s1  ;;  %v973_v17 = vmul.f32 %v4793_v15, %v4935_v25 }
 0x11d   :  { %570 = vrot.lane.b32.xlu1 %v551_v46, %s4554_s1  ;;  %v5096_v46 = vpop.permute.xlu0 %1055 }
 0x11e   :  { %8122 = vst [vmem:[#allocation16_spill] sm:$0xff] %v5096_v46 }
 0x11f   :  { %628 = vrot.lane.b32.xlu0 %v610_v24, %s4556_s26  ;;  %v1325_v24 = vmul.f32 %v4829_v31, %v4918_v26 }
 0x121   :  { %626 = vrot.lane.b32.xlu1 %v609_v51, %s4556_s26  ;;  %v975_v51 = vmul.f32 %v4793_v15, %v4944_v18 }
 0x123   :  { %632 = vrot.lane.b32.xlu0 %v612_v27, %s4556_s26  ;;  %v5104_v27 = vpop.permute.xlu1 %564 }
 0x125   :  { %630 = vrot.lane.b32.xlu1 %v611_v53, %s4556_s26  ;;  %v5106_v53 = vpop.permute.xlu0 %1221 }
 0x126   :  { %8123 = vst [vmem:[#allocation17_spill] sm:$0xff] %v5106_v53 }
 0x127   :  { %688 = vrot.lane.b32.xlu0 %v670_v61, %s4557_s27  ;;  %v974_v61 = vmul.f32 %v4793_v15, %v4952_v56  ;;  %v493_v15 = vmul.f32 %v4755_v50, %v4959_v12 }
 0x129   :  { %686 = vrot.lane.b32.xlu1 %v669_v7, %s4557_s27  ;;  %v1151_v7 = vmul.f32 %v4813_v23, %v4935_v25 }
 0x12b   :  { %692 = vrot.lane.b32.xlu0 %v672_v30, %s4557_s27  ;;  %v1152_v30 = vmul.f32 %v4813_v23, %v4952_v56 }
 0x12d   :  { %690 = vrot.lane.b32.xlu1 %v671_v62, %s4557_s27  ;;  %v5117_v62 = vpop.permute.xlu1 %624 }
 0x12f   :  { %748 = vrot.lane.b32.xlu0 %v730_v45, %s4558_s28  ;;  %v5119_v45 = vpop.permute.xlu0 %1225 }
 0x130   :  { %8124 = vst [vmem:[#allocation18_spill] sm:$0xff] %v5119_v45 }
 0x131   :  { %746 = vrot.lane.b32.xlu1 %v729_v19, %s4558_s28  ;;  %v1153_v19 = vmul.f32 %v4813_v23, %v4944_v18  ;;  %v554_v23 = vmul.f32 %v4752_v48, %v4987_v21 }
 0x133   :  { %752 = vrot.lane.b32.xlu0 %v732_v14, %s4558_s28  ;;  %v494_v14 = vmul.f32 %v4755_v50, %v4987_v21 }
 0x135   :  { %750 = vrot.lane.b32.xlu1 %v731_v34, %s4558_s28  ;;  %v5130_v34 = vpop.permute.xlu1 %684 }
 0x136   :  { %8125 = vst [vmem:[#allocation19_spill] sm:$0xff] %v5130_v34 }
 0x137   :  { %808 = vrot.lane.b32.xlu0 %v790_v39, %s4559_s29  ;;  %v5132_v39 = vpop.permute.xlu0 %1229 }
 0x138   :  { %8126 = vst [vmem:[#allocation20_spill] sm:$0xff] %v5132_v39 }
 0x139   :  { %806 = vrot.lane.b32.xlu1 %v789_v41, %s4559_s29  ;;  %v495_v41 = vmul.f32 %v4755_v50, %v4962_v1  ;;  %v555_v50 = vmul.f32 %v4752_v48, %v4962_v1 }
 0x13b   :  { %812 = vrot.lane.b32.xlu0 %v792_v43, %s4559_s29  ;;  %v553_v43 = vmul.f32 %v4752_v48, %v4959_v12  ;;  %v734_v48 = vmul.f32 %v4770_v59, %v4987_v21 }
 0x13d   :  { %810 = vrot.lane.b32.xlu1 %v791_v20, %s4559_s29  ;;  %v5143_v20 = vpop.permute.xlu1 %744 }
 0x13e   :  { %8127 = vst [vmem:[#allocation21_spill] sm:$0xff] %v5143_v20 }
 0x13f   :  { %928 = vrot.lane.b32.xlu0 %v910_v49, %s4560_s30  ;;  %v5145_v49 = vpop.permute.xlu0 %1233 }
 0x140   :  { %8128 = vst [vmem:[#allocation22_spill] sm:$0xff] %v5145_v49 }
 0x141   :  { %926 = vrot.lane.b32.xlu1 %v909_v37, %s4560_s30  ;;  %v614_v37 = vmul.f32 %v4759_v52, %v4987_v21 }
 0x143   :  { %932 = vrot.lane.b32.xlu0 %v912_v60, %s4560_s30 }
 0x145   :  { %930 = vrot.lane.b32.xlu1 %v911_v29, %s4560_s30  ;;  %v674_v29 = vmul.f32 %v4766_v55, %v4987_v21 }
 0x147   :  { %1106 = vrot.lane.b32.xlu0 %v1088_v42, %s4561_s7  ;;  %v5158_v42 = vpop.permute.xlu1 %804 }
 0x148   :  { %8129 = vst [vmem:[#allocation23_spill] sm:$0xff] %v5158_v42 }
 0x149   :  { %1104 = vrot.lane.b32.xlu1 %v1087_v44, %s4561_s7  ;;  %v613_v44 = vmul.f32 %v4759_v52, %v4959_v12 }
 0x14b   :  { %1110 = vrot.lane.b32.xlu0 %v1090_v13, %s4561_s7 }
 0x14d   :  { %1108 = vrot.lane.b32.xlu1 %v1089_v16, %s4561_s7  ;;  %v615_v16 = vmul.f32 %v4759_v52, %v4962_v1  ;;  %v914_v52 = vmul.f32 %v4787_v10, %v4987_v21 }
 0x14f   :  { %1284 = vrot.lane.b32.xlu0 %v1266_v33, %s4562_s8  ;;  %v5171_v33 = vpop.permute.xlu1 %924 }
 0x150   :  { %8130 = vst [vmem:[#allocation24_spill] sm:$0xff] %v5171_v33 }
 0x151   :  { %1282 = vrot.lane.b32.xlu1 %v1265_v2, %s4562_s8 }
 0x153   :  { %1288 = vrot.lane.b32.xlu0 %v1268_v40, %s4562_s8  ;;  %v794_v40 = vmul.f32 %v4778_v63, %v4987_v21 }
 0x155   :  { %1286 = vrot.lane.b32.xlu1 %v1267_v36, %s4562_s8  ;;  %v673_v36 = vmul.f32 %v4766_v55, %v4959_v12 }
 0x157   :  { %994 = vrot.lane.b32.xlu0 %v973_v17, %s4555_s25 }
 0x159   :  { %1342 = vrot.lane.b32.xlu1 %v1325_v24, %s4563_s9  ;;  %v5186_v24 = vpop.permute.xlu1 %984 }
 0x15b   :  { %998 = vrot.lane.b32.xlu0 %v975_v51, %s4555_s25  ;;  %v675_v51 = vmul.f32 %v4766_v55, %v4962_v1  ;;  %v1270_v55 = vmul.f32 %v4823_v28, %v4987_v21 }
 0x15d   :  { %996 = vrot.lane.b32.xlu1 %v974_v61, %s4555_s25 }
 0x15f   :  { %1172 = vrot.lane.b32.xlu0 %v1151_v7, %s4554_s1  ;;  %v1092_v7 = vmul.f32 %v4807_v22, %v4987_v21 }
 0x161   :  { %1174 = vrot.lane.b32.xlu1 %v1152_v30, %s4554_s1  ;;  %v733_v30 = vmul.f32 %v4770_v59, %v4959_v12 }
 0x163   :  { %1176 = vrot.lane.b32.xlu0 %v1153_v19, %s4554_s1  ;;  %v5199_v19 = vpop.permute.xlu1 %1045 }
 0x164   :  { %8131 = vst [vmem:[#allocation25_spill] sm:$0xff] %v5199_v19 }
 0x165   :  { %514 = vrot.lane.b32.xlu1 %v493_v15, %s4555_s25 }
 0x167   :  { %516 = vrot.lane.b32.xlu0 %v494_v14, %s4555_s25  ;;  %v735_v14 = vmul.f32 %v4770_v59, %v4962_v1  ;;  %v1328_v59 = vmul.f32 %v4829_v31, %v4929_v32 }
 0x169   :  { %518 = vrot.lane.b32.xlu1 %v495_v41, %s4555_s25 }
 0x16b   :  { %576 = vrot.lane.b32.xlu0 %v554_v23, %s4554_s1  ;;  %v1326_v23 = vmul.f32 %v4829_v31, %v4923_v6 }
 0x16d   :  { %574 = vrot.lane.b32.xlu1 %v553_v43, %s4554_s1  ;;  %v5214_v43 = vpop.permute.xlu1 %1049 }
 0x16e   :  { %8132 = vst [vmem:[#allocation26_spill] sm:$0xff] %v5214_v43 }
 0x16f   :  { %636 = vrot.lane.b32.xlu0 %v614_v37, %s4556_s26  ;;  %v793_v37 = vmul.f32 %v4778_v63, %v4959_v12 }
 0x171   :  { %578 = vrot.lane.b32.xlu1 %v555_v50, %s4554_s1  ;;  %v5154_v60 = vpop.permute.xlu0 %986 }
 0x173   :  { %696 = vrot.lane.b32.xlu0 %v674_v29, %s4557_s27  ;;  %v795_v29 = vmul.f32 %v4778_v63, %v4962_v1  ;;  %v5245_v63 = vld [vmem:[%s7879_s4 + $0x8] sm:$0xff] }
 0x175   :  { %634 = vrot.lane.b32.xlu1 %v613_v44, %s4556_s26  ;;  %v5164_v13 = vpop.permute.xlu0 %990  ;;  %v5227_v44 = vpop.permute.xlu1 %1053 }
 0x176   :  { %8133 = vst [vmem:[#allocation27_spill] sm:$0xff] %v5227_v44 }
 0x177   :  { %756 = vrot.lane.b32.xlu0 %v734_v48, %s4558_s28 }
 0x179   :  { %638 = vrot.lane.b32.xlu1 %v615_v16, %s4556_s26  ;;  %v5174_v2 = vpop.permute.xlu0 %1164  ;;  %v1330_v16 = vmul.f32 %v4829_v31, %v4987_v21 }
 0x17b   :  { %816 = vrot.lane.b32.xlu0 %v794_v40, %s4559_s29  ;;  %v913_v40 = vmul.f32 %v4787_v10, %v4959_v12 }
 0x17d   :  { %694 = vrot.lane.b32.xlu1 %v673_v36, %s4557_s27  ;;  %v5182_v17 = vpop.permute.xlu0 %1168 }
 0x17f   :  { %936 = vrot.lane.b32.xlu0 %v914_v52, %s4560_s30  ;;  %v5240_v52 = vpop.permute.xlu1 %1057 }
 0x180   :  { %8135 = vst [vmem:[#allocation29_spill] sm:$0xff] %v5240_v52 }
 0x181   :  { %698 = vrot.lane.b32.xlu1 %v675_v51, %s4557_s27  ;;  %v5192_v61 = vpop.permute.xlu0 %508  ;;  %v915_v51 = vmul.f32 %v4787_v10, %v4962_v1 }
 0x183   :  { %1114 = vrot.lane.b32.xlu0 %v1092_v7, %s4561_s7 }
 0x185   :  { %754 = vrot.lane.b32.xlu1 %v733_v30, %s4558_s28  ;;  %v5202_v15 = vpop.permute.xlu0 %512  ;;  %v1091_v30 = vmul.f32 %v4807_v22, %v4959_v12 }
 0x187   :  { %1292 = vrot.lane.b32.xlu0 %v1270_v55, %s4562_s8  ;;  %v5255_v55 = vpop.permute.xlu1 %1102 }
 0x188   :  { %8137 = vst [vmem:[#allocation31_spill] sm:$0xff] %v5255_v55 }
 0x189   :  { %758 = vrot.lane.b32.xlu1 %v735_v14, %s4558_s28  ;;  %v5210_v41 = vpop.permute.xlu0 %568 }
 0x18b   :  { %1344 = vrot.lane.b32.xlu0 %v1326_v23, %s4563_s9  ;;  %v1093_v23 = vmul.f32 %v4807_v22, %v4962_v1  ;;  %v5265_v10 = vpop.permute.xlu1 %1162 }
 0x18d   :  { %814 = vrot.lane.b32.xlu1 %v793_v37, %s4559_s29  ;;  %v5220_v50 = vpop.permute.xlu0 %572 }
 0x18f   :  { %1348 = vrot.lane.b32.xlu0 %v1328_v59, %s4563_s9  ;;  %v1269_v59 = vmul.f32 %v4823_v28, %v4959_v12 }
 0x191   :  { %818 = vrot.lane.b32.xlu1 %v795_v29, %s4559_s29  ;;  %v5230_v48 = vpop.permute.xlu0 %628 }
 0x193   :  { %1352 = vrot.lane.b32.xlu0 %v1330_v16, %s4563_s9  ;;  %v1271_v16 = vmul.f32 %v4823_v28, %v4962_v1 }
 0x195   :  { %934 = vrot.lane.b32.xlu1 %v913_v40, %s4560_s30  ;;  %v5238_v36 = vpop.permute.xlu0 %632  ;;  %v5274_v40 = vpop.permute.xlu1 %1223 }
 0x196   :  { %8134 = vst [vmem:[#allocation28_spill] sm:$0xff] %v5238_v36  ;;  %8141 = vst [vmem:[#allocation35_spill] sm:$0xff] %v5274_v40 }
 0x197   :  { %1381 = vperm.xlu0 %4223, %v5245_v63  }
 0x199   :  { %938 = vrot.lane.b32.xlu1 %v915_v51, %s4560_s30  ;;  %v5251_v7 = vpop.permute.xlu0 %688  ;;  %v1327_v51 = vmul.f32 %v4829_v31, %v4921_v38 }
 0x19a   :  { %8136 = vst [vmem:[#allocation30_spill] sm:$0xff] %v5251_v7 }
 0x19d   :  { %1112 = vrot.lane.b32.xlu1 %v1091_v30, %s4561_s7  ;;  %v5258_v14 = vpop.permute.xlu0 %692 }
 0x19e   :  { %8138 = vst [vmem:[#allocation32_spill] sm:$0xff] %v5258_v14 }
 0x1a1   :  { %1116 = vrot.lane.b32.xlu1 %v1093_v23, %s4561_s7  ;;  %v5263_v37 = vpop.permute.xlu0 %748  ;;  %v5284_v23 = vpop.permute.xlu1 %1227 }
 0x1a2   :  { %8139 = vst [vmem:[#allocation33_spill] sm:$0xff] %v5263_v37  ;;  %8144 = vst [vmem:[#allocation38_spill] sm:$0xff] %v5284_v23 }
 0x1a5   :  { %1290 = vrot.lane.b32.xlu1 %v1269_v59, %s4562_s8  ;;  %v5270_v29 = vpop.permute.xlu0 %752  ;;  %v1329_v59 = vmul.f32 %v4829_v31, %v4959_v12  ;;  %v5293_v0 = vpop.permute.xlu1 %1231 }
 0x1a6   :  { %8140 = vst [vmem:[#allocation34_spill] sm:$0xff] %v5270_v29  ;;  %8146 = vst [vmem:[#allocation40_spill] sm:$0xff] %v5293_v0 }
 0x1a9   :  { %1294 = vrot.lane.b32.xlu1 %v1271_v16, %s4562_s8  ;;  %v5277_v22 = vpop.permute.xlu0 %808  ;;  %v1331_v16 = vmul.f32 %v4829_v31, %v4962_v1  ;;  %v5320_v43 = vpop.permute.xlu1 %1235  ;;  %s4580_s8 = smov 85  }
 0x1aa   :  { %8142 = vst [vmem:[#allocation36_spill] sm:$0xff] %v5277_v22  ;;  %8159 = vst [vmem:[#allocation53_spill] sm:$0xff] %v5320_v43 }
 0x1ad   :  { %1346 = vrot.lane.b32.xlu1 %v1327_v51, %s4563_s9  ;;  %v5282_v30 = vpop.permute.xlu0 %812  ;;  %v5324_v8 = vpop.permute.xlu1 %1280 }
 0x1ae   :  { %8143 = vst [vmem:[#allocation37_spill] sm:$0xff] %v5282_v30  ;;  %8161 = vst [vmem:[#allocation55_spill] sm:$0xff] %v5324_v8 }
 0x1b1   :  { %1350 = vrot.lane.b32.xlu1 %v1329_v59, %s4563_s9  ;;  %v5289_v28 = vpop.permute.xlu0 %928  ;;  %v5328_v40 = vpop.permute.xlu1 %1340 }
 0x1b2   :  { %8145 = vst [vmem:[#allocation39_spill] sm:$0xff] %v5289_v28  ;;  %8163 = vst [vmem:[#allocation57_spill] sm:$0xff] %v5328_v40 }
 0x1b5   :  { %1354 = vrot.lane.b32.xlu1 %v1331_v16, %s4563_s9  ;;  %v5296_v52 = vpop.permute.xlu0 %932  ;;  %v5332_v4 = vpop.permute.xlu1 %988 }
 0x1b6   :  { %8147 = vst [vmem:[#allocation41_spill] sm:$0xff] %v5296_v52 }
 0x1b9   :  { %v5298_v51 = vpop.permute.xlu0 %1106 }
 0x1ba   :  { %8148 = vst [vmem:[#allocation42_spill] sm:$0xff] %v5298_v51 }
 0x1bd   :  { %v5300_v49 = vpop.permute.xlu0 %1110 }
 0x1be   :  { %8149 = vst [vmem:[#allocation43_spill] sm:$0xff] %v5300_v49 }
 0x1c1   :  { %v5302_v46 = vpop.permute.xlu0 %1284 }
 0x1c2   :  { %8150 = vst [vmem:[#allocation44_spill] sm:$0xff] %v5302_v46  ;;  %v5377_v46 = vld [vmem:[%s7879_s4] sm:$0xff] }
 0x1c5   :  { %v5304_v44 = vpop.permute.xlu0 %1288 }
 0x1c6   :  { %8151 = vst [vmem:[#allocation45_spill] sm:$0xff] %v5304_v44 }
 0x1c9   :  { %v5306_v59 = vpop.permute.xlu0 %994 }
 0x1ca   :  { %8152 = vst [vmem:[#allocation46_spill] sm:$0xff] %v5306_v59 }
 0x1cd   :  { %v5308_v39 = vpop.permute.xlu0 %998 }
 0x1ce   :  { %8153 = vst [vmem:[#allocation47_spill] sm:$0xff] %v5308_v39 }
 0x1d1   :  { %v5310_v35 = vpop.permute.xlu0 %1172 }
 0x1d2   :  { %8154 = vst [vmem:[#allocation48_spill] sm:$0xff] %v5310_v35 }
 0x1d5   :  { %v5312_v31 = vpop.permute.xlu0 %1176 }
 0x1d6   :  { %8155 = vst [vmem:[#allocation49_spill] sm:$0xff] %v5312_v31  ;;  %v5336_v31 = vpop.permute.xlu1 %992 }
 0x1d9   :  { %v5314_v0 = vpop.permute.xlu0 %516 }
 0x1da   :  { %8156 = vst [vmem:[#allocation50_spill] sm:$0xff] %v5314_v0 }
 0x1dd   :  { %v5316_v16 = vpop.permute.xlu0 %576 }
 0x1de   :  { %8157 = vst [vmem:[#allocation51_spill] sm:$0xff] %v5316_v16 }
 0x1e1   :  { %v5318_v23 = vpop.permute.xlu0 %636 }
 0x1e2   :  { %8158 = vst [vmem:[#allocation52_spill] sm:$0xff] %v5318_v23  ;;  %v5340_v23 = vpop.permute.xlu1 %1166 }
 0x1e5   :  { %v5322_v45 = vpop.permute.xlu0 %696 }
 0x1e6   :  { %8160 = vst [vmem:[#allocation54_spill] sm:$0xff] %v5322_v45  ;;  %v5344_v45 = vpop.permute.xlu1 %1170 }
 0x1e9   :  { %v5326_v53 = vpop.permute.xlu0 %756 }
 0x1ea   :  { %8162 = vst [vmem:[#allocation56_spill] sm:$0xff] %v5326_v53  ;;  %v5348_v53 = vpop.permute.xlu1 %506 }
 0x1ed   :  { %v5330_v54 = vpop.permute.xlu0 %816 }
 0x1ee   :  { %8164 = vst [vmem:[#allocation58_spill] sm:$0xff] %v5330_v54  ;;  %v5352_v54 = vpop.permute.xlu1 %510 }
 0x1f1   :  { %v5334_v19 = vpop.permute.xlu0 %936 }
 0x1f2   :  { %8165 = vst [vmem:[#allocation59_spill] sm:$0xff] %v5334_v19  ;;  %v5356_v19 = vpop.permute.xlu1 %566 }
 0x1f5   :  { %v5338_v39 = vpop.permute.xlu0 %1114 }
 0x1f6   :  { %8166 = vst [vmem:[#allocation60_spill] sm:$0xff] %v5338_v39 }
 0x1f9   :  { %v5342_v43 = vpop.permute.xlu0 %1292 }
 0x1fa   :  { %8167 = vst [vmem:[#allocation61_spill] sm:$0xff] %v5342_v43 }
 0x1fd   :  { %v5346_v16 = vpop.permute.xlu0 %1344 }
 0x1fe   :  { %8168 = vst [vmem:[#allocation62_spill] sm:$0xff] %v5346_v16 }
 0x201   :  { %v5350_v0 = vpop.permute.xlu0 %1348 }
 0x202   :  { %8169 = vst [vmem:[#allocation63_spill] sm:$0xff] %v5350_v0  ;;  %v5363_v0 = vpop.permute.xlu1 %570 }
 0x205   :  { %v5354_v35 = vpop.permute.xlu0 %1352 }
 0x206   :  { %8170 = vst [vmem:[#allocation64_spill] sm:$0xff] %v5354_v35 }
 0x216   :  { %v1382_v40 = vpop.permute.xlu0 %1381 }
 0x217   :  { %v1386_v39 = vmul.f32 %v1382_v40, %v4923_v6  ;;  %v1384_v44 = vmul.f32 0.0, %v1382_v40  ;;  %v1388_v43 = vmul.f32 %v1382_v40, %v4929_v32  ;;  %v1385_v16 = vmul.f32 %v1382_v40, %v4918_v26 }
 0x218   :  { %v1390_v35 = vmul.f32 %v1382_v40, %v4987_v21  ;;  %v1387_v59 = vmul.f32 %v1382_v40, %v4921_v38 }
 0x219   :  { %1404 = vrot.lane.b32.xlu0 %v1386_v39, %s4565_s12  ;;  %1400 = vrot.lane.b32.xlu1 %v1384_v44, %s4565_s12  ;;  %v5371_v39 = vpop.permute.xlu1 %626  ;;  %v1389_v44 = vmul.f32 %v1382_v40, %v4959_v12 }
 0x21d   :  { %1408 = vrot.lane.b32.xlu0 %v1388_v43, %s4565_s12  ;;  %1402 = vrot.lane.b32.xlu1 %v1385_v16, %s4565_s12  ;;  %v1391_v43 = vmul.f32 %v1382_v40, %v4962_v1  ;;  %v5382_v16 = vpop.permute.xlu1 %630 }
 0x21e   :  { %8171 = vst [vmem:[#allocation65_spill] sm:$0xff] %v5382_v16 }
 0x221   :  { %1412 = vrot.lane.b32.xlu0 %v1390_v35, %s4565_s12  ;;  %1406 = vrot.lane.b32.xlu1 %v1387_v59, %s4565_s12  ;;  %v5385_v35 = vpop.permute.xlu1 %686 }
 0x222   :  { %8172 = vst [vmem:[#allocation66_spill] sm:$0xff] %v5385_v35 }
 0x225   :  { %1441 = vperm.xlu0 %4223, %v5377_v46   ;;  %1410 = vrot.lane.b32.xlu1 %v1389_v44, %s4565_s12  ;;  %v5387_v59 = vpop.permute.xlu1 %690 }
 0x226   :  { %8173 = vst [vmem:[#allocation67_spill] sm:$0xff] %v5387_v59 }
 0x229   :  { %1414 = vrot.lane.b32.xlu1 %v1391_v43, %s4565_s12  ;;  %v5389_v8 = vpop.permute.xlu1 %746 }
 0x22a   :  { %8174 = vst [vmem:[#allocation68_spill] sm:$0xff] %v5389_v8 }
 0x22d   :  { %v5391_v49 = vpop.permute.xlu1 %750 }
 0x22e   :  { %8175 = vst [vmem:[#allocation69_spill] sm:$0xff] %v5391_v49 }
 0x231   :  { %v5393_v51 = vpop.permute.xlu1 %806 }
 0x232   :  { %8176 = vst [vmem:[#allocation70_spill] sm:$0xff] %v5393_v51 }
 0x235   :  { %v5395_v55 = vpop.permute.xlu1 %810 }
 0x236   :  { %8177 = vst [vmem:[#allocation71_spill] sm:$0xff] %v5395_v55 }
 0x239   :  { %v5397_v52 = vpop.permute.xlu1 %926 }
 0x23a   :  { %8178 = vst [vmem:[#allocation72_spill] sm:$0xff] %v5397_v52 }
 0x23d   :  { %v5399_v44 = vpop.permute.xlu1 %930 }
 0x23e   :  { %8179 = vst [vmem:[#allocation73_spill] sm:$0xff] %v5399_v44 }
 0x241   :  { %v5401_v40 = vpop.permute.xlu1 %1104 }
 0x242   :  { %8180 = vst [vmem:[#allocation74_spill] sm:$0xff] %v5401_v40 }
 0x245   :  { %v5403_v28 = vpop.permute.xlu1 %1108 }
 0x246   :  { %8181 = vst [vmem:[#allocation75_spill] sm:$0xff] %v5403_v28 }
 0x249   :  { %v5405_v43 = vpop.permute.xlu1 %1282 }
 0x24a   :  { %8182 = vst [vmem:[#allocation76_spill] sm:$0xff] %v5405_v43 }
 0x24d   :  { %v5407_v33 = vpop.permute.xlu1 %1286 }
 0x24e   :  { %8183 = vst [vmem:[#allocation77_spill] sm:$0xff] %v5407_v33 }
 0x251   :  { %v5409_v30 = vpop.permute.xlu1 %1342 }
 0x252   :  { %8184 = vst [vmem:[#allocation78_spill] sm:$0xff] %v5409_v30 }
 0x255   :  { %v5411_v22 = vpop.permute.xlu1 %996 }
 0x256   :  { %8185 = vst [vmem:[#allocation79_spill] sm:$0xff] %v5411_v22 }
 0x259   :  { %v5413_v42 = vpop.permute.xlu1 %1174 }
 0x25a   :  { %8186 = vst [vmem:[#allocation80_spill] sm:$0xff] %v5413_v42 }
 0x25d   :  { %v5415_v51 = vpop.permute.xlu1 %514 }
 0x25e   :  { %8187 = vst [vmem:[#allocation81_spill] sm:$0xff] %v5415_v51 }
 0x261   :  { %v5417_v55 = vpop.permute.xlu1 %518 }
 0x262   :  { %8188 = vst [vmem:[#allocation82_spill] sm:$0xff] %v5417_v55 }
 0x265   :  { %v5419_v52 = vpop.permute.xlu1 %574 }
 0x266   :  { %8189 = vst [vmem:[#allocation83_spill] sm:$0xff] %v5419_v52 }
 0x269   :  { %v5423_v40 = vpop.permute.xlu1 %578 }
 0x26a   :  { %8191 = vst [vmem:[#allocation85_spill] sm:$0xff] %v5423_v40 }
 0x26d   :  { %v5427_v43 = vpop.permute.xlu1 %634 }
 0x26e   :  { %8193 = vst [vmem:[#allocation87_spill] sm:$0xff] %v5427_v43 }
 0x271   :  { %v5432_v29 = vpop.permute.xlu1 %638 }
 0x272   :  { %8195 = vst [vmem:[#allocation89_spill] sm:$0xff] %v5432_v29 }
 0x28b   :  { %v5421_v44 = vpop.permute.xlu0 %1404 }
 0x28c   :  { %8190 = vst [vmem:[#allocation84_spill] sm:$0xff] %v5421_v44 }
 0x28f   :  { %v5425_v28 = vpop.permute.xlu0 %1408 }
 0x290   :  { %8192 = vst [vmem:[#allocation86_spill] sm:$0xff] %v5425_v28  ;;  %v5440_v28 = vpop.permute.xlu1 %694 }
 0x291   :  { %8196 = vst [vmem:[#allocation90_spill] sm:$0xff] %v5440_v28 }
 0x293   :  { %v5429_v33 = vpop.permute.xlu0 %1412 }
 0x294   :  { %8194 = vst [vmem:[#allocation88_spill] sm:$0xff] %v5429_v33  ;;  %v5448_v29 = vpop.permute.xlu1 %698 }
 0x295   :  { %8197 = vst [vmem:[#allocation91_spill] sm:$0xff] %v5448_v29 }
 0x2a4   :  { %v1442_v30 = vpop.permute.xlu0 %1441 }
 0x2a5   :  { %v1445_v22 = vmul.f32 %v1442_v30, %v4899_v58  ;;  %v1444_v42 = vmul.f32 0.0, %v1442_v30  ;;  %v1447_v55 = vmul.f32 %v1442_v30, %v4904_v9  ;;  %v1446_v40 = vmul.f32 %v1442_v30, %v4906_v11 }
 0x2a6   :  { %v1449_v33 = vmul.f32 %v1442_v30, %v4935_v25  ;;  %v1448_v44 = vmul.f32 %v1442_v30, %v4912_v3 }
 0x2a7   :  { %1462 = vrot.lane.b32.xlu0 %v1445_v22, %s4558_s28  ;;  %1460 = vrot.lane.b32.xlu1 %v1444_v42, %s4558_s28  ;;  %v1451_v42 = vmul.f32 %v1442_v30, %v4944_v18  ;;  %v1450_v22 = vmul.f32 %v1442_v30, %v4952_v56  ;;  %v7951_v30 = vmov 12  }
 0x2a8   :  { %4225 = vset.pattern.permute.xlu0 %v7951_v30 }
 0x2ab   :  { %1466 = vrot.lane.b32.xlu0 %v1447_v55, %s4558_s28  ;;  %1464 = vrot.lane.b32.xlu1 %v1446_v40, %s4558_s28  ;;  %v5455_v55 = vld [vmem:[%s7879_s4 + $0x10] sm:$0xff]  ;;  %s4587_s4 = smov 48  }
 0x2af   :  { %1470 = vrot.lane.b32.xlu0 %v1449_v33, %s4558_s28  ;;  %1468 = vrot.lane.b32.xlu1 %v1448_v44, %s4558_s28  ;;  %v5458_v33 = vpop.permute.xlu1 %754 }
 0x2b0   :  { %8198 = vst [vmem:[#allocation92_spill] sm:$0xff] %v5458_v33 }
 0x2b3   :  { %1474 = vrot.lane.b32.xlu0 %v1451_v42, %s4558_s28  ;;  %1472 = vrot.lane.b32.xlu1 %v1450_v22, %s4558_s28  ;;  %v5460_v44 = vpop.permute.xlu1 %758 }
 0x2b4   :  { %8199 = vst [vmem:[#allocation93_spill] sm:$0xff] %v5460_v44 }
 0x2b7   :  { %1500 = vperm.xlu1 %4224, %v5455_v55   ;;  %v5462_v40 = vpop.permute.xlu1 %814 }
 0x2b8   :  { %8200 = vst [vmem:[#allocation94_spill] sm:$0xff] %v5462_v40 }
 0x2bb   :  { %4226 = vset.pattern.permute.xlu1 %v7951_v30  ;;  %v5466_v42 = vpop.permute.xlu1 %818 }
 0x2bc   :  { %8201 = vst [vmem:[#allocation95_spill] sm:$0xff] %v5466_v42 }
 0x2bf   :  { %v5468_v22 = vpop.permute.xlu1 %934 }
 0x2c0   :  { %8202 = vst [vmem:[#allocation96_spill] sm:$0xff] %v5468_v22 }
 0x2c3   :  { %v5470_v29 = vpop.permute.xlu1 %938 }
 0x2c4   :  { %8203 = vst [vmem:[#allocation97_spill] sm:$0xff] %v5470_v29 }
 0x2c7   :  { %v5472_v28 = vpop.permute.xlu1 %1112 }
 0x2c8   :  { %8204 = vst [vmem:[#allocation98_spill] sm:$0xff] %v5472_v28 }
 0x2cb   :  { %v5474_v43 = vpop.permute.xlu1 %1116 }
 0x2cc   :  { %8205 = vst [vmem:[#allocation99_spill] sm:$0xff] %v5474_v43 }
 0x2cf   :  { %v5476_v33 = vpop.permute.xlu1 %1290 }
 0x2d0   :  { %8206 = vst [vmem:[#allocation100_spill] sm:$0xff] %v5476_v33 }
 0x2d3   :  { %v5478_v44 = vpop.permute.xlu1 %1294 }
 0x2d4   :  { %8207 = vst [vmem:[#allocation101_spill] sm:$0xff] %v5478_v44 }
 0x2d7   :  { %v5480_v40 = vpop.permute.xlu1 %1346 }
 0x2d8   :  { %8208 = vst [vmem:[#allocation102_spill] sm:$0xff] %v5480_v40 }
 0x2db   :  { %v5482_v52 = vpop.permute.xlu1 %1350 }
 0x2dc   :  { %8209 = vst [vmem:[#allocation103_spill] sm:$0xff] %v5482_v52 }
 0x2df   :  { %v5484_v51 = vpop.permute.xlu1 %1354 }
 0x2e0   :  { %8210 = vst [vmem:[#allocation104_spill] sm:$0xff] %v5484_v51  ;;  %v4520_v51 = vld [vmem:[%s7878_s0] sm:$0xff] }
 0x2e3   :  { %v5486_v30 = vpop.permute.xlu1 %1400 }
 0x2e4   :  { %8211 = vst [vmem:[#allocation105_spill] sm:$0xff] %v5486_v30 }
 0x2e7   :  { %v5488_v42 = vpop.permute.xlu1 %1402 }
 0x2e8   :  { %8212 = vst [vmem:[#allocation106_spill] sm:$0xff] %v5488_v42 }
 0x2eb   :  { %v5490_v22 = vpop.permute.xlu1 %1406 }
 0x2ec   :  { %8213 = vst [vmem:[#allocation107_spill] sm:$0xff] %v5490_v22 }
 0x2ef   :  { %v5492_v29 = vpop.permute.xlu1 %1410 }
 0x2f0   :  { %8214 = vst [vmem:[#allocation108_spill] sm:$0xff] %v5492_v29 }
 0x2f3   :  { %v5494_v28 = vpop.permute.xlu1 %1414 }
 0x2f4   :  { %8215 = vst [vmem:[#allocation109_spill] sm:$0xff] %v5494_v28  ;;  %v4521_v28 = vld [vmem:[%s7878_s0 + $0x10] sm:$0xff] }
 0x319   :  { %v5496_v43 = vpop.permute.xlu1 %1460 }
 0x31a   :  { %8216 = vst [vmem:[#allocation110_spill] sm:$0xff] %v5496_v43 }
 0x31d   :  { %v5498_v33 = vpop.permute.xlu1 %1464 }
 0x31e   :  { %8217 = vst [vmem:[#allocation111_spill] sm:$0xff] %v5498_v33 }
 0x321   :  { %v5500_v44 = vpop.permute.xlu1 %1468 }
 0x322   :  { %8218 = vst [vmem:[#allocation112_spill] sm:$0xff] %v5500_v44 }
 0x325   :  { %v5502_v40 = vpop.permute.xlu1 %1472 }
 0x326   :  { %8219 = vst [vmem:[#allocation113_spill] sm:$0xff] %v5502_v40  ;;  %v4522_v40 = vld [vmem:[%s7878_s0 + $0x8] sm:$0xff] }
 0x336   :  { %v1501_v52 = vpop.permute.xlu1 %1500 }
 0x337   :  { %v1504_v30 = vmul.f32 %v4520_v51, %v1501_v52  ;;  %v1503_v42 = vmul.f32 0.0, %v1501_v52  ;;  %v1506_v33 = vmul.f32 %v4521_v28, %v1501_v52  ;;  %v1505_v44 = vmul.f32 %v4522_v40, %v1501_v52  ;;  %v4523_v51 = vld [vmem:[%s7878_s0 + $0x20] sm:$0xff]  ;;  %v4525_v28 = vld [vmem:[%s7878_s0 + $0x30] sm:$0xff] }
 0x339   :  { %1521 = vrot.lane.b32.xlu1 %v1504_v30, %s4558_s28  ;;  %1519 = vrot.lane.b32.xlu0 %v1503_v42, %s4558_s28  ;;  %v1508_v30 = vmul.f32 %v4523_v51, %v1501_v52  ;;  %v4524_v42 = vld [vmem:[%s7878_s0 + $0x18] sm:$0xff]  ;;  %v5534_v51 = vpop.permute.xlu0 %1462 }
 0x33a   :  { %v1507_v43 = vmul.f32 %v4524_v42, %v1501_v52  ;;  %8220 = vst [vmem:[#allocation114_spill] sm:$0xff] %v5534_v51 }
 0x33d   :  { %1525 = vrot.lane.b32.xlu1 %v1506_v33, %s4558_s28  ;;  %1523 = vrot.lane.b32.xlu0 %v1505_v44, %s4558_s28  ;;  %v1510_v33 = vmul.f32 %v4525_v28, %v1501_v52  ;;  %v4526_v44 = vld [vmem:[%s7878_s0 + $0x28] sm:$0xff] }
 0x33e   :  { %v1509_v40 = vmul.f32 %v4526_v44, %v1501_v52 }
 0x341   :  { %1529 = vrot.lane.b32.xlu1 %v1508_v30, %s4558_s28  ;;  %1527 = vrot.lane.b32.xlu0 %v1507_v43, %s4558_s28  ;;  %v5536_v30 = vpop.permute.xlu0 %1466 }
 0x342   :  { %8221 = vst [vmem:[#allocation115_spill] sm:$0xff] %v5536_v30 }
 0x345   :  { %1533 = vrot.lane.b32.xlu1 %v1510_v33, %s4558_s28  ;;  %1531 = vrot.lane.b32.xlu0 %v1509_v40, %s4558_s28  ;;  %v5538_v43 = vpop.permute.xlu0 %1470  ;;  %s4567_s28 = smov 86  }
 0x346   :  { %8222 = vst [vmem:[#allocation116_spill] sm:$0xff] %v5538_v43 }
 0x349   :  { %1559 = vperm.xlu0 %4225, %v5245_v63   ;;  %v5540_v42 = vpop.permute.xlu0 %1474 }
 0x34a   :  { %8223 = vst [vmem:[#allocation117_spill] sm:$0xff] %v5540_v42 }
 0x3ab   :  { %v5542_v28 = vpop.permute.xlu0 %1519 }
 0x3ac   :  { %8224 = vst [vmem:[#allocation118_spill] sm:$0xff] %v5542_v28 }
 0x3af   :  { %v5544_v29 = vpop.permute.xlu0 %1523 }
 0x3b0   :  { %8225 = vst [vmem:[#allocation119_spill] sm:$0xff] %v5544_v29 }
 0x3b3   :  { %v5546_v22 = vpop.permute.xlu0 %1527 }
 0x3b4   :  { %8226 = vst [vmem:[#allocation120_spill] sm:$0xff] %v5546_v22 }
 0x3b7   :  { %v5548_v52 = vpop.permute.xlu0 %1531 }
 0x3b8   :  { %8227 = vst [vmem:[#allocation121_spill] sm:$0xff] %v5548_v52 }
 0x3c8   :  { %v1560_v33 = vpop.permute.xlu0 %1559 }
 0x3c9   :  { %v1564_v44 = vmul.f32 %v1560_v33, %v4921_v38  ;;  %v1562_v40 = vmul.f32 %v1560_v33, %v4918_v26  ;;  %v1566_v42 = vmul.f32 %v1560_v33, %v4959_v12  ;;  %v1563_v28 = vmul.f32 %v1560_v33, %v4923_v6 }
 0x3ca   :  { %v1568_v52 = vmul.f32 %v1560_v33, %v4962_v1  ;;  %v1565_v22 = vmul.f32 %v1560_v33, %v4929_v32 }
 0x3cb   :  { %1580 = vrot.lane.b32.xlu0 %v1564_v44, %s4567_s28  ;;  %1576 = vrot.lane.b32.xlu1 %v1562_v40, %s4567_s28  ;;  %v1567_v44 = vmul.f32 %v1560_v33, %v4987_v21  ;;  %v7976_v40 = vmov 13  }
 0x3cc   :  { %4227 = vset.pattern.permute.xlu0 %v7976_v40 }
 0x3cf   :  { %1584 = vrot.lane.b32.xlu0 %v1566_v42, %s4567_s28  ;;  %1578 = vrot.lane.b32.xlu1 %v1563_v28, %s4567_s28  ;;  %v4569_v42 = vmov 14   ;;  %v5566_v28 = vpop.permute.xlu1 %1521 }
 0x3d0   :  { %8228 = vst [vmem:[#allocation122_spill] sm:$0xff] %v5566_v28  ;;  %v7982_v28 = vmov 16  }
 0x3d3   :  { %1588 = vrot.lane.b32.xlu0 %v1568_v52, %s4567_s28  ;;  %1582 = vrot.lane.b32.xlu1 %v1565_v22, %s4567_s28  ;;  %v5568_v29 = vpop.permute.xlu1 %1525 }
 0x3d4   :  { %8229 = vst [vmem:[#allocation123_spill] sm:$0xff] %v5568_v29  ;;  %v4570_v29 = vmov 15  }
 0x3d7   :  { %1586 = vrot.lane.b32.xlu1 %v1567_v44, %s4567_s28  ;;  %v5570_v43 = vpop.permute.xlu1 %1529 }
 0x3d8   :  { %8230 = vst [vmem:[#allocation124_spill] sm:$0xff] %v5570_v43 }
 0x3db   :  { %1614 = vperm.xlu1 %4226, %v5377_v46   ;;  %v5572_v52 = vpop.permute.xlu1 %1533 }
 0x3dc   :  { %8231 = vst [vmem:[#allocation125_spill] sm:$0xff] %v5572_v52 }
 0x3df   :  { %4228 = vset.pattern.permute.xlu1 %v4569_v42 }
 0x43d   :  { %v5574_v22 = vpop.permute.xlu1 %1576 }
 0x43e   :  { %8232 = vst [vmem:[#allocation126_spill] sm:$0xff] %v5574_v22 }
 0x441   :  { %v5576_v33 = vpop.permute.xlu1 %1578 }
 0x442   :  { %8233 = vst [vmem:[#allocation127_spill] sm:$0xff] %v5576_v33 }
 0x445   :  { %v5578_v44 = vpop.permute.xlu1 %1582 }
 0x446   :  { %8234 = vst [vmem:[#allocation128_spill] sm:$0xff] %v5578_v44 }
 0x449   :  { %v5580_v30 = vpop.permute.xlu1 %1586 }
 0x44a   :  { %8235 = vst [vmem:[#allocation129_spill] sm:$0xff] %v5580_v30  ;;  %v8239_v30 = vmov 18  }
 0x45a   :  { %v5582_v51 = vpop.permute.xlu1 %1614 }
 0x45b   :  { %v1618_v42 = vmul.f32 %v5582_v51, %v4906_v11  ;;  %v1617_v40 = vmul.f32 %v5582_v51, %v4899_v58  ;;  %v1620_v52 = vmul.f32 %v5582_v51, %v4912_v3  ;;  %v1619_v43 = vmul.f32 %v5582_v51, %v4904_v9 }
 0x45d   :  { %1633 = vrot.lane.b32.xlu1 %v1618_v42, %s4559_s29  ;;  %1631 = vrot.lane.b32.xlu0 %v1617_v40, %s4559_s29  ;;  %v7986_v40 = vmov 17   ;;  %v4573_v42 = vmov 19  }
 0x461   :  { %1637 = vrot.lane.b32.xlu1 %v1620_v52, %s4559_s29  ;;  %1635 = vrot.lane.b32.xlu0 %v1619_v43, %s4559_s29  ;;  %v7984_v43 = vmov 18   ;;  %v4576_v52 = vmov 20  }
 0x465   :  { %1924 = vperm.xlu1 %4228, %v5245_v63   ;;  %1730 = vperm.xlu0 %4227, %v5245_v63  }
 0x469   :  { %4229 = vset.pattern.permute.xlu1 %v4570_v29  ;;  %4230 = vset.pattern.permute.xlu0 %v7982_v28  ;;  %v4575_v29 = vmov 21   ;;  %v4577_v28 = vmov 24  }
 0x46a   :  { %1984 = vperm.xlu1 %4229, %v5245_v63   ;;  %2044 = vperm.xlu0 %4230, %v5245_v63  }
 0x46e   :  { %4231 = vset.pattern.permute.xlu1 %v7986_v40  ;;  %4233 = vset.pattern.permute.xlu0 %v4573_v42  ;;  %v8236_v42 = vmov 13  }
 0x46f   :  { %2222 = vperm.xlu1 %4231, %v5245_v63   ;;  %2578 = vperm.xlu0 %4233, %v5245_v63  }
 0x473   :  { %4232 = vset.pattern.permute.xlu1 %v7984_v43  ;;  %4236 = vset.pattern.permute.xlu0 %v4575_v29  ;;  %v8237_v29 = vmov 16   ;;  %v8238_v43 = vmov 12  }
 0x474   :  { %2400 = vperm.xlu1 %4232, %v5245_v63   ;;  %2698 = vperm.xlu0 %4236, %v5245_v63  }
 0x478   :  { %4234 = vset.pattern.permute.xlu1 %v4576_v52  ;;  %4239 = vset.pattern.permute.xlu0 %v7986_v40  ;;  %v4578_v52 = vmov 22   ;;  %v4579_v40 = vmov 23  }
 0x479   :  { %2638 = vperm.xlu1 %4234, %v5245_v63   ;;  %2282 = vperm.xlu0 %4239, %v5377_v46  }
 0x47d   :  { %4235 = vset.pattern.permute.xlu1 %v8236_v42  ;;  %4242 = vset.pattern.permute.xlu0 %v4577_v28  ;;  %v1621_v28 = vmul.f32 %v5582_v51, %v4935_v25 }
 0x47e   :  { %1798 = vperm.xlu1 %4235, %v5377_v46   ;;  %2878 = vperm.xlu0 %4242, %v5245_v63  }
 0x482   :  { %4237 = vset.pattern.permute.xlu1 %v8237_v29  ;;  %4243 = vset.pattern.permute.xlu0 %v8238_v43  ;;  %v1622_v43 = vmul.f32 %v5582_v51, %v4952_v56 }
 0x483   :  { %2104 = vperm.xlu1 %4237, %v5377_v46  }
 0x487   :  { %4238 = vset.pattern.permute.xlu1 %v4578_v52  ;;  %v5627_v52 = vpop.permute.xlu0 %1580 }
 0x488   :  { %2758 = vperm.xlu1 %4238, %v5245_v63   ;;  %8240 = vst [vmem:[#allocation130_spill] sm:$0xff] %v5627_v52 }
 0x48c   :  { %4240 = vset.pattern.permute.xlu1 %v4579_v40  ;;  %v5629_v40 = vpop.permute.xlu0 %1584 }
 0x48d   :  { %2818 = vperm.xlu1 %4240, %v5245_v63   ;;  %8241 = vst [vmem:[#allocation131_spill] sm:$0xff] %v5629_v40 }
 0x490   :  { %v5631_v63 = vpop.permute.xlu0 %1588 }
 0x491   :  { %4241 = vset.pattern.permute.xlu1 %v8239_v30  ;;  %8242 = vst [vmem:[#allocation132_spill] sm:$0xff] %v5631_v63 }
 0x492   :  { %2460 = vperm.xlu1 %4241, %v5377_v46  }
 0x496   :  { %1639 = vrot.lane.b32.xlu1 %v1621_v28, %s4559_s29 }
 0x497   :  { %4244 = vset.pattern.permute.xlu1 %v8236_v42 }
 0x49a   :  { %1641 = vrot.lane.b32.xlu1 %v1622_v43, %s4559_s29 }
 0x4cf   :  { %v5633_v44 = vpop.permute.xlu0 %1631  ;;  %v5635_v46 = vpop.permute.xlu1 %1633 }
 0x4d0   :  { %8243 = vst [vmem:[#allocation133_spill] sm:$0xff] %v5633_v44  ;;  %8244 = vst [vmem:[#allocation134_spill] sm:$0xff] %v5635_v46 }
 0x4d3   :  { %v5637_v22 = vpop.permute.xlu0 %1635  ;;  %v5639_v28 = vpop.permute.xlu1 %1637 }
 0x4d4   :  { %8245 = vst [vmem:[#allocation135_spill] sm:$0xff] %v5637_v22  ;;  %8246 = vst [vmem:[#allocation136_spill] sm:$0xff] %v5639_v28 }
 0x4e4   :  { %v5641_v42 = vpop.permute.xlu0 %1730  ;;  %v5647_v52 = vpop.permute.xlu1 %1924 }
 0x4e5   :  { %v1734_v33 = vmul.f32 %v5641_v42, %v4923_v6  ;;  %v1733_v43 = vmul.f32 %v5641_v42, %v4918_v26  ;;  %v1927_v63 = vmul.f32 %v5647_v52, %v4918_v26  ;;  %v1735_v28 = vmul.f32 %v5641_v42, %v4921_v38 }
 0x4e6   :  { %v1929_v22 = vmul.f32 %v5647_v52, %v4921_v38  ;;  %v1928_v44 = vmul.f32 %v5647_v52, %v4923_v6  ;;  %v1930_v46 = vmul.f32 %v5647_v52, %v4929_v32  ;;  %v1932_v14 = vmul.f32 %v5647_v52, %v4987_v21 }
 0x4e7   :  { %1751 = vrot.lane.b32.xlu1 %v1734_v33, %s4580_s8  ;;  %1749 = vrot.lane.b32.xlu0 %v1733_v43, %s4580_s8  ;;  %v1736_v33 = vmul.f32 %v5641_v42, %v4929_v32 }
 0x4e9   :  { %v5665_v43 = vpop.permute.xlu1 %1984  ;;  %v5684_v40 = vpop.permute.xlu0 %2044 }
 0x4ea   :  { %v1992_v36 = vmul.f32 %v5665_v43, %v4987_v21 }
 0x4eb   :  { %1943 = vrot.lane.b32.xlu1 %v1927_v63, %s4581_s10  ;;  %1753 = vrot.lane.b32.xlu0 %v1735_v28, %s4580_s8  ;;  %v1737_v63 = vmul.f32 %v5641_v42, %v4959_v12  ;;  %v1987_v28 = vmul.f32 %v5665_v43, %v4918_v26 }
 0x4ee   :  { %v5703_v49 = vpop.permute.xlu1 %2222 }
 0x4ef   :  { %1947 = vrot.lane.b32.xlu1 %v1929_v22, %s4581_s10  ;;  %1945 = vrot.lane.b32.xlu0 %v1928_v44, %s4581_s10  ;;  %v8247_v22 = vmov 0   ;;  %v1988_v44 = vmul.f32 %v5665_v43, %v4923_v6 }
 0x4f3   :  { %1755 = vrot.lane.b32.xlu1 %v1736_v33, %s4580_s8  ;;  %1668 = vperm.xlu0 %4243, %v5455_v55   ;;  %v1989_v33 = vmul.f32 %v5665_v43, %v4921_v38  ;;  %v5722_v37 = vpop.permute.xlu1 %2400 }
 0x4f7   :  { %1757 = vrot.lane.b32.xlu1 %v1737_v63, %s4580_s8  ;;  %2003 = vrot.lane.b32.xlu0 %v1987_v28, %s4582_s11  ;;  %v1931_v63 = vmul.f32 %v5647_v52, %v4959_v12  ;;  %v2047_v28 = vmul.f32 %v5684_v40, %v4918_v26 }
 0x4f8   :  { %4248 = vset.pattern.permute.xlu0 %v8247_v22 }
 0x4fb   :  { %2005 = vrot.lane.b32.xlu1 %v1988_v44, %s4582_s11  ;;  %2007 = vrot.lane.b32.xlu0 %v1989_v33, %s4582_s11  ;;  %v2048_v44 = vmul.f32 %v5684_v40, %v4923_v6  ;;  %v2049_v33 = vmul.f32 %v5684_v40, %v4921_v38 }
 0x4ff   :  { %1865 = vperm.xlu1 %4244, %v5455_v55   ;;  %1949 = vrot.lane.b32.xlu0 %v1930_v46, %s4581_s10  ;;  %v1990_v46 = vmul.f32 %v5665_v43, %v4929_v32 }
 0x503   :  { %1951 = vrot.lane.b32.xlu1 %v1931_v63, %s4581_s10  ;;  %2063 = vrot.lane.b32.xlu0 %v2047_v28, %s4583_s13  ;;  %v2225_v63 = vmul.f32 %v5703_v49, %v4918_v26  ;;  %v8248_v28 = vmov 17  }
 0x504   :  { %4245 = vset.pattern.permute.xlu1 %v8237_v29  ;;  %v1991_v29 = vmul.f32 %v5665_v43, %v4959_v12 }
 0x507   :  { %2065 = vrot.lane.b32.xlu1 %v2048_v44, %s4583_s13  ;;  %2067 = vrot.lane.b32.xlu0 %v2049_v33, %s4583_s13  ;;  %v2226_v44 = vmul.f32 %v5703_v49, %v4923_v6  ;;  %v2227_v33 = vmul.f32 %v5703_v49, %v4921_v38 }
 0x50b   :  { %2163 = vperm.xlu1 %4245, %v5455_v55   ;;  %2009 = vrot.lane.b32.xlu0 %v1990_v46, %s4582_s11  ;;  %v2050_v46 = vmul.f32 %v5684_v40, %v4929_v32 }
 0x50f   :  { %2011 = vrot.lane.b32.xlu1 %v1991_v29, %s4582_s11  ;;  %2241 = vrot.lane.b32.xlu0 %v2225_v63, %s4584_s14  ;;  %v2051_v29 = vmul.f32 %v5684_v40, %v4959_v12  ;;  %v2403_v63 = vmul.f32 %v5722_v37, %v4918_v26 }
 0x510   :  { %4246 = vset.pattern.permute.xlu1 %v8248_v28  ;;  %v2404_v28 = vmul.f32 %v5722_v37, %v4923_v6 }
 0x513   :  { %2243 = vrot.lane.b32.xlu1 %v2226_v44, %s4584_s14  ;;  %2245 = vrot.lane.b32.xlu0 %v2227_v33, %s4584_s14  ;;  %v2405_v44 = vmul.f32 %v5722_v37, %v4921_v38  ;;  %v2228_v33 = vmul.f32 %v5703_v49, %v4929_v32 }
 0x517   :  { %2341 = vperm.xlu1 %4246, %v5455_v55   ;;  %2069 = vrot.lane.b32.xlu0 %v2050_v46, %s4583_s13  ;;  %v5741_v46 = vpop.permute.xlu0 %2578 }
 0x518   :  { %v2584_v20 = vmul.f32 %v5741_v46, %v4929_v32 }
 0x51b   :  { %2071 = vrot.lane.b32.xlu1 %v2051_v29, %s4583_s13  ;;  %2419 = vrot.lane.b32.xlu0 %v2403_v63, %s4585_s15  ;;  %v2581_v29 = vmul.f32 %v5741_v46, %v4918_v26  ;;  %v2582_v63 = vmul.f32 %v5741_v46, %v4923_v6  ;;  %v5800_v8 = vpop.permute.xlu0 %2698 }
 0x51c   :  { %4247 = vset.pattern.permute.xlu1 %v8239_v30  ;;  %v2229_v30 = vmul.f32 %v5703_v49, %v4959_v12 }
 0x51f   :  { %2421 = vrot.lane.b32.xlu1 %v2404_v28, %s4585_s15  ;;  %2423 = vrot.lane.b32.xlu0 %v2405_v44, %s4585_s15  ;;  %v2406_v28 = vmul.f32 %v5722_v37, %v4929_v32  ;;  %v2407_v44 = vmul.f32 %v5722_v37, %v4959_v12 }
 0x523   :  { %2519 = vperm.xlu1 %4247, %v5455_v55   ;;  %2247 = vrot.lane.b32.xlu0 %v2228_v33, %s4584_s14  ;;  %v2583_v55 = vmul.f32 %v5741_v46, %v4921_v38  ;;  %v5762_v33 = vpop.permute.xlu1 %2638 }
 0x527   :  { %2249 = vrot.lane.b32.xlu1 %v2229_v30, %s4584_s14  ;;  %2597 = vrot.lane.b32.xlu0 %v2581_v29, %s4586_s16  ;;  %v2641_v30 = vmul.f32 %v5762_v33, %v4918_v26  ;;  %v2642_v29 = vmul.f32 %v5762_v33, %v4923_v6 }
 0x528   :  { %4249 = vset.pattern.permute.xlu1 %v8247_v22 }
 0x52b   :  { %2599 = vrot.lane.b32.xlu1 %v2582_v63, %s4586_s16  ;;  %2601 = vrot.lane.b32.xlu0 %v2583_v55, %s4586_s16  ;;  %v5772_v63 = vpop.permute.xlu1 %1798  ;;  %v2643_v55 = vmul.f32 %v5762_v33, %v4921_v38 }
 0x52f   :  { %2425 = vrot.lane.b32.xlu1 %v2406_v28, %s4585_s15  ;;  %2427 = vrot.lane.b32.xlu0 %v2407_v44, %s4585_s15  ;;  %v1738_v28 = vmul.f32 %v5641_v42, %v4987_v21  ;;  %v1739_v44 = vmul.f32 %v5641_v42, %v4962_v1  ;;  %v5784_v22 = vpop.permute.xlu1 %2104 }
 0x530   :  { %v2107_v59 = vmul.f32 %v5784_v22, %v4899_v58 }
 0x533   :  { %2657 = vrot.lane.b32.xlu1 %v2641_v30, %s4587_s4  ;;  %2659 = vrot.lane.b32.xlu0 %v2642_v29, %s4587_s4  ;;  %v1801_v30 = vmul.f32 %v5772_v63, %v4899_v58  ;;  %v1802_v29 = vmul.f32 %v5772_v63, %v4906_v11 }
 0x537   :  { %2661 = vrot.lane.b32.xlu1 %v2643_v55, %s4587_s4  ;;  %1759 = vrot.lane.b32.xlu0 %v1738_v28, %s4580_s8  ;;  %v1803_v55 = vmul.f32 %v5772_v63, %v4904_v9  ;;  %v5794_v28 = vpop.permute.xlu1 %2758 }
 0x53b   :  { %1761 = vrot.lane.b32.xlu1 %v1739_v44, %s4580_s8  ;;  %1817 = vrot.lane.b32.xlu0 %v1801_v30, %s4560_s30  ;;  %v2585_v44 = vmul.f32 %v5741_v46, %v4959_v12  ;;  %v2702_v30 = vmul.f32 %v5800_v8, %v4923_v6 }
 0x53f   :  { %1819 = vrot.lane.b32.xlu1 %v1802_v29, %s4560_s30  ;;  %1821 = vrot.lane.b32.xlu0 %v1803_v55, %s4560_s30  ;;  %v2701_v29 = vmul.f32 %v5800_v8, %v4918_v26  ;;  %v5808_v55 = vpop.permute.xlu1 %2818 }
 0x543   :  { %2603 = vrot.lane.b32.xlu1 %v2584_v20, %s4586_s16  ;;  %2605 = vrot.lane.b32.xlu0 %v2585_v44, %s4586_s16  ;;  %v2703_v20 = vmul.f32 %v5800_v8, %v4921_v38  ;;  %v5818_v44 = vpop.permute.xlu1 %2460 }
 0x547   :  { %2719 = vrot.lane.b32.xlu0 %v2702_v30, %s4588_s17  ;;  %2717 = vrot.lane.b32.xlu1 %v2701_v29, %s4588_s17  ;;  %v1933_v30 = vmul.f32 %v5647_v52, %v4962_v1  ;;  %v2109_v29 = vmul.f32 %v5784_v22, %v4904_v9  ;;  %v5830_v7 = vpop.permute.xlu1 %1639 }
 0x548   :  { %8249 = vst [vmem:[#allocation137_spill] sm:$0xff] %v5830_v7  ;;  %v2762_v7 = vmul.f32 %v5794_v28, %v4923_v6 }
 0x54b   :  { %1953 = vrot.lane.b32.xlu0 %v1932_v14, %s4581_s10  ;;  %2721 = vrot.lane.b32.xlu1 %v2703_v20, %s4588_s17  ;;  %v2108_v14 = vmul.f32 %v5784_v22, %v4906_v11  ;;  %v2645_v20 = vmul.f32 %v5762_v33, %v4959_v12  ;;  %v5842_v34 = vpop.permute.xlu1 %1641 }
 0x54c   :  { %8250 = vst [vmem:[#allocation138_spill] sm:$0xff] %v5842_v34 }
 0x54f   :  { %2123 = vrot.lane.b32.xlu0 %v2107_v59, %s4563_s9  ;;  %1955 = vrot.lane.b32.xlu1 %v1933_v30, %s4581_s10  ;;  %v2644_v59 = vmul.f32 %v5762_v33, %v4929_v32  ;;  %v5840_v30 = vpop.permute.xlu0 %2282 }
 0x553   :  { %2127 = vrot.lane.b32.xlu0 %v2109_v29, %s4563_s9  ;;  %2125 = vrot.lane.b32.xlu1 %v2108_v14, %s4563_s9  ;;  %v2761_v29 = vmul.f32 %v5794_v28, %v4918_v26  ;;  %v5857_v34 = vpop.permute.xlu0 %2878 }
 0x557   :  { %2665 = vrot.lane.b32.xlu0 %v2645_v20, %s4587_s4  ;;  %2663 = vrot.lane.b32.xlu1 %v2644_v59, %s4587_s4  ;;  %v26_v20 = vld [vmem:[%s7877_s5 + $0x10] sm:$0xff]  ;;  %v2763_v59 = vmul.f32 %v5794_v28, %v4921_v38 }
 0x559   :  { %v5850_v14 = vpop.permute.xlu1 %1751 }
 0x55a   :  { %8251 = vst [vmem:[#allocation139_spill] sm:$0xff] %v5850_v14  ;;  %v5865_v14 = vpop.permute.xlu0 %1749 }
 0x55b   :  { %2779 = vrot.lane.b32.xlu0 %v2762_v7, %s4589_s18  ;;  %2777 = vrot.lane.b32.xlu1 %v2761_v29, %s4589_s18  ;;  %v27_v7 = vld [vmem:[%s7877_s5 + $0x18] sm:$0xff]  ;;  %v1804_v29 = vmul.f32 %v5772_v63, %v4912_v3  ;;  %8252 = vst [vmem:[#allocation140_spill] sm:$0xff] %v5865_v14  ;;  %v1805_v14 = vmul.f32 %v5772_v63, %v4935_v25 }
 0x55d   :  { %v5867_v35 = vpop.permute.xlu1 %1943 }
 0x55e   :  { %8253 = vst [vmem:[#allocation141_spill] sm:$0xff] %v5867_v35 }
 0x55f   :  { %2939 = vperm.xlu0 %4248, %v26_v20   ;;  %2781 = vrot.lane.b32.xlu1 %v2763_v59, %s4589_s18  ;;  %v1740_v20 = vmul.f32 0.0, %v5641_v42  ;;  %v5875_v59 = vpop.permute.xlu0 %1753  ;;  %v1993_v42 = vmul.f32 %v5665_v43, %v4962_v1 }
 0x560   :  { %8254 = vst [vmem:[#allocation142_spill] sm:$0xff] %v5875_v59 }
 0x561   :  { %v5877_v16 = vpop.permute.xlu1 %1947 }
 0x562   :  { %8255 = vst [vmem:[#allocation143_spill] sm:$0xff] %v5877_v16  ;;  %v2286_v16 = vmul.f32 %v5840_v30, %v4906_v11 }
 0x563   :  { %1823 = vrot.lane.b32.xlu0 %v1804_v29, %s4560_s30  ;;  %3054 = vperm.xlu1 %4249, %v27_v7   ;;  %v2285_v29 = vmul.f32 %v5840_v30, %v4899_v58  ;;  %v5889_v7 = vpop.permute.xlu0 %1945 }
 0x564   :  { %8256 = vst [vmem:[#allocation144_spill] sm:$0xff] %v5889_v7 }
 0x567   :  { %2013 = vrot.lane.b32.xlu0 %v1992_v36, %s4582_s11  ;;  %1763 = vrot.lane.b32.xlu1 %v1740_v20, %s4580_s8  ;;  %v2287_v36 = vmul.f32 %v5840_v30, %v4904_v9  ;;  %v5891_v20 = vpop.permute.xlu1 %1755 }
 0x568   :  { %8257 = vst [vmem:[#allocation145_spill] sm:$0xff] %v5891_v20  ;;  %v2704_v20 = vmul.f32 %v5800_v8, %v4929_v32 }
 0x56b   :  { %1825 = vrot.lane.b32.xlu1 %v1805_v14, %s4560_s30  ;;  %2301 = vrot.lane.b32.xlu0 %v2285_v29, %s4565_s12  ;;  %v2705_v14 = vmul.f32 %v5800_v8, %v4959_v12  ;;  %v5903_v35 = vpop.permute.xlu1 %1757 }
 0x56c   :  { %8258 = vst [vmem:[#allocation146_spill] sm:$0xff] %v5903_v35 }
 0x56f   :  { %2015 = vrot.lane.b32.xlu1 %v1993_v42, %s4582_s11  ;;  %2305 = vrot.lane.b32.xlu0 %v2287_v36, %s4565_s12  ;;  %v2822_v42 = vmul.f32 %v5808_v55, %v4923_v6  ;;  %v5916_v7 = vpop.permute.xlu1 %2005 }
 0x570   :  { %8260 = vst [vmem:[#allocation148_spill] sm:$0xff] %v5916_v7 }
 0x572   :  { %v5899_v29 = vpop.permute.xlu0 %1668 }
 0x573   :  { %2303 = vrot.lane.b32.xlu1 %v2286_v16, %s4565_s12  ;;  %2725 = vrot.lane.b32.xlu0 %v2705_v14, %s4588_s17  ;;  %v2821_v16 = vmul.f32 %v5808_v55, %v4918_v26  ;;  %v1934_v14 = vmul.f32 0.0, %v5647_v52  ;;  %v2052_v52 = vmul.f32 %v5684_v40, %v4987_v21 }
 0x576   :  { %v5909_v36 = vpop.permute.xlu0 %2003 }
 0x577   :  { %8259 = vst [vmem:[#allocation147_spill] sm:$0xff] %v5909_v36  ;;  %2723 = vrot.lane.b32.xlu1 %v2704_v20, %s4588_s17  ;;  %2839 = vrot.lane.b32.xlu0 %v2822_v42, %s4590_s23  ;;  %v2823_v36 = vmul.f32 %v5808_v55, %v4921_v38  ;;  %v2053_v20 = vmul.f32 %v5684_v40, %v4962_v1 }
 0x57a   :  { %v5918_v35 = vpop.permute.xlu0 %2007 }
 0x57b   :  { %8261 = vst [vmem:[#allocation149_spill] sm:$0xff] %v5918_v35  ;;  %2837 = vrot.lane.b32.xlu1 %v2821_v16, %s4590_s23  ;;  %1957 = vrot.lane.b32.xlu0 %v1934_v14, %s4581_s10  ;;  %v2111_v16 = vmul.f32 %v5784_v22, %v4935_v25 }
 0x57e   :  { %v5926_v42 = vpop.permute.xlu1 %1865  ;;  %v5928_v59 = vpop.permute.xlu0 %1949 }
 0x57f   :  { %8262 = vst [vmem:[#allocation150_spill] sm:$0xff] %v5928_v59  ;;  %2841 = vrot.lane.b32.xlu1 %v2823_v36, %s4590_s23  ;;  %2075 = vrot.lane.b32.xlu0 %v2053_v20, %s4583_s13  ;;  %v2110_v59 = vmul.f32 %v5784_v22, %v4912_v3  ;;  %v2464_v36 = vmul.f32 %v5818_v44, %v4906_v11 }
 0x582   :  { %v5936_v14 = vpop.permute.xlu1 %1951  ;;  %v5938_v35 = vpop.permute.xlu0 %2063 }
 0x583   :  { %8263 = vst [vmem:[#allocation151_spill] sm:$0xff] %v5936_v14  ;;  %8264 = vst [vmem:[#allocation152_spill] sm:$0xff] %v5938_v35  ;;  %2073 = vrot.lane.b32.xlu1 %v2052_v52, %s4583_s13  ;;  %2131 = vrot.lane.b32.xlu0 %v2111_v16, %s4563_s9  ;;  %v2463_v14 = vmul.f32 %v5818_v44, %v4899_v58  ;;  %v2764_v52 = vmul.f32 %v5794_v28, %v4929_v32 }
 0x586   :  { %v5946_v20 = vpop.permute.xlu1 %2065  ;;  %v5948_v7 = vpop.permute.xlu0 %2067 }
 0x587   :  { %8265 = vst [vmem:[#allocation153_spill] sm:$0xff] %v5946_v20  ;;  %8266 = vst [vmem:[#allocation154_spill] sm:$0xff] %v5948_v7  ;;  %2129 = vrot.lane.b32.xlu1 %v2110_v59, %s4563_s9  ;;  %2481 = vrot.lane.b32.xlu0 %v2464_v36, %s4567_s28  ;;  %v2465_v7 = vmul.f32 %v5818_v44, %v4904_v9  ;;  %v2881_v59 = vmul.f32 %v5857_v34, %v4918_v26 }
 0x58a   :  { %v5956_v16 = vpop.permute.xlu1 %2163  ;;  %v5958_v35 = vpop.permute.xlu0 %2009 }
 0x58b   :  { %8267 = vst [vmem:[#allocation155_spill] sm:$0xff] %v5956_v16  ;;  %8268 = vst [vmem:[#allocation156_spill] sm:$0xff] %v5958_v35  ;;  %2479 = vrot.lane.b32.xlu1 %v2463_v14, %s4567_s28  ;;  %2783 = vrot.lane.b32.xlu0 %v2764_v52, %s4589_s18  ;;  %v2765_v14 = vmul.f32 %v5794_v28, %v4959_v12  ;;  %v2883_v52 = vmul.f32 %v5857_v34, %v4921_v38 }
 0x58e   :  { %v5966_v36 = vpop.permute.xlu1 %2011  ;;  %v5968_v20 = vpop.permute.xlu0 %2241 }
 0x58f   :  { %8269 = vst [vmem:[#allocation157_spill] sm:$0xff] %v5966_v36  ;;  %8270 = vst [vmem:[#allocation158_spill] sm:$0xff] %v5968_v20  ;;  %2483 = vrot.lane.b32.xlu1 %v2465_v7, %s4567_s28  ;;  %2897 = vrot.lane.b32.xlu0 %v2881_v59, %s4591_s24  ;;  %v2882_v7 = vmul.f32 %v5857_v34, %v4923_v6  ;;  %v2230_v59 = vmul.f32 %v5703_v49, %v4987_v21 }
 0x592   :  { %v5976_v35 = vpop.permute.xlu1 %2243  ;;  %v5978_v16 = vpop.permute.xlu0 %2245 }
 0x593   :  { %8271 = vst [vmem:[#allocation159_spill] sm:$0xff] %v5976_v35  ;;  %8272 = vst [vmem:[#allocation160_spill] sm:$0xff] %v5978_v16  ;;  %2785 = vrot.lane.b32.xlu1 %v2765_v14, %s4589_s18  ;;  %2901 = vrot.lane.b32.xlu0 %v2883_v52, %s4591_s24  ;;  %v1994_v16 = vmul.f32 0.0, %v5665_v43  ;;  %v2288_v14 = vmul.f32 %v5840_v30, %v4912_v3 }
 0x596   :  { %v5986_v36 = vpop.permute.xlu1 %2341  ;;  %v5988_v20 = vpop.permute.xlu0 %2069 }
 0x597   :  { %8273 = vst [vmem:[#allocation161_spill] sm:$0xff] %v5988_v20  ;;  %2899 = vrot.lane.b32.xlu1 %v2882_v7, %s4591_s24  ;;  %2251 = vrot.lane.b32.xlu0 %v2230_v59, %s4584_s14  ;;  %v2231_v20 = vmul.f32 %v5703_v49, %v4962_v1  ;;  %v2824_v7 = vmul.f32 %v5808_v55, %v4929_v32 }
 0x59a   :  { %v5995_v52 = vpop.permute.xlu1 %2071  ;;  %v5997_v35 = vpop.permute.xlu0 %2419 }
 0x59b   :  { %8274 = vst [vmem:[#allocation162_spill] sm:$0xff] %v5995_v52  ;;  %8275 = vst [vmem:[#allocation163_spill] sm:$0xff] %v5997_v35  ;;  %2017 = vrot.lane.b32.xlu1 %v1994_v16, %s4582_s11  ;;  %2307 = vrot.lane.b32.xlu0 %v2288_v14, %s4565_s12  ;;  %v2289_v52 = vmul.f32 %v5840_v30, %v4935_v25  ;;  %v2054_v16 = vmul.f32 0.0, %v5684_v40  ;;  %v2408_v40 = vmul.f32 %v5722_v37, %v4987_v21 }
 0x59e   :  { %v6005_v59 = vpop.permute.xlu1 %2421  ;;  %v6007_v43 = vpop.permute.xlu0 %2423 }
 0x59f   :  { %8276 = vst [vmem:[#allocation164_spill] sm:$0xff] %v6005_v59  ;;  %8277 = vst [vmem:[#allocation165_spill] sm:$0xff] %v6007_v43  ;;  %2253 = vrot.lane.b32.xlu1 %v2231_v20, %s4584_s14  ;;  %2843 = vrot.lane.b32.xlu0 %v2824_v7, %s4590_s23  ;;  %v2825_v43 = vmul.f32 %v5808_v55, %v4959_v12  ;;  %v2409_v20 = vmul.f32 %v5722_v37, %v4962_v1 }
 0x5a2   :  { %v6014_v14 = vpop.permute.xlu1 %2519  ;;  %v6016_v35 = vpop.permute.xlu0 %2247 }
 0x5a3   :  { %8278 = vst [vmem:[#allocation166_spill] sm:$0xff] %v6014_v14  ;;  %8279 = vst [vmem:[#allocation167_spill] sm:$0xff] %v6016_v35  ;;  %2309 = vrot.lane.b32.xlu1 %v2289_v52, %s4565_s12  ;;  %2077 = vrot.lane.b32.xlu0 %v2054_v16, %s4583_s13  ;;  %v2467_v52 = vmul.f32 %v5818_v44, %v4935_v25  ;;  %v2884_v25 = vmul.f32 %v5857_v34, %v4929_v32 }
 0x5a6   :  { %v6024_v7 = vpop.permute.xlu1 %2249  ;;  %v6026_v59 = vpop.permute.xlu0 %2597 }
 0x5a7   :  { %8280 = vst [vmem:[#allocation168_spill] sm:$0xff] %v6024_v7  ;;  %2845 = vrot.lane.b32.xlu1 %v2825_v43, %s4590_s23  ;;  %2431 = vrot.lane.b32.xlu0 %v2409_v20, %s4585_s15  ;;  %v2466_v7 = vmul.f32 %v5818_v44, %v4912_v3  ;;  %v2885_v43 = vmul.f32 %v5857_v34, %v4959_v12  ;;  %v2232_v12 = vmul.f32 0.0, %v5703_v49 }
 0x5aa   :  { %v6034_v16 = vpop.permute.xlu1 %2599  ;;  %v6036_v35 = vpop.permute.xlu0 %2601 }
 0x5ab   :  { %8281 = vst [vmem:[#allocation169_spill] sm:$0xff] %v6036_v35  ;;  %2429 = vrot.lane.b32.xlu1 %v2408_v40, %s4585_s15  ;;  %2487 = vrot.lane.b32.xlu0 %v2467_v52, %s4567_s28  ;;  %v2586_v40 = vmul.f32 %v5741_v46, %v4987_v21 }
 0x5ae   :  { %v6044_v20 = vpop.permute.xlu1 %2425  ;;  %v6046_v14 = vpop.permute.xlu0 %2427 }
 0x5af   :  { %8282 = vst [vmem:[#allocation170_spill] sm:$0xff] %v6044_v20  ;;  %8283 = vst [vmem:[#allocation171_spill] sm:$0xff] %v6046_v14  ;;  %2485 = vrot.lane.b32.xlu1 %v2466_v7, %s4567_s28  ;;  %2905 = vrot.lane.b32.xlu0 %v2885_v43, %s4591_s24  ;;  %v1623_v7 = vmul.f32 %v5582_v51, %v4944_v18  ;;  %v2587_v20 = vmul.f32 %v5741_v46, %v4962_v1  ;;  %v2410_v51 = vmul.f32 0.0, %v5722_v37 }
 0x5b0   :  { %v1807_v37 = vmul.f32 %v5772_v63, %v4944_v18 }
 0x5b2   :  { %v6054_v52 = vpop.permute.xlu1 %2657  ;;  %v6056_v35 = vpop.permute.xlu0 %2659 }
 0x5b3   :  { %8284 = vst [vmem:[#allocation172_spill] sm:$0xff] %v6054_v52  ;;  %8285 = vst [vmem:[#allocation173_spill] sm:$0xff] %v6056_v35  ;;  %2903 = vrot.lane.b32.xlu1 %v2884_v25, %s4591_s24  ;;  %2607 = vrot.lane.b32.xlu0 %v2586_v40, %s4586_s16  ;;  %v2646_v25 = vmul.f32 %v5762_v33, %v4987_v21 }
 0x5b6   :  { %v6063_v43 = vpop.permute.xlu1 %2661  ;;  %v6065_v14 = vpop.permute.xlu0 %1759 }
 0x5b7   :  { %8286 = vst [vmem:[#allocation174_spill] sm:$0xff] %v6063_v43  ;;  %8287 = vst [vmem:[#allocation175_spill] sm:$0xff] %v6065_v14  ;;  %2255 = vrot.lane.b32.xlu1 %v2232_v12, %s4584_s14  ;;  %1643 = vrot.lane.b32.xlu0 %v1623_v7, %s4559_s29  ;;  %v1806_v12 = vmul.f32 %v5772_v63, %v4952_v56 }
 0x5ba   :  { %v6073_v40 = vpop.permute.xlu1 %1761  ;;  %v6075_v49 = vpop.permute.xlu0 %1817 }
 0x5bb   :  { %8288 = vst [vmem:[#allocation176_spill] sm:$0xff] %v6073_v40  ;;  %2609 = vrot.lane.b32.xlu1 %v2587_v20, %s4586_s16  ;;  %2667 = vrot.lane.b32.xlu0 %v2646_v25, %s4587_s4  ;;  %v2647_v40 = vmul.f32 %v5762_v33, %v4962_v1  ;;  %v2588_v20 = vmul.f32 0.0, %v5741_v46  ;;  %v2706_v46 = vmul.f32 %v5800_v8, %v4987_v21 }
 0x5be   :  { %v6082_v7 = vpop.permute.xlu1 %1819  ;;  %v6084_v14 = vpop.permute.xlu0 %1821 }
 0x5bf   :  { %8289 = vst [vmem:[#allocation177_spill] sm:$0xff] %v6084_v14  ;;  %2433 = vrot.lane.b32.xlu1 %v2410_v51, %s4585_s15  ;;  %1827 = vrot.lane.b32.xlu0 %v1806_v12, %s4560_s30  ;;  %v2707_v51 = vmul.f32 %v5800_v8, %v4962_v1 }
 0x5c2   :  { %v6091_v43 = vpop.permute.xlu1 %2603  ;;  %v6093_v25 = vpop.permute.xlu0 %2605 }
 0x5c3   :  { %8290 = vst [vmem:[#allocation178_spill] sm:$0xff] %v6091_v43  ;;  %8291 = vst [vmem:[#allocation179_spill] sm:$0xff] %v6093_v25  ;;  %2669 = vrot.lane.b32.xlu1 %v2647_v40, %s4587_s4  ;;  %2611 = vrot.lane.b32.xlu0 %v2588_v20, %s4586_s16  ;;  %v2113_v40 = vmul.f32 %v5784_v22, %v4944_v18  ;;  %v858_v20 = vmul.f32 0.0, %v4784_v5  ;;  %v468_v25 = vmul.f32 0.0, %v4750_v47 }
 0x5c6   :  { %v6101_v12 = vpop.permute.xlu1 %2717  ;;  %v6103_v52 = vpop.permute.xlu0 %2719 }
 0x5c7   :  { %8292 = vst [vmem:[#allocation180_spill] sm:$0xff] %v6101_v12  ;;  %8293 = vst [vmem:[#allocation181_spill] sm:$0xff] %v6103_v52  ;;  %1829 = vrot.lane.b32.xlu1 %v1807_v37, %s4560_s30  ;;  %2729 = vrot.lane.b32.xlu0 %v2707_v51, %s4588_s17  ;;  %v859_v37 = vmul.f32 %v4784_v5, %v4899_v58  ;;  %v860_v51 = vmul.f32 %v4784_v5, %v4906_v11 }
 0x5c8   :  { %v861_v12 = vmul.f32 %v4784_v5, %v4904_v9  ;;  %v471_v52 = vmul.f32 %v4750_v47, %v4921_v38  ;;  %v1000_v58 = vsel %vm520_vm3, %v5186_v24, %v5154_v60  ;;  %v1001_v11 = vsel %vm520_vm3, %v5154_v60, %v5332_v4 }
 0x5c9   :  { %v2112_v9 = vmul.f32 %v5784_v22, %v4952_v56  ;;  %v6146_v38 = vmul.f32 %v4784_v5, %v4912_v3  ;;  %v6150_v24 = vmul.f32 %v4750_v47, %v4929_v32  ;;  %v1179_v3 = vsel %vm8096_vm4, %v5174_v2, %v5340_v23 }
 0x5ca   :  { %v6113_v43 = vpop.permute.xlu1 %2721  ;;  %v6115_v35 = vpop.permute.xlu0 %1953  ;;  %v1015_v32 = vadd.f32 %v1000_v58, %v858_v20  ;;  %v1180_v5 = vsel %vm8096_vm4, %v5340_v23, %v5182_v17  ;;  %v1808_v20 = vmul.f32 0.0, %v5772_v63 }
 0x5cb   :  { %8294 = vst [vmem:[#allocation182_spill] sm:$0xff] %v6113_v43  ;;  %8295 = vst [vmem:[#allocation183_spill] sm:$0xff] %v6115_v35  ;;  %2727 = vrot.lane.b32.xlu1 %v2706_v46, %s4588_s17  ;;  %2135 = vrot.lane.b32.xlu0 %v2113_v40, %s4563_s9  ;;  %v469_v43 = vmul.f32 %v4750_v47, %v4918_v26  ;;  %v470_v35 = vmul.f32 %v4750_v47, %v4923_v6 }
 0x5cc   :  { %v2766_v26 = vmul.f32 %v5794_v28, %v4987_v21  ;;  %v1002_v6 = vsel %vm520_vm3, %v5332_v4, %v5164_v13  ;;  %v1003_v40 = vsel %vm520_vm3, %v5164_v13, %v5336_v31  ;;  %v1178_v4 = vsel %vm8096_vm4, %v5265_v10, %v5174_v2 }
 0x5cd   :  { %v1181_v13 = vsel %vm8096_vm4, %v5182_v17, %v5344_v45  ;;  %v521_v10 = vsel %vm520_vm3, %v5052_v57, %v5348_v53  ;;  %v522_v2 = vsel %vm520_vm3, %v5348_v53, %v5192_v61  ;;  %v1018_v58 = vadd.f32 %v1003_v40, %v861_v12 }
 0x5ce   :  { %v6152_v60 = vpop.permute.xlu1 %1955  ;;  %v6154_v46 = vpop.permute.xlu0 %2123  ;;  %v523_v57 = vsel %vm520_vm3, %v5192_v61, %v5352_v54  ;;  %v524_v53 = vsel %vm520_vm3, %v5352_v54, %v5202_v15  ;;  %v582_v61 = vsel %vm8096_vm4, %v5356_v19, %v5210_v41  ;;  %v583_v54 = vsel %vm8096_vm4, %v5210_v41, %v5363_v0 }
 0x5cf   :  { %8296 = vst [vmem:[#allocation184_spill] sm:$0xff] %v6152_v60  ;;  %2133 = vrot.lane.b32.xlu1 %v2112_v9, %s4563_s9  ;;  %2787 = vrot.lane.b32.xlu0 %v2766_v26, %s4589_s18  ;;  %v1016_v60 = vadd.f32 %v1001_v11, %v859_v37  ;;  %v2648_v9 = vmul.f32 0.0, %v5762_v33  ;;  %v1017_v37 = vadd.f32 %v1002_v6, %v860_v51 }
 0x5d0   :  { %v6181_v11 = vadd.f32 %v1178_v4, %v1015_v32  ;;  %v581_v33 = vsel %vm8096_vm4, %v5104_v27, %v5356_v19  ;;  %v6202_v12 = vadd.f32 %v1181_v13, %v1018_v58  ;;  %v536_v51 = vadd.f32 %v521_v10, %v468_v25  ;;  %v8300_v32 = vld [vmem:[#allocation65_spill] sm:$0xff]  ;;  %v8301_v13 = vld [vmem:[#allocation28_spill] sm:$0xff] }
 0x5d1   :  { %v6183_v23 = vadd.f32 %v1179_v3, %v1016_v60  ;;  %v6200_v63 = vadd.f32 %v1180_v5, %v1017_v37  ;;  %v537_v6 = vadd.f32 %v522_v2, %v469_v43  ;;  %v2767_v27 = vmul.f32 %v5794_v28, %v4962_v1  ;;  %v8303_v2 = vld [vmem:[#allocation19_spill] sm:$0xff] }
 0x5d2   :  { %v6185_v26 = vpop.permute.xlu1 %2125  ;;  %v6187_v17 = vpop.permute.xlu0 %2127  ;;  %v2291_v60 = vmul.f32 %v5840_v30, %v4944_v18  ;;  %v538_v5 = vadd.f32 %v523_v57, %v470_v35  ;;  %v539_v40 = vadd.f32 %v524_v53, %v471_v52  ;;  %v596_v4 = vadd.f32 %v581_v33, %v536_v51 }
 0x5d3   :  { %8297 = vst [vmem:[#allocation185_spill] sm:$0xff] %v6187_v17  ;;  %2671 = vrot.lane.b32.xlu1 %v2648_v9, %s4587_s4  ;;  %1831 = vrot.lane.b32.xlu0 %v1808_v20, %s4560_s30  ;;  %v584_v43 = vsel %vm8096_vm4, %v5363_v0, %v5220_v50  ;;  %v641_v41 = vsel %vm8094_vm5, %v5117_v62, %v5371_v39  ;;  %v8302_v62 = vld [vmem:[#allocation66_spill] sm:$0xff] }
 0x5d4   :  { %v642_v3 = vsel %vm8094_vm5, %v5371_v39, %v5230_v48  ;;  %v643_v35 = vsel %vm8094_vm5, %v5230_v48, %v8300_v32  ;;  %v597_v0 = vadd.f32 %v582_v61, %v537_v6  ;;  %v598_v52 = vadd.f32 %v583_v54, %v538_v5  ;;  %v8304_v39 = vld [vmem:[#allocation30_spill] sm:$0xff]  ;;  %v8305_v48 = vld [vmem:[#allocation67_spill] sm:$0xff]  ;;  %v8307_v5 = vld [vmem:[#allocation68_spill] sm:$0xff] }
 0x5d5   :  { %v644_v10 = vsel %vm8094_vm5, %v8300_v32, %v8301_v13  ;;  %v701_v9 = vsel %vm8090_vm6, %v8303_v2, %v8302_v62  ;;  %v702_v20 = vsel %vm8090_vm6, %v8302_v62, %v8304_v39  ;;  %v703_v37 = vsel %vm8090_vm6, %v8304_v39, %v8305_v48  ;;  %v8308_v32 = vld [vmem:[#allocation21_spill] sm:$0xff] }
 0x5d6   :  { %v6217_v25 = vpop.permute.xlu1 %2663  ;;  %v6219_v19 = vpop.permute.xlu0 %2665  ;;  %v2290_v58 = vmul.f32 %v5840_v30, %v4952_v56  ;;  %v2826_v57 = vmul.f32 %v5808_v55, %v4987_v21  ;;  %v599_v53 = vadd.f32 %v584_v43, %v539_v40  ;;  %v656_v33 = vadd.f32 %v641_v41, %v596_v4  ;;  %v8309_v2 = vld [vmem:[#allocation33_spill] sm:$0xff] }
 0x5d7   :  { %8298 = vst [vmem:[#allocation186_spill] sm:$0xff] %v6217_v25  ;;  %8299 = vst [vmem:[#allocation187_spill] sm:$0xff] %v6219_v19  ;;  %2789 = vrot.lane.b32.xlu1 %v2767_v27, %s4589_s18  ;;  %2313 = vrot.lane.b32.xlu0 %v2291_v60, %s4565_s12  ;;  %v657_v51 = vadd.f32 %v642_v3, %v597_v0  ;;  %v658_v6 = vadd.f32 %v643_v35, %v598_v52  ;;  %v8306_v27 = vld [vmem:[#allocation32_spill] sm:$0xff]  ;;  %v8310_v3 = vld [vmem:[#allocation69_spill] sm:$0xff] }
 0x5d8   :  { %v704_v60 = vsel %vm8090_vm6, %v8305_v48, %v8306_v27  ;;  %v761_v62 = vsel %vm8079_vm7, %v8308_v32, %v8307_v5  ;;  %v762_v39 = vsel %vm8079_vm7, %v8307_v5, %v8309_v2  ;;  %v659_v40 = vadd.f32 %v644_v10, %v599_v53  ;;  %v8311_v0 = vld [vmem:[#allocation34_spill] sm:$0xff]  ;;  %v8313_v10 = vld [vmem:[#allocation23_spill] sm:$0xff]  ;;  %v8315_v53 = vld [vmem:[#allocation36_spill] sm:$0xff] }
 0x5d9   :  { %v716_v4 = vadd.f32 %v701_v9, %v656_v33  ;;  %v717_v43 = vadd.f32 %v702_v20, %v657_v51  ;;  %v718_v41 = vadd.f32 %v703_v37, %v658_v6  ;;  %v763_v35 = vsel %vm8079_vm7, %v8309_v2, %v8310_v3  ;;  %v8316_v51 = vld [vmem:[#allocation71_spill] sm:$0xff]  ;;  %v8318_v2 = vld [vmem:[#allocation37_spill] sm:$0xff] }
 0x5da   :  { %v6248_v61 = vpop.permute.xlu1 %2777  ;;  %v6250_v54 = vpop.permute.xlu0 %2779  ;;  %v764_v52 = vsel %vm8079_vm7, %v8310_v3, %v8311_v0  ;;  %v2708_v48 = vmul.f32 0.0, %v5800_v8  ;;  %v2114_v5 = vmul.f32 0.0, %v5784_v22  ;;  %v719_v32 = vadd.f32 %v704_v60, %v659_v40  ;;  %v8317_v22 = vld [vmem:[#allocation81_spill] sm:$0xff]  ;;  %v8319_v40 = vld [vmem:[#allocation72_spill] sm:$0xff]  ;;  %v8321_v3 = vld [vmem:[#allocation39_spill] sm:$0xff] }
 0x5db   :  { %2311 = vrot.lane.b32.xlu1 %v2290_v58, %s4565_s12  ;;  %2847 = vrot.lane.b32.xlu0 %v2826_v57, %s4590_s23  ;;  %v776_v58 = vadd.f32 %v761_v62, %v716_v4  ;;  %v777_v47 = vadd.f32 %v762_v39, %v717_v43  ;;  %v8312_v57 = vld [vmem:[#allocation70_spill] sm:$0xff]  ;;  %v823_v8 = vsel %vm8073_vm8, %v8315_v53, %v8316_v51  ;;  %v8320_v4 = vld [vmem:[#allocation24_spill] sm:$0xff] }
 0x5dc   :  { %v821_v9 = vsel %vm8073_vm8, %v8313_v10, %v8312_v57  ;;  %v822_v33 = vsel %vm8073_vm8, %v8312_v57, %v8315_v53  ;;  %v525_v6 = vsel %vm520_vm3, %v5202_v15, %v8317_v22  ;;  %v778_v60 = vadd.f32 %v763_v35, %v718_v41  ;;  %v8322_v10 = vld [vmem:[#allocation83_spill] sm:$0xff] }
 0x5dd   :  { %v779_v62 = vadd.f32 %v764_v52, %v719_v32  ;;  %v824_v39 = vsel %vm8073_vm8, %v8316_v51, %v8318_v2  ;;  %v941_v43 = vsel %vm940_vm9, %v8320_v4, %v8319_v40  ;;  %v942_v57 = vsel %vm940_vm9, %v8319_v40, %v8321_v3  ;;  %v8325_v40 = vld [vmem:[#allocation73_spill] sm:$0xff]  ;;  %v8327_v22 = vld [vmem:[#allocation87_spill] sm:$0xff] }
 0x5de   :  { %v6274_v20 = vpop.permute.xlu1 %2781  ;;  %v6276_v37 = vpop.permute.xlu0 %2939  ;;  %v585_v15 = vsel %vm8096_vm4, %v5220_v50, %v8322_v10  ;;  %v2827_v41 = vmul.f32 %v5808_v55, %v4962_v1  ;;  %v2469_v35 = vmul.f32 %v5818_v44, %v4944_v18  ;;  %v836_v52 = vadd.f32 %v821_v9, %v776_v58  ;;  %v8326_v50 = vld [vmem:[#allocation41_spill] sm:$0xff] }
 0x5df   :  { %8314 = vst [vmem:[#allocation65_spill] sm:$0xff] %v6276_v37  ;;  %2731 = vrot.lane.b32.xlu1 %v2708_v48, %s4588_s17  ;;  %2137 = vrot.lane.b32.xlu0 %v2114_v5, %s4563_s9  ;;  %v837_v48 = vadd.f32 %v822_v33, %v777_v47  ;;  %v838_v5 = vadd.f32 %v823_v8, %v778_v60  ;;  %v8328_v8 = vld [vmem:[#allocation74_spill] sm:$0xff] }
 0x5e0   :  { %v540_v32 = vadd.f32 %v525_v6, %v6150_v24  ;;  %v943_v4 = vsel %vm940_vm9, %v8321_v3, %v8325_v40  ;;  %v944_v10 = vsel %vm940_vm9, %v8325_v40, %v8326_v50  ;;  %v645_v47 = vsel %vm8094_vm5, %v8301_v13, %v8327_v22  ;;  %v8329_v6 = vld [vmem:[#allocation31_spill] sm:$0xff]  ;;  %v8330_v3 = vld [vmem:[#allocation90_spill] sm:$0xff] }
 0x5e1   :  { %v839_v24 = vadd.f32 %v824_v39, %v779_v62  ;;  %v956_v58 = vadd.f32 %v941_v43, %v836_v52  ;;  %v957_v9 = vadd.f32 %v942_v57, %v837_v48  ;;  %v1119_v60 = vsel %vm8072_vm10, %v8329_v6, %v8328_v8  ;;  %v8331_v62 = vld [vmem:[#allocation42_spill] sm:$0xff]  ;;  %v8334_v52 = vld [vmem:[#allocation75_spill] sm:$0xff] }
 0x5e2   :  { %v6306_v53 = vpop.permute.xlu1 %3054  ;;  %v6308_v51 = vpop.permute.xlu0 %1823  ;;  %v600_v33 = vadd.f32 %v585_v15, %v540_v32  ;;  %v705_v40 = vsel %vm8090_vm6, %v8306_v27, %v8330_v3  ;;  %v2468_v18 = vmul.f32 %v5818_v44, %v4952_v56  ;;  %v2886_v13 = vmul.f32 %v5857_v34, %v4987_v21  ;;  %v8335_v48 = vld [vmem:[#allocation43_spill] sm:$0xff]  ;;  %v8344_v3 = vld [vmem:[#allocation96_spill] sm:$0xff] }
 0x5e3   :  { %8323 = vst [vmem:[#allocation28_spill] sm:$0xff] %v6306_v53  ;;  %8324 = vst [vmem:[#allocation66_spill] sm:$0xff] %v6308_v51  ;;  %2849 = vrot.lane.b32.xlu1 %v2827_v41, %s4590_s23  ;;  %2491 = vrot.lane.b32.xlu0 %v2469_v35, %s4567_s28  ;;  %v958_v41 = vadd.f32 %v943_v4, %v838_v5  ;;  %v959_v35 = vadd.f32 %v944_v10, %v839_v24  ;;  %v8336_v5 = vld [vmem:[#allocation92_spill] sm:$0xff]  ;;  %v8338_v24 = vld [vmem:[#allocation55_spill] sm:$0xff]  ;;  %vm8099_vm6 = vcmask 375808   ;;  %vm8098_vm5 = vcmask 367616  }
 0x5e4   :  { %v1120_v39 = vsel %vm8072_vm10, %v8328_v8, %v8331_v62  ;;  %v660_v43 = vadd.f32 %v645_v47, %v600_v33  ;;  %v1121_v27 = vsel %vm8072_vm10, %v8331_v62, %v8334_v52  ;;  %v1122_v32 = vsel %vm8072_vm10, %v8334_v52, %v8335_v48  ;;  %v8337_v47 = vld [vmem:[#allocation76_spill] sm:$0xff]  ;;  %v8340_v52 = vld [vmem:[#allocation77_spill] sm:$0xff] }
 0x5e5   :  { %v765_v10 = vsel %vm8079_vm7, %v8311_v0, %v8336_v5  ;;  %v1134_v4 = vadd.f32 %v1119_v60, %v956_v58  ;;  %v1297_v33 = vsel %vm8071_vm11, %v8338_v24, %v8337_v47  ;;  %v8339_v8 = vld [vmem:[#allocation44_spill] sm:$0xff]  ;;  %v2768_v0 = vmul.f32 0.0, %v5794_v28 }
 0x5e6   :  { %v6334_v57 = vpop.permute.xlu1 %1763  ;;  %v6336_v15 = vpop.permute.xlu0 %2013  ;;  %v1298_v6 = vsel %vm8071_vm11, %v8337_v47, %v8339_v8  ;;  %v720_v62 = vadd.f32 %v705_v40, %v660_v43  ;;  %v2292_v58 = vmul.f32 0.0, %v5840_v30  ;;  %v1135_v60 = vadd.f32 %v1120_v39, %v957_v9  ;;  %v8343_v43 = vld [vmem:[#allocation46_spill] sm:$0xff]  ;;  %v8345_v30 = vld [vmem:[#allocation45_spill] sm:$0xff] }
 0x5e7   :  { %8332 = vst [vmem:[#allocation19_spill] sm:$0xff] %v6334_v57  ;;  %8333 = vst [vmem:[#allocation30_spill] sm:$0xff] %v6336_v15  ;;  %2489 = vrot.lane.b32.xlu1 %v2468_v18, %s4567_s28  ;;  %2907 = vrot.lane.b32.xlu0 %v2886_v13, %s4591_s24  ;;  %v1299_v57 = vsel %vm8071_vm11, %v8339_v8, %v8340_v52  ;;  %v8341_v15 = vld [vmem:[#allocation94_spill] sm:$0xff]  ;;  %v1136_v13 = vadd.f32 %v1121_v27, %v958_v41  ;;  %v8347_v27 = vld [vmem:[#allocation57_spill] sm:$0xff] }
 0x5e8   :  { %v825_v18 = vsel %vm8073_vm8, %v8318_v2, %v8341_v15  ;;  %v1137_v24 = vadd.f32 %v1122_v32, %v959_v35  ;;  %v780_v56 = vadd.f32 %v765_v10, %v720_v62  ;;  %v1312_v40 = vadd.f32 %v1297_v33, %v1134_v4  ;;  %v8346_v39 = vld [vmem:[#allocation78_spill] sm:$0xff]  ;;  %v8396_v15 = vld [vmem:[#allocation148_spill] sm:$0xff] }
 0x5e9   :  { %v1004_v8 = vsel %vm520_vm3, %v5336_v31, %v8343_v43  ;;  %v945_v2 = vsel %vm940_vm9, %v8326_v50, %v8344_v3  ;;  %v1313_v28 = vadd.f32 %v1298_v6, %v1135_v60  ;;  %v1300_v9 = vsel %vm8071_vm11, %v8340_v52, %v8345_v30  ;;  %v8348_v31 = vld [vmem:[#allocation98_spill] sm:$0xff]  ;;  %v8349_v6 = vld [vmem:[#allocation48_spill] sm:$0xff]  ;;  %v8355_v60 = vld [vmem:[#allocation63_spill] sm:$0xff] }
 0x5ea   :  { %v6363_v5 = vpop.permute.xlu1 %1825  ;;  %v6365_v47 = vpop.permute.xlu0 %2301  ;;  %v1314_v41 = vadd.f32 %v1299_v57, %v1136_v13  ;;  %v840_v35 = vadd.f32 %v825_v18, %v780_v56  ;;  %v1357_v32 = vsel %vm1356_vm12, %v8347_v27, %v8346_v39  ;;  %v1123_v10 = vsel %vm8072_vm10, %v8335_v48, %v8348_v31  ;;  %v8350_v56 = vld [vmem:[#allocation62_spill] sm:$0xff]  ;;  %v8353_v48 = vld [vmem:[#allocation100_spill] sm:$0xff]  ;;  %v8382_v31 = vld [vmem:[#allocation155_spill] sm:$0xff] }
 0x5eb   :  { %8342 = vst [vmem:[#allocation67_spill] sm:$0xff] %v6363_v5  ;;  %2791 = vrot.lane.b32.xlu1 %v2768_v0, %s4589_s18  ;;  %2315 = vrot.lane.b32.xlu0 %v2292_v58, %s4565_s12  ;;  %v2887_v50 = vmul.f32 %v5857_v34, %v4962_v1  ;;  %v2470_v4 = vmul.f32 0.0, %v5818_v44  ;;  %v1019_v33 = vadd.f32 %v1004_v8, %v6146_v38  ;;  %v8354_v44 = vld [vmem:[#allocation102_spill] sm:$0xff]  ;;  %v2828_v27 = vmul.f32 0.0, %v5808_v55  ;;  %v8398_v1 = vld [vmem:[#allocation149_spill] sm:$0xff]  ;;  %v8406_v5 = vld [vmem:[#allocation160_spill] sm:$0xff] }
 0x5ec   :  { %v1182_v57 = vsel %vm8096_vm4, %v5344_v45, %v8349_v6  ;;  %v1358_v62 = vsel %vm1356_vm12, %v8346_v39, %v8350_v56  ;;  %v960_v52 = vadd.f32 %v945_v2, %v840_v35  ;;  %v1301_v58 = vsel %vm8071_vm11, %v8345_v30, %v8353_v48  ;;  %v8356_v39 = vld [vmem:[#allocation103_spill] sm:$0xff]  ;;  %v8379_v48 = vld [vmem:[#allocation133_spill] sm:$0xff] }
 0x5ed   :  { %v1359_v38 = vsel %vm1356_vm12, %v8350_v56, %v8354_v44  ;;  %v1360_v45 = vsel %vm1356_vm12, %v8354_v44, %v8355_v60  ;;  %v1315_v13 = vadd.f32 %v1300_v9, %v1137_v24  ;;  %v1372_v8 = vadd.f32 %v1357_v32, %v1312_v40  ;;  %v6416_v56 = vld [vmem:[%s7878_s0] sm:$0xff] }
 0x5ee   :  { %v6394_v18 = vpop.permute.xlu1 %2015  ;;  %v6396_v0 = vpop.permute.xlu0 %2305  ;;  %v1138_v2 = vadd.f32 %v1123_v10, %v960_v52  ;;  %v1197_v35 = vadd.f32 %v1182_v57, %v1019_v33  ;;  %v1361_v30 = vsel %vm1356_vm12, %v8355_v60, %v8356_v39  ;;  %v1374_v40 = vadd.f32 %v1359_v38, %v1314_v41  ;;  %v8358_v33 = vld [vmem:[#allocation106_spill] sm:$0xff]  ;;  %v8359_v57 = vld [vmem:[#allocation105_spill] sm:$0xff]  ;;  %v8360_v52 = vld [vmem:[#allocation84_spill] sm:$0xff] }
 0x5ef   :  { %8351 = vst [vmem:[#allocation32_spill] sm:$0xff] %v6394_v18  ;;  %8352 = vst [vmem:[#allocation68_spill] sm:$0xff] %v6396_v0  ;;  %2909 = vrot.lane.b32.xlu1 %v2887_v50, %s4591_s24  ;;  %2493 = vrot.lane.b32.xlu0 %v2470_v4, %s4567_s28  ;;  %v1671_v50 = vmul.f32 %v6416_v56, %v5899_v29  ;;  %v1373_v4 = vadd.f32 %v1358_v62, %v1313_v28  ;;  %v8361_v60 = vld [vmem:[#allocation107_spill] sm:$0xff]  ;;  %v8362_v41 = vld [vmem:[#allocation86_spill] sm:$0xff]  ;;  %vm2257_vm11 = vcmask 539648   ;;  %vm2435_vm10 = vcmask 531456  }
 0x5f0   :  { %v1316_v24 = vadd.f32 %v1301_v58, %v1138_v2  ;;  %v1375_v9 = vadd.f32 %v1360_v45, %v1315_v13  ;;  %v1417_v55 = vsel %vm1416_vm13, %v8359_v57, %v8358_v33  ;;  %v1418_v44 = vsel %vm1416_vm13, %v8358_v33, %v8360_v52  ;;  %v8363_v58 = vld [vmem:[#allocation108_spill] sm:$0xff]  ;;  %v8364_v45 = vld [vmem:[#allocation114_spill] sm:$0xff]  ;;  %v8366_v33 = vld [vmem:[#allocation111_spill] sm:$0xff] }
 0x5f1   :  { %v1419_v18 = vsel %vm1416_vm13, %v8360_v52, %v8361_v60  ;;  %v1420_v62 = vsel %vm1416_vm13, %v8361_v60, %v8362_v41  ;;  %v1421_v38 = vsel %vm1416_vm13, %v8362_v41, %v8363_v58  ;;  %v8365_v13 = vld [vmem:[#allocation110_spill] sm:$0xff]  ;;  %v1477_v57 = vsel %vm8079_vm7, %v8364_v45, %v8366_v33  ;;  %v8370_v39 = vld [vmem:[#allocation116_spill] sm:$0xff] }
 0x5f2   :  { %v6420_v32 = vpop.permute.xlu1 %2303  ;;  %v6422_v10 = vpop.permute.xlu0 %2725  ;;  %v1376_v28 = vadd.f32 %v1361_v30, %v1316_v24  ;;  %v1476_v2 = vsel %vm8079_vm7, %v8365_v13, %v8364_v45  ;;  %v6454_v24 = vld [vmem:[%s7878_s0 + $0x10] sm:$0xff]  ;;  %v1432_v60 = vadd.f32 %v1417_v55, %v1372_v8  ;;  %v1433_v41 = vadd.f32 %v1418_v44, %v1373_v4 }
 0x5f3   :  { %8357 = vst [vmem:[#allocation21_spill] sm:$0xff] %v6422_v10  ;;  %2851 = vrot.lane.b32.xlu1 %v2828_v27, %s4590_s23  ;;  %1685 = vrot.lane.b32.xlu0 %v1671_v50, %s4559_s29  ;;  %v8367_v27 = vld [vmem:[#allocation115_spill] sm:$0xff]  ;;  %v2888_v50 = vmul.f32 0.0, %v5857_v34  ;;  %v1673_v52 = vmul.f32 %v6454_v24, %v5899_v29  ;;  %v1434_v13 = vadd.f32 %v1419_v18, %v1374_v40  ;;  %v8372_v55 = vld [vmem:[#allocation126_spill] sm:$0xff]  ;;  %v8401_v10 = vld [vmem:[#allocation152_spill] sm:$0xff]  ;;  %vm8097_vm4 = vcmask 359424  }
 0x5f4   :  { %v1478_v30 = vsel %vm8079_vm7, %v8366_v33, %v8367_v27  ;;  %v1435_v58 = vadd.f32 %v1420_v62, %v1375_v9  ;;  %v8369_v33 = vld [vmem:[#allocation112_spill] sm:$0xff]  ;;  %v1436_v8 = vadd.f32 %v1421_v38, %v1376_v28  ;;  %v1491_v18 = vadd.f32 %v1476_v2, %v6181_v11  ;;  %v8371_v9 = vld [vmem:[#allocation127_spill] sm:$0xff]  ;;  %v8373_v62 = vld [vmem:[#allocation130_spill] sm:$0xff] }
 0x5f5   :  { %v1479_v34 = vsel %vm8079_vm7, %v8367_v27, %v8369_v33  ;;  %v1480_v43 = vsel %vm8079_vm7, %v8369_v33, %v8370_v39  ;;  %v1492_v4 = vadd.f32 %v1477_v57, %v6183_v23  ;;  %v1493_v40 = vadd.f32 %v1478_v30, %v6200_v63  ;;  %v8375_v38 = vld [vmem:[#allocation128_spill] sm:$0xff]  ;;  %v8376_v57 = vld [vmem:[#allocation131_spill] sm:$0xff]  ;;  %v8378_v39 = vld [vmem:[#allocation134_spill] sm:$0xff] }
 0x5f6   :  { %v6458_v6 = vpop.permute.xlu1 %2723  ;;  %v6460_v45 = vpop.permute.xlu0 %2839  ;;  %v1591_v44 = vsel %vm1590_vm14, %v8372_v55, %v8371_v9  ;;  %v1592_v27 = vsel %vm1590_vm14, %v8371_v9, %v8373_v62  ;;  %v1494_v63 = vadd.f32 %v1479_v34, %v6202_v12  ;;  %v6489_v28 = vadd.f32 %v1480_v43, %v1197_v35  ;;  %v8380_v43 = vld [vmem:[#allocation135_spill] sm:$0xff] }
 0x5f7   :  { %8368 = vst [vmem:[#allocation33_spill] sm:$0xff] %v6458_v6  ;;  %2911 = vrot.lane.b32.xlu1 %v2888_v50, %s4591_s24  ;;  %1689 = vrot.lane.b32.xlu0 %v1673_v52, %s4559_s29  ;;  %v6482_v50 = vld [vmem:[%s7878_s0 + $0x8] sm:$0xff]  ;;  %v1593_v2 = vsel %vm1590_vm14, %v8373_v62, %v8375_v38  ;;  %v1594_v30 = vsel %vm1590_vm14, %v8375_v38, %v8376_v57  ;;  %v8381_v38 = vld [vmem:[#allocation136_spill] sm:$0xff]  ;;  %vm2673_vm7 = vcmask 392192   ;;  %v8405_v6 = vld [vmem:[#allocation158_spill] sm:$0xff] }
 0x5f8   :  { %v1672_v11 = vmul.f32 %v6482_v50, %v5899_v29  ;;  %v1869_v23 = vmul.f32 %v6482_v50, %v5926_v42  ;;  %8374 = vst [vmem:[#allocation69_spill] sm:$0xff] %v6489_v28  ;;  %v1605_v9 = vadd.f32 %v8372_v55, %v1432_v60  ;;  %v1645_v12 = vsel %vm8073_vm8, %v8379_v48, %v8378_v39 }
 0x5f9   :  { %v1646_v35 = vsel %vm8073_vm8, %v8378_v39, %v8380_v43  ;;  %v1606_v34 = vadd.f32 %v1591_v44, %v1433_v41  ;;  %v1607_v62 = vadd.f32 %v1592_v27, %v1434_v13  ;;  %v1608_v60 = vadd.f32 %v1593_v2, %v1435_v58  ;;  %v8386_v27 = vld [vmem:[#allocation140_spill] sm:$0xff]  ;;  %v8387_v2 = vld [vmem:[#allocation142_spill] sm:$0xff] }
 0x5fa   :  { %v6497_v52 = vpop.permute.xlu1 %2837  ;;  %v6499_v33 = vpop.permute.xlu0 %1957  ;;  %v1609_v55 = vadd.f32 %v1594_v30, %v1436_v8  ;;  %v1868_v57 = vmul.f32 %v6416_v56, %v5926_v42  ;;  %v2166_v3 = vmul.f32 %v6416_v56, %v8382_v31  ;;  %v6518_v39 = vadd.f32 %v8379_v48, %v1491_v18  ;;  %v8385_v8 = vld [vmem:[#allocation139_spill] sm:$0xff]  ;;  %v8388_v18 = vld [vmem:[#allocation137_spill] sm:$0xff] }
 0x5fb   :  { %8377 = vst [vmem:[#allocation34_spill] sm:$0xff] %v6499_v33  ;;  %1687 = vrot.lane.b32.xlu1 %v1672_v11, %s4559_s29  ;;  %1886 = vrot.lane.b32.xlu0 %v1869_v23, %s4560_s30  ;;  %v1647_v33 = vsel %vm8073_vm8, %v8380_v43, %v8381_v38  ;;  %v6520_v11 = vadd.f32 %v1645_v12, %v1492_v4 }
 0x5fc   :  { %v6522_v41 = vadd.f32 %v1646_v35, %v1493_v40  ;;  %v6528_v58 = vadd.f32 %v1647_v33, %v1494_v63  ;;  %v1766_v23 = vsel %vm8086_vm15, %v8386_v27, %v8385_v8  ;;  %v1767_v48 = vsel %vm8086_vm15, %v8385_v8, %v8387_v2  ;;  %v8390_v40 = vld [vmem:[#allocation144_spill] sm:$0xff]  ;;  %v8391_v63 = vld [vmem:[#allocation141_spill] sm:$0xff]  ;;  %v8392_v33 = vld [vmem:[#allocation143_spill] sm:$0xff] }
 0x5fd   :  { %v6541_v4 = vsel %vm8073_vm8, %v8381_v38, %v8388_v18  ;;  %v1960_v30 = vsel %vm1959_vm2, %v8391_v63, %v8390_v40  ;;  %v1961_v12 = vsel %vm1959_vm2, %v8390_v40, %v8392_v33  ;;  %v1782_v43 = vadd.f32 %v1766_v23, %v1606_v34  ;;  %v8395_v18 = vld [vmem:[#allocation145_spill] sm:$0xff]  ;;  %v8397_v40 = vld [vmem:[#allocation147_spill] sm:$0xff] }
 0x5fe   :  { %v6524_v13 = vpop.permute.xlu1 %2841  ;;  %v6526_v44 = vpop.permute.xlu0 %2075  ;;  %8384 = vst [vmem:[#allocation23_spill] sm:$0xff] %v6528_v58  ;;  %8389 = vst [vmem:[#allocation36_spill] sm:$0xff] %v6541_v4  ;;  %v1783_v35 = vadd.f32 %v1767_v48, %v1607_v62  ;;  %vm2613_vm8 = vcmask 523264   ;;  %v2020_v22 = vsel %vm2019_vm1, %v8397_v40, %v8396_v15  ;;  %v2021_v21 = vsel %vm2019_vm1, %v8396_v15, %v8398_v1  ;;  %v8399_v48 = vld [vmem:[#allocation146_spill] sm:$0xff]  ;;  %v8414_v4 = vld [vmem:[#allocation173_spill] sm:$0xff] }
 0x5ff   :  { %8383 = vst [vmem:[#allocation70_spill] sm:$0xff] %v6526_v44  ;;  %1884 = vrot.lane.b32.xlu1 %v1868_v57, %s4560_s30  ;;  %2182 = vrot.lane.b32.xlu0 %v2166_v3, %s4563_s9  ;;  %v1870_v57 = vmul.f32 %v6454_v24, %v5926_v42  ;;  %v2168_v3 = vmul.f32 %v6454_v24, %v8382_v31  ;;  %v8402_v58 = vld [vmem:[#allocation154_spill] sm:$0xff] }
 0x600   :  { %v1768_v44 = vsel %vm8086_vm15, %v8387_v2, %v8395_v18  ;;  %v1781_v34 = vadd.f32 %v8386_v27, %v1605_v9  ;;  %v1976_v62 = vadd.f32 %v1960_v30, %v1782_v43  ;;  %v1977_v23 = vadd.f32 %v1961_v12, %v1783_v35 }
 0x601   :  { %v1769_v2 = vsel %vm8086_vm15, %v8395_v18, %v8399_v48  ;;  %v2344_v9 = vmul.f32 %v6416_v56, %v5986_v36  ;;  %v6583_v30 = vadd.f32 %v1768_v44, %v1608_v60  ;;  %v8404_v48 = vld [vmem:[#allocation159_spill] sm:$0xff]  ;;  %vm2733_vm15 = vcmask 384000   ;;  %v28_v60 = vld [vmem:[%s7877_s5 + $0x20] sm:$0xff] }
 0x602   :  { %v6553_v38 = vpop.permute.xlu1 %2073  ;;  %v6555_v8 = vpop.permute.xlu0 %2131  ;;  %v1975_v27 = vadd.f32 %v8391_v63, %v1781_v34  ;;  %v2036_v12 = vadd.f32 %v2020_v22, %v1976_v62  ;;  %v2037_v18 = vadd.f32 %v2021_v21, %v1977_v23  ;;  %v6587_v35 = vadd.f32 %v1769_v2, %v1609_v55  ;;  %v6603_v55 = vld [vmem:[%s7878_s0 + $0x20] sm:$0xff]  ;;  %v6610_v63 = vld [vmem:[%s7878_s0 + $0x18] sm:$0xff]  ;;  %v8409_v2 = vld [vmem:[#allocation165_spill] sm:$0xff] }
 0x603   :  { %8393 = vst [vmem:[#allocation71_spill] sm:$0xff] %v6553_v38  ;;  %8394 = vst [vmem:[#allocation37_spill] sm:$0xff] %v6555_v8  ;;  %1888 = vrot.lane.b32.xlu1 %v1870_v57, %s4560_s30  ;;  %2186 = vrot.lane.b32.xlu0 %v2168_v3, %s4563_s9  ;;  %v8400_v38 = vld [vmem:[#allocation153_spill] sm:$0xff]  ;;  %v2167_v57 = vmul.f32 %v6482_v50, %v8382_v31  ;;  %v2259_v51 = vsel %vm2257_vm11, %v8404_v48, %v8406_v5  ;;  %v8407_v62 = vld [vmem:[#allocation164_spill] sm:$0xff] }
 0x604   :  { %v2080_v8 = vsel %vm2079_vm0, %v8401_v10, %v8400_v38  ;;  %v2081_v15 = vsel %vm2079_vm0, %v8400_v38, %v8402_v58  ;;  %v2258_v38 = vsel %vm2257_vm11, %v8405_v6, %v8404_v48  ;;  %v1675_v44 = vmul.f32 %v6603_v55, %v5899_v29  ;;  %v8408_v23 = vld [vmem:[#allocation163_spill] sm:$0xff] }
 0x605   :  { %v2096_v22 = vadd.f32 %v2080_v8, %v2036_v12  ;;  %v2097_v21 = vadd.f32 %v2081_v15, %v2037_v18  ;;  %v1674_v8 = vmul.f32 %v6610_v63, %v5899_v29  ;;  %v6615_v34 = vadd.f32 %v8397_v40, %v1975_v27 }
 0x606   :  { %v6585_v3 = vpop.permute.xlu1 %2129  ;;  %v2482_v43 = vpop.permute.xlu0 %2481  ;;  %v2436_v48 = vsel %vm2435_vm10, %v8408_v23, %v8407_v62  ;;  %v2437_v15 = vsel %vm2435_vm10, %v8407_v62, %v8409_v2  ;;  %v1834_v40 = vsel %vm940_vm9, %v6082_v7, %v6084_v14  ;;  %v2614_v62 = vsel %vm2613_vm8, %v6026_v59, %v6034_v16  ;;  %v8413_v14 = vld [vmem:[#allocation169_spill] sm:$0xff] }
 0x607   :  { %8403 = vst [vmem:[#allocation72_spill] sm:$0xff] %v6585_v3  ;;  %2184 = vrot.lane.b32.xlu1 %v2167_v57, %s4563_s9  ;;  %2360 = vrot.lane.b32.xlu0 %v2344_v9, %s4565_s12  ;;  %v2346_v57 = vmul.f32 %v6454_v24, %v5986_v36  ;;  %v8410_v9 = vld [vmem:[#allocation150_spill] sm:$0xff]  ;;  %v2274_v18 = vadd.f32 %v2258_v38, %v2096_v22 }
 0x608   :  { %v1962_v12 = vsel %vm1959_vm2, %v8392_v33, %v8410_v9  ;;  %v2275_v3 = vadd.f32 %v2259_v51, %v2097_v21  ;;  %v1833_v25 = vsel %vm940_vm9, %v6075_v49, %v6082_v7  ;;  %v2345_v51 = vmul.f32 %v6482_v50, %v5986_v36  ;;  %v8412_v21 = vld [vmem:[#allocation166_spill] sm:$0xff] }
 0x609   :  { %v2452_v33 = vadd.f32 %v2436_v48, %v2274_v18  ;;  %v2140_v22 = vsel %vm1356_vm12, %v6185_v26, %v6187_v17  ;;  %v2615_v7 = vsel %vm2613_vm8, %v6034_v16, %v8413_v14  ;;  %v1850_v28 = vadd.f32 %v1834_v40, %v6522_v41  ;;  %v8417_v41 = vld [vmem:[#allocation181_spill] sm:$0xff]  ;;  %v8418_v40 = vld [vmem:[#allocation180_spill] sm:$0xff] }
 0x60a   :  { %v6631_v27 = vpop.permute.xlu1 %2479  ;;  %v6633_v19 = vpop.permute.xlu0 %2783  ;;  %v2453_v38 = vadd.f32 %v2437_v15, %v2275_v3  ;;  %v2139_v3 = vsel %vm1356_vm12, %v6154_v46, %v6185_v26  ;;  %v8416_v15 = vld [vmem:[#allocation174_spill] sm:$0xff]  ;;  %v2318_v16 = vsel %vm1416_vm13, %v6420_v32, %v6396_v0 }
 0x60b   :  { %8411 = vst [vmem:[#allocation24_spill] sm:$0xff] %v6633_v19  ;;  %3169 = vperm.xlu1 %4249, %v28_v60   ;;  %2364 = vrot.lane.b32.xlu0 %v2346_v57, %s4565_s12  ;;  %v2523_v19 = vmul.f32 %v6482_v50, %v8412_v21  ;;  %v8415_v60 = vld [vmem:[#allocation172_spill] sm:$0xff]  ;;  %v2630_v48 = vadd.f32 %v2614_v62, %v2452_v33  ;;  %v8419_v0 = vld [vmem:[#allocation182_spill] sm:$0xff] }
 0x60c   :  { %v2674_v57 = vsel %vm2673_vm7, %v8415_v60, %v8414_v4  ;;  %v2675_v18 = vsel %vm2673_vm7, %v8414_v4, %v8416_v15  ;;  %v1849_v50 = vadd.f32 %v1833_v25, %v6520_v11  ;;  %v2734_v60 = vsel %vm2733_vm15, %v8418_v40, %v8417_v41 }
 0x60d   :  { %v2156_v26 = vadd.f32 %v2140_v22, %v1850_v28  ;;  %v2317_v62 = vsel %vm1416_vm13, %v6365_v47, %v6420_v32  ;;  %v2631_v25 = vadd.f32 %v2615_v7, %v2453_v38  ;;  %v2690_v11 = vadd.f32 %v2674_v57, %v2630_v48 }
 0x60e   :  { %v6666_v17 = vpop.permute.xlu1 %2483  ;;  %v6668_v14 = vpop.permute.xlu0 %2897  ;;  %v2155_v4 = vadd.f32 %v2139_v3, %v1849_v50  ;;  %v2735_v15 = vsel %vm2733_vm15, %v8417_v41, %v8419_v0  ;;  %v2794_v28 = vsel %vm8099_vm6, %v6248_v61, %v6250_v54  ;;  %v2795_v48 = vsel %vm8099_vm6, %v6250_v54, %v6274_v20 }
 0x60f   :  { %2362 = vrot.lane.b32.xlu1 %v2345_v51, %s4565_s12  ;;  %1693 = vrot.lane.b32.xlu0 %v1675_v44, %s4559_s29  ;;  %v2496_v33 = vsel %vm1590_vm14, %v2482_v43, %v6666_v17  ;;  %v2334_v32 = vadd.f32 %v2318_v16, %v2156_v26  ;;  %v2495_v51 = vsel %vm1590_vm14, %v6631_v27, %v2482_v43 }
 0x610   :  { %v1978_v44 = vadd.f32 %v1962_v12, %v6583_v30  ;;  %v2691_v38 = vadd.f32 %v2675_v18, %v2631_v25  ;;  %v2750_v22 = vadd.f32 %v2734_v60, %v2690_v11  ;;  %v2333_v7 = vadd.f32 %v2317_v62, %v2155_v4  ;;  %v8420_v60 = vld [vmem:[#allocation151_spill] sm:$0xff] }
 0x611   :  { %v2854_v50 = vsel %vm8098_vm5, %v6497_v52, %v6460_v45  ;;  %v2512_v16 = vadd.f32 %v2496_v33, %v2334_v32  ;;  %v1963_v18 = vsel %vm1959_vm2, %v8410_v9, %v8420_v60  ;;  %v2855_v54 = vsel %vm8098_vm5, %v6460_v45, %v6524_v13 }
 0x612   :  { %v6689_v57 = vpop.permute.xlu1 %2785  ;;  %v6691_v3 = vpop.permute.xlu0 %2901  ;;  %v2751_v30 = vadd.f32 %v2735_v15, %v2691_v38  ;;  %v2810_v43 = vadd.f32 %v2794_v28, %v2750_v22  ;;  %v2511_v12 = vadd.f32 %v2495_v51, %v2333_v7  ;;  %v2522_v41 = vmul.f32 %v6416_v56, %v8412_v21  ;;  %v8421_v15 = vld [vmem:[#allocation156_spill] sm:$0xff] }
 0x613   :  { %1691 = vrot.lane.b32.xlu1 %v1674_v8, %s4559_s29  ;;  %2540 = vrot.lane.b32.xlu0 %v2523_v19, %s4567_s28  ;;  %v1871_v8 = vmul.f32 %v6610_v63, %v5926_v42  ;;  %v2095_v19 = vadd.f32 %v8401_v10, %v6615_v34  ;;  %v2022_v26 = vsel %vm2019_vm1, %v8398_v1, %v8421_v15  ;;  %v8422_v10 = vld [vmem:[#allocation157_spill] sm:$0xff] }
 0x614   :  { %v2811_v62 = vadd.f32 %v2795_v48, %v2751_v30  ;;  %v2870_v25 = vadd.f32 %v2854_v50, %v2810_v43  ;;  %v6719_v45 = vadd.f32 %v6276_v37, %v2512_v16  ;;  %v2023_v1 = vsel %vm2019_vm1, %v8421_v15, %v8422_v10  ;;  %v8423_v48 = vld [vmem:[#allocation161_spill] sm:$0xff] }
 0x615   :  { %v6731_v33 = vadd.f32 %v6276_v37, %v2511_v12  ;;  %v1979_v32 = vadd.f32 %v1963_v18, %v6587_v35  ;;  %v2273_v51 = vadd.f32 %v8405_v6, %v2095_v19  ;;  %v2524_v38 = vmul.f32 %v6454_v24, %v8412_v21  ;;  %v6749_v6 = vld [vmem:[%s7878_s0 + $0x28] sm:$0xff]  ;;  %v8424_v12 = vld [vmem:[#allocation162_spill] sm:$0xff] }
 0x616   :  { %v2900_v9 = vpop.permute.xlu1 %2899  ;;  %v6716_v11 = vpop.permute.xlu0 %2251  ;;  %v2871_v34 = vadd.f32 %v2855_v54, %v2811_v62  ;;  %v2169_v22 = vmul.f32 %v6610_v63, %v8382_v31  ;;  %v2038_v7 = vadd.f32 %v2022_v26, %v1978_v44  ;;  %v2082_v50 = vsel %vm2079_vm0, %v8402_v58, %v8423_v48  ;;  %v8425_v54 = vld [vmem:[#allocation167_spill] sm:$0xff] }
 0x617   :  { %v2914_v56 = vsel %vm8097_vm4, %v6668_v14, %v2900_v9  ;;  %v2915_v4 = vsel %vm8097_vm4, %v2900_v9, %v6691_v3  ;;  %2538 = vrot.lane.b32.xlu1 %v2522_v41, %s4567_s28  ;;  %1890 = vrot.lane.b32.xlu0 %v1871_v8, %s4560_s30  ;;  %v1676_v24 = vmul.f32 %v6749_v6, %v5899_v29  ;;  %v4060_v18 = vmul.f32 -1.442695, %v6719_v45 }
 0x618   :  { %v2930_v28 = vadd.f32 %v2914_v56, %v2870_v25  ;;  %v2931_v16 = vadd.f32 %v2915_v4, %v2871_v34  ;;  %v2039_v35 = vadd.f32 %v2023_v1, %v1979_v32  ;;  %v2083_v44 = vsel %vm2079_vm0, %v8423_v48, %v8424_v12  ;;  %v8426_v56 = vld [vmem:[#allocation168_spill] sm:$0xff]  ;;  %v8427_v34 = vld [vmem:[#allocation170_spill] sm:$0xff] }
 0x619   :  { %v2451_v58 = vadd.f32 %v8408_v23, %v2273_v51  ;;  %v2260_v41 = vsel %vm2257_vm11, %v8406_v5, %v8425_v54  ;;  %v1848_v8 = vadd.f32 %v6075_v49, %v6518_v39  ;;  %v4059_v19 = vmul.f32 -1.442695, %v6731_v33  ;;  %v8428_v32 = vld [vmem:[#allocation172_spill] sm:$0xff] }
 0x61a   :  { %v6742_v30 = vpop.permute.xlu1 %2017  ;;  %v6744_v43 = vpop.permute.xlu0 %2307  ;;  %v6767_v15 = vadd.f32 %v6306_v53, %v2930_v28  ;;  %v2098_v26 = vadd.f32 %v2082_v50, %v2038_v7  ;;  %v1872_v62 = vmul.f32 %v6603_v55, %v5926_v42  ;;  %v2347_v25 = vmul.f32 %v6610_v63, %v5986_v36  ;;  %v8430_v50 = vld [vmem:[#allocation178_spill] sm:$0xff] }
 0x61b   :  { %2542 = vrot.lane.b32.xlu1 %v2524_v38, %s4567_s28  ;;  %2188 = vrot.lane.b32.xlu0 %v2169_v22, %s4563_s9  ;;  %v2629_v23 = vadd.f32 %v6026_v59, %v2451_v58  ;;  %v2099_v9 = vadd.f32 %v2083_v44, %v2039_v35  ;;  %v2261_v5 = vsel %vm2257_vm11, %v8425_v54, %v8426_v56  ;;  %4341 = vpow2.f32 %v4060_v18  ;;  %v8432_v18 = vld [vmem:[#allocation179_spill] sm:$0xff] }
 0x61c   :  { %v2154_v49 = vadd.f32 %v6154_v46, %v1848_v8  ;;  %v6779_v39 = vadd.f32 %v6306_v53, %v2931_v16  ;;  %v2276_v59 = vadd.f32 %v2260_v41, %v2098_v26  ;;  %v2438_v28 = vsel %vm2435_vm10, %v8409_v2, %v8427_v34  ;;  %v8429_v46 = vld [vmem:[#allocation171_spill] sm:$0xff]  ;;  %v8431_v16 = vld [vmem:[#allocation169_spill] sm:$0xff] }
 0x61d   :  { %v2689_v51 = vadd.f32 %v8428_v32, %v2629_v23  ;;  %v2439_v38 = vsel %vm2435_vm10, %v8427_v34, %v8429_v46  ;;  %4343 = vpow2.f32 %v4059_v19  ;;  %v4067_v7 = vmul.f32 -1.442695, %v6767_v15  ;;  %v8434_v26 = vld [vmem:[#allocation69_spill] sm:$0xff]  ;;  %v8435_v23 = vld [vmem:[#allocation36_spill] sm:$0xff]  ;;  %v8437_v34 = vld [vmem:[#allocation174_spill] sm:$0xff] }
 0x61e   :  { %v6781_v4 = vpop.permute.xlu1 %2253  ;;  %v6783_v1 = vpop.permute.xlu0 %2843  ;;  %v2332_v22 = vadd.f32 %v6365_v47, %v2154_v49  ;;  %v2277_v48 = vadd.f32 %v2261_v5, %v2099_v9  ;;  %v2616_v2 = vsel %vm2613_vm8, %v8431_v16, %v8430_v50  ;;  %v2170_v44 = vmul.f32 %v6603_v55, %v8382_v31  ;;  %v8438_v32 = vld [vmem:[#allocation187_spill] sm:$0xff] }
 0x61f   :  { %1892 = vrot.lane.b32.xlu1 %v1872_v62, %s4560_s30  ;;  %2366 = vrot.lane.b32.xlu0 %v2347_v25, %s4565_s12  ;;  %v2749_v35 = vadd.f32 %v8418_v40, %v2689_v51  ;;  %v2454_v58 = vadd.f32 %v2438_v28, %v2276_v59  ;;  %v2617_v54 = vsel %vm2613_vm8, %v8430_v50, %v8432_v18  ;;  %v4068_v41 = vmul.f32 -1.442695, %v6779_v39  ;;  %v8436_v59 = vld [vmem:[#allocation186_spill] sm:$0xff] }
 0x620   :  { %v2510_v47 = vadd.f32 %v6631_v27, %v2332_v22  ;;  %v1663_v62 = vadd.f32 %v8435_v23, %v8434_v26  ;;  %v2455_v40 = vadd.f32 %v2439_v38, %v2277_v48  ;;  %4345 = vpow2.f32 %v4067_v7  ;;  %v8440_v38 = vld [vmem:[#allocation177_spill] sm:$0xff]  ;;  %v8441_v7 = vld [vmem:[#allocation67_spill] sm:$0xff] }
 0x621   :  { %v2809_v25 = vadd.f32 %v6248_v61, %v2749_v35  ;;  %v2632_v9 = vadd.f32 %v2616_v2, %v2454_v58  ;;  %v2348_v27 = vmul.f32 %v6603_v55, %v5986_v36  ;;  %v2525_v5 = vmul.f32 %v6610_v63, %v8412_v21  ;;  %v8443_v2 = vld [vmem:[#allocation33_spill] sm:$0xff]  ;;  %v8444_v26 = vld [vmem:[#allocation23_spill] sm:$0xff] }
 0x622   :  { %v6807_v8 = vpop.permute.xlu1 %2309  ;;  %v6809_v19 = vpop.permute.xlu0 %2077  ;;  %v2633_v49 = vadd.f32 %v2617_v54, %v2455_v40  ;;  %v2676_v28 = vsel %vm2673_vm7, %v8437_v34, %v8436_v59  ;;  %v2677_v61 = vsel %vm2673_vm7, %v8436_v59, %v8438_v32  ;;  %v6834_v63 = vadd.f32 %v6276_v37, %v2510_v47  ;;  %v8447_v59 = vld [vmem:[#allocation37_spill] sm:$0xff] }
 0x623   :  { %8433 = vst [vmem:[#allocation39_spill] sm:$0xff] %v6807_v8  ;;  %2190 = vrot.lane.b32.xlu1 %v2170_v44, %s4563_s9  ;;  %1695 = vrot.lane.b32.xlu0 %v1676_v24, %s4559_s29  ;;  %v2869_v51 = vadd.f32 %v6497_v52, %v2809_v25  ;;  %v8439_v24 = vld [vmem:[#allocation66_spill] sm:$0xff]  ;;  %4347 = vpow2.f32 %v4068_v41  ;;  %v2736_v52 = vsel %vm2733_vm15, %v8419_v0, %v8443_v2  ;;  %v8445_v25 = vld [vmem:[#allocation72_spill] sm:$0xff] }
 0x624   :  { %v1835_v22 = vsel %vm940_vm9, %v8440_v38, %v8439_v24  ;;  %v1836_v48 = vsel %vm940_vm9, %v8439_v24, %v8441_v7  ;;  %v6849_v44 = vld [vmem:[%s7878_s0 + $0x30] sm:$0xff]  ;;  %v2692_v54 = vadd.f32 %v2676_v28, %v2632_v9  ;;  %v2693_v47 = vadd.f32 %v2677_v61, %v2633_v49  ;;  %v8448_v49 = vld [vmem:[#allocation21_spill] sm:$0xff] }
 0x625   :  { %v2929_v35 = vadd.f32 %v6668_v14, %v2869_v51  ;;  %v1677_v58 = vmul.f32 %v6849_v44, %v5899_v29  ;;  %v1873_v41 = vmul.f32 %v6749_v6, %v5926_v42  ;;  %v2171_v14 = vmul.f32 %v6749_v6, %v8382_v31  ;;  %v4342_v0 = vpop.eup %4341  ;;  %v8449_v51 = vld [vmem:[#allocation24_spill] sm:$0xff] }
 0x626   :  { %v6836_v50 = vpop.permute.xlu1 %2845  ;;  %v6838_v16 = vpop.permute.xlu0 %2431  ;;  %v1851_v23 = vadd.f32 %v1835_v22, %v8444_v26  ;;  %v1852_v40 = vadd.f32 %v1836_v48, %v1663_v62  ;;  %v2142_v29 = vsel %vm1356_vm12, %v8445_v25, %v8447_v59  ;;  %v2737_v34 = vsel %vm2733_vm15, %v8443_v2, %v8448_v49  ;;  %v8451_v48 = vld [vmem:[#allocation68_spill] sm:$0xff] }
 0x627   :  { %8442 = vst [vmem:[#allocation73_spill] sm:$0xff] %v6836_v50  ;;  %2368 = vrot.lane.b32.xlu1 %v2348_v27, %s4565_s12  ;;  %2544 = vrot.lane.b32.xlu0 %v2525_v5, %s4567_s28  ;;  %v8446_v27 = vld [vmem:[#allocation185_spill] sm:$0xff]  ;;  %v4344_v9 = vpop.eup %4343  ;;  %v2752_v28 = vadd.f32 %v2736_v52, %v2692_v54  ;;  %v4058_v61 = vmul.f32 -1.442695, %v6834_v63  ;;  %v2796_v62 = vsel %vm8099_vm6, %v6274_v20, %v8449_v51  ;;  %v2976_v54 = vadd.f32 1.0, %v4342_v0 }
 0x628   :  { %v2141_v5 = vsel %vm1356_vm12, %v8446_v27, %v8445_v25  ;;  %v6876_v22 = vadd.f32 %v6306_v53, %v2929_v35  ;;  %v2319_v26 = vsel %vm1416_vm13, %v8451_v48, %v6744_v43  ;;  %v2320_v2 = vsel %vm1416_vm13, %v6744_v43, %v6807_v8 }
 0x629   :  { %v2157_v20 = vadd.f32 %v2141_v5, %v1851_v23  ;;  %v2158_v52 = vadd.f32 %v2142_v29, %v1852_v40  ;;  %v2526_v25 = vmul.f32 %v6603_v55, %v8412_v21  ;;  %v2753_v35 = vadd.f32 %v2737_v34, %v2693_v47 }
 0x62a   :  { %v6871_v24 = vpop.permute.xlu1 %2429  ;;  %v6873_v38 = vpop.permute.xlu0 %2487  ;;  %v2975_v27 = vadd.f32 1.0, %v4344_v9  ;;  %v2812_v59 = vadd.f32 %v2796_v62, %v2752_v28  ;;  %v2797_v48 = vsel %vm8099_vm6, %v8449_v51, %v6689_v57  ;;  %4349 = vpow2.f32 %v4058_v61 }
 0x62b   :  { %8450 = vst [vmem:[#allocation41_spill] sm:$0xff] %v6873_v38  ;;  %1697 = vrot.lane.b32.xlu1 %v1677_v58, %s4559_s29  ;;  %1894 = vrot.lane.b32.xlu0 %v1873_v41, %s4560_s30  ;;  %v4346_v49 = vpop.eup %4345  ;;  %v2335_v43 = vadd.f32 %v2319_v26, %v2157_v20  ;;  %v2856_v58 = vsel %vm8098_vm5, %v6524_v13, %v6783_v1  ;;  %v4066_v55 = vmul.f32 -1.442695, %v6876_v22  ;;  %4351 = vrcp.f32 %v2976_v54  ;;  %s4592_s29 = smov 21  }
 0x62c   :  { %v2336_v41 = vadd.f32 %v2320_v2, %v2158_v52  ;;  %v2857_v47 = vsel %vm8098_vm5, %v6783_v1, %v6836_v50  ;;  %v2813_v29 = vadd.f32 %v2797_v48, %v2753_v35  ;;  %4353 = vrcp.f32 %v2975_v27  ;;  %v8453_v48 = vld [vmem:[#allocation10_spill] sm:$0xff]  ;;  %v8486_v50 = vld [vmem:[#allocation93_spill] sm:$0xff] }
 0x62d   :  { %v4348_v13 = vpop.eup %4347  ;;  %v3090_v28 = vadd.f32 1.0, %v4346_v49  ;;  %v1874_v1 = vmul.f32 %v6849_v44, %v5926_v42  ;;  %v2872_v61 = vadd.f32 %v2856_v58, %v2812_v59  ;;  %4355 = vpow2.f32 %v4066_v55 }
 0x62e   :  { %v2486_v23 = vpop.permute.xlu1 %2485  ;;  %v6894_v0 = vpop.permute.xlu0 %2905  ;;  %v2873_v51 = vadd.f32 %v2857_v47, %v2813_v29  ;;  %v3091_v20 = vadd.f32 1.0, %v4348_v13  ;;  %v2172_v27 = vmul.f32 %v6849_v44, %v8382_v31  ;;  %v8457_v29 = vld [vmem:[#allocation12_spill] sm:$0xff]  ;;  %vm8472_vm6 = vcmask 1014784  }
 0x62f   :  { %8452 = vst [vmem:[#allocation74_spill] sm:$0xff] %v6894_v0  ;;  %v2497_v40 = vsel %vm1590_vm14, %v6666_v17, %v2486_v23  ;;  %v2498_v5 = vsel %vm1590_vm14, %v2486_v23, %v6873_v38  ;;  %2546 = vrot.lane.b32.xlu1 %v2526_v25, %s4567_s28  ;;  %2192 = vrot.lane.b32.xlu0 %v2171_v14, %s4563_s9  ;;  %4357 = vrcp.f32 %v3090_v28 }
 0x630   :  { %v2513_v9 = vadd.f32 %v2497_v40, %v2335_v43  ;;  %v2514_v34 = vadd.f32 %v2498_v5, %v2336_v41  ;;  %v2349_v17 = vmul.f32 %v6749_v6, %v5986_v36  ;;  %v8454_v43 = vld [vmem:[#allocation4_spill] sm:$0xff]  ;;  %v8455_v40 = vld [vmem:[#allocation50_spill] sm:$0xff]  ;;  %v8456_v5 = vld [vmem:[#allocation81_spill] sm:$0xff] }
 0x631   :  { %v473_v58 = vmul.f32 %v8454_v43, %v8453_v48  ;;  %v526_v13 = vsel %vm520_vm3, %v8456_v5, %v8455_v40  ;;  %v8466_v48 = vld [vmem:[#allocation87_spill] sm:$0xff] }
 0x632   :  { %v6911_v62 = vadd.f32 %v6276_v37, %v2513_v9  ;;  %v6914_v14 = vadd.f32 %v6276_v37, %v2514_v34  ;;  %v2904_v26 = vpop.permute.xlu1 %2903  ;;  %v6916_v2 = vpop.permute.xlu0 %2607  ;;  %v8458_v9 = vld [vmem:[#allocation82_spill] sm:$0xff]  ;;  %v8482_v37 = vld [vmem:[#allocation8_spill] sm:$0xff] }
 0x633   :  { %v2916_v49 = vsel %vm8097_vm4, %v6691_v3, %v2904_v26  ;;  %v2917_v52 = vsel %vm8097_vm4, %v2904_v26, %v6894_v0  ;;  %1896 = vrot.lane.b32.xlu1 %v1874_v1, %s4560_s30  ;;  %2370 = vrot.lane.b32.xlu0 %v2349_v17, %s4565_s12  ;;  %v2527_v3 = vmul.f32 %v6749_v6, %v8412_v21  ;;  %v8459_v1 = vld [vmem:[#allocation11_spill] sm:$0xff]  ;;  %vm8462_vm4 = vcmask 1031168  }
 0x634   :  { %v4061_v59 = vmul.f32 -1.442695, %v6911_v62  ;;  %v4062_v54 = vmul.f32 -1.442695, %v6914_v14  ;;  %v2932_v25 = vadd.f32 %v2916_v49, %v2872_v61  ;;  %v2933_v35 = vadd.f32 %v2917_v52, %v2873_v51  ;;  %v4350_v28 = vpop.eup %4349  ;;  %v8460_v26 = vld [vmem:[#allocation51_spill] sm:$0xff]  ;;  %vm8464_vm5 = vmmov %vm8462_vm4 }
 0x635   :  { %v474_v6 = vmul.f32 %v8454_v43, %v8457_v29  ;;  %v527_v34 = vsel %vm520_vm3, %v8455_v40, %v8458_v9  ;;  %v475_v17 = vmul.f32 %v8454_v43, %v8459_v1  ;;  %v8461_v49 = vld [vmem:[#allocation83_spill] sm:$0xff]  ;;  %v8465_v1 = vld [vmem:[#allocation52_spill] sm:$0xff] }
 0x636   :  { %4359 = vpow2.f32 %v4061_v59  ;;  %v6933_v41 = vadd.f32 %v6306_v53, %v2932_v25  ;;  %v6936_v23 = vadd.f32 %v6306_v53, %v2933_v35  ;;  %v6938_v55 = vpop.permute.xlu1 %2255  ;;  %v6940_v47 = vpop.permute.xlu0 %1643  ;;  %v586_v52 = vsel %vm8462_vm4, %v8461_v49, %v8460_v26  ;;  %v8463_v59 = vld [vmem:[#allocation85_spill] sm:$0xff] }
 0x637   :  { %4361 = vpow2.f32 %v4062_v54  ;;  %2194 = vrot.lane.b32.xlu1 %v2172_v27, %s4563_s9  ;;  %2548 = vrot.lane.b32.xlu0 %v2527_v3, %s4567_s28  ;;  %v587_v54 = vsel %vm8464_vm5, %v8460_v26, %v8463_v59  ;;  %v2350_v25 = vmul.f32 %v6849_v44, %v5986_v36  ;;  %v1875_v35 = vmul.f32 0.0, %v5926_v42  ;;  %v4352_v27 = vpop.eup %4351 }
 0x638   :  { %4363 = vrcp.f32 %v3091_v20  ;;  %v4069_v61 = vmul.f32 -1.442695, %v6933_v41  ;;  %v4070_v51 = vmul.f32 -1.442695, %v6936_v23  ;;  %v541_v3 = vadd.f32 %v526_v13, %v473_v58  ;;  %v4354_v5 = vpop.eup %4353  ;;  %v8468_v13 = vld [vmem:[#allocation89_spill] sm:$0xff] }
 0x639   :  { %v542_v20 = vadd.f32 %v527_v34, %v474_v6  ;;  %v543_v49 = vadd.f32 %v8458_v9, %v475_v17  ;;  %vm8467_vm4 = vcmask 1022976   ;;  %v8470_v34 = vld [vmem:[#allocation54_spill] sm:$0xff]  ;;  %v4356_v9 = vpop.eup %4355  ;;  %v2974_v17 = vadd.f32 1.0, %v4350_v28 }
 0x63a   :  { %4365 = vpow2.f32 %v4069_v61  ;;  %v6965_v43 = vpop.permute.xlu1 %2609  ;;  %v6967_v40 = vpop.permute.xlu0 %2667  ;;  %v646_v26 = vsel %vm8467_vm4, %v8466_v48, %v8465_v1  ;;  %v601_v42 = vadd.f32 %v586_v52, %v541_v3  ;;  %vm8469_vm5 = vmmov %vm8467_vm4  ;;  %v8471_v61 = vld [vmem:[#allocation90_spill] sm:$0xff]  ;;  %v3000_v53 = vmul.f32 %v4352_v27, %v6719_v45 }
 0x63b   :  { %4367 = vpow2.f32 %v4070_v51  ;;  %2372 = vrot.lane.b32.xlu1 %v2350_v25, %s4565_s12  ;;  %1898 = vrot.lane.b32.xlu0 %v1875_v35, %s4560_s30  ;;  %v602_v58 = vadd.f32 %v587_v54, %v542_v20  ;;  %v647_v6 = vsel %vm8469_vm5, %v8465_v1, %v8468_v13  ;;  %v706_v29 = vsel %vm8472_vm6, %v8471_v61, %v8470_v34  ;;  %v4358_v1 = vpop.eup %4357  ;;  %v8474_v20 = vld [vmem:[#allocation56_spill] sm:$0xff]  ;;  %s4593_s30 = smov 42  }
 0x63c   :  { %v2528_v48 = vmul.f32 %v6849_v44, %v8412_v21  ;;  %v2351_v51 = vmul.f32 0.0, %v5986_v36  ;;  %v603_v52 = vadd.f32 %v8463_v59, %v543_v49  ;;  %v661_v54 = vadd.f32 %v646_v26, %v601_v42  ;;  %v8475_v61 = vld [vmem:[#allocation92_spill] sm:$0xff]  ;;  %v8477_v59 = vld [vmem:[#allocation91_spill] sm:$0xff]  ;;  %v8479_v49 = vld [vmem:[#allocation58_spill] sm:$0xff] }
 0x63d   :  { %v662_v3 = vadd.f32 %v647_v6, %v602_v58  ;;  %vm8476_vm6 = vcmask 883712   ;;  %v2999_v45 = vmul.f32 %v4354_v5, %v6731_v33  ;;  %vm8478_vm4 = vcmask 1014784   ;;  %v8480_v26 = vld [vmem:[#allocation94_spill] sm:$0xff] }
 0x63e   :  { %v6986_v25 = vpop.permute.xlu1 %2433  ;;  %v6988_v35 = vpop.permute.xlu0 %1827  ;;  %v766_v28 = vsel %vm8476_vm6, %v8475_v61, %v8474_v20  ;;  %v721_v44 = vadd.f32 %v706_v29, %v661_v54  ;;  %v707_v27 = vsel %vm8478_vm4, %v8470_v34, %v8477_v59  ;;  %vm8481_vm5 = vcmask 875520  }
 0x63f   :  { %8473 = vst [vmem:[#allocation31_spill] sm:$0xff] %v6986_v25  ;;  %2550 = vrot.lane.b32.xlu1 %v2528_v48, %s4567_s28  ;;  %2374 = vrot.lane.b32.xlu0 %v2351_v51, %s4565_s12  ;;  %v826_v42 = vsel %vm8481_vm5, %v8480_v26, %v8479_v49  ;;  %v2173_v58 = vmul.f32 0.0, %v8382_v31  ;;  %4369 = vrcp.f32 %v2974_v17  ;;  %v3089_v61 = vadd.f32 1.0, %v4356_v9  ;;  %v8483_v51 = vld [vmem:[#allocation6_spill] sm:$0xff]  ;;  %v8487_v9 = vld [vmem:[#allocation59_spill] sm:$0xff]  ;;  %v8488_v17 = vld [vmem:[#allocation96_spill] sm:$0xff] }
 0x640   :  { %v4360_v36 = vpop.eup %4359  ;;  %v4250_v5 = vpack.i.bf16 %v3000_v53, %v2999_v45  ;;  %v865_v0 = vmul.f32 %v8483_v51, %v8482_v37  ;;  %v663_v29 = vadd.f32 %v8468_v13, %v603_v52  ;;  %v781_v54 = vadd.f32 %v766_v28, %v721_v44  ;;  %v8489_v28 = vld [vmem:[#allocation95_spill] sm:$0xff]  ;;  %vm8490_vm4 = vmmov %vm8481_vm5  ;;  %v8491_v45 = vld [vmem:[#allocation60_spill] sm:$0xff] }
 0x641   :  { %v4362_v6 = vpop.eup %4361  ;;  %v2977_v33 = vadd.f32 1.0, %v4360_v36  ;;  %v722_v26 = vadd.f32 %v707_v27, %v662_v3  ;;  %v767_v31 = vsel %vm8476_vm6, %v8474_v20, %v8486_v50  ;;  %v946_v53 = vsel %vm940_vm9, %v8488_v17, %v8487_v9  ;;  %v8492_v36 = vld [vmem:[#allocation98_spill] sm:$0xff]  ;;  %v8495_v37 = vld [vmem:[#allocation97_spill] sm:$0xff] }
 0x642   :  { %v4364_v48 = vpop.eup %4363  ;;  %v2978_v38 = vadd.f32 1.0, %v4362_v6  ;;  %v7006_v34 = vpop.permute.xlu1 %2669  ;;  %v841_v52 = vadd.f32 %v826_v42, %v781_v54  ;;  %v827_v3 = vsel %vm8490_vm4, %v8479_v49, %v8489_v28  ;;  %vm8493_vm5 = vcmask 859136  }
 0x643   :  { %8484 = vst [vmem:[#allocation42_spill] sm:$0xff] %v7006_v34  ;;  %v7008_v25 = vpop.permute.xlu0 %2611  ;;  %4371 = vrcp.f32 %v2977_v33  ;;  %2196 = vrot.lane.b32.xlu1 %v2173_v58, %s4563_s9  ;;  %4251 = vrot.lane.b32.xlu0 %v4250_v5, %s4592_s29  ;;  %v1124_v20 = vsel %vm8493_vm5, %v8492_v36, %v8491_v45  ;;  %v2529_v44 = vmul.f32 0.0, %v8412_v21  ;;  %v3114_v6 = vmul.f32 %v4358_v1, %v6767_v15  ;;  %v8496_v36 = vld [vmem:[#allocation61_spill] sm:$0xff]  ;;  %vm8503_vm4 = vmmov %vm8493_vm5 }
 0x644   :  { %8485 = vst [vmem:[#allocation75_spill] sm:$0xff] %v7008_v25  ;;  %v4366_v13 = vpop.eup %4365  ;;  %4373 = vrcp.f32 %v3089_v61  ;;  %v3115_v58 = vmul.f32 %v4364_v48, %v6779_v39  ;;  %v723_v5 = vadd.f32 %v8477_v59, %v663_v29  ;;  %v782_v42 = vadd.f32 %v767_v31, %v722_v26  ;;  %v8497_v61 = vld [vmem:[#allocation100_spill] sm:$0xff]  ;;  %v8499_v39 = vld [vmem:[#allocation7_spill] sm:$0xff]  ;;  %v8501_v48 = vld [vmem:[#allocation46_spill] sm:$0xff] }
 0x645   :  { %v4368_v27 = vpop.eup %4367  ;;  %v3092_v33 = vadd.f32 1.0, %v4366_v13  ;;  %v961_v54 = vadd.f32 %v946_v53, %v841_v52  ;;  %4375 = vrcp.f32 %v2978_v38  ;;  %v947_v21 = vsel %vm940_vm9, %v8487_v9, %v8495_v37  ;;  %v8500_v38 = vld [vmem:[#allocation79_spill] sm:$0xff]  ;;  %v8504_v52 = vld [vmem:[#allocation64_spill] sm:$0xff] }
 0x646   :  { %v7028_v17 = vpop.permute.xlu1 %1829  ;;  %vm8498_vm6 = vcmask 850944   ;;  %v3093_v1 = vadd.f32 1.0, %v4368_v27  ;;  %v863_v59 = vmul.f32 %v8483_v51, %v8499_v39  ;;  %v1005_v29 = vsel %vm520_vm3, %v8501_v48, %v8500_v38  ;;  %v8502_v9 = vld [vmem:[#allocation99_spill] sm:$0xff]  ;;  %v8507_v39 = vld [vmem:[#allocation9_spill] sm:$0xff] }
 0x647   :  { %v7030_v49 = vpop.permute.xlu0 %2729  ;;  %v1302_v15 = vsel %vm8498_vm6, %v8497_v61, %v8496_v36  ;;  %4377 = vrcp.f32 %v3092_v33  ;;  %2552 = vrot.lane.b32.xlu1 %v2529_v44, %s4567_s28  ;;  %v842_v26 = vadd.f32 %v827_v3, %v782_v42  ;;  %v1139_v31 = vadd.f32 %v1124_v20, %v961_v54  ;;  %v8505_v27 = vld [vmem:[#allocation103_spill] sm:$0xff]  ;;  %vm8509_vm5 = vmmov %vm8498_vm6  ;;  %v8510_v54 = vld [vmem:[#allocation88_spill] sm:$0xff] }
 0x648   :  { %8494 = vst [vmem:[#allocation43_spill] sm:$0xff] %v7030_v49  ;;  %v783_v53 = vadd.f32 %v8486_v50, %v723_v5  ;;  %v1125_v13 = vsel %vm8503_vm4, %v8491_v45, %v8502_v9  ;;  %v1362_v33 = vsel %vm1356_vm12, %v8505_v27, %v8504_v52  ;;  %v4255_v44 = vpack.i.bf16 %v3115_v58, %v3114_v6  ;;  %v8506_v61 = vld [vmem:[#allocation47_spill] sm:$0xff]  ;;  %v8508_v45 = vld [vmem:[#allocation101_spill] sm:$0xff]  ;;  %v8511_v6 = vld [vmem:[#allocation108_spill] sm:$0xff] }
 0x649   :  { %v1022_v25 = vadd.f32 %v8506_v61, %v865_v0  ;;  %v864_v49 = vmul.f32 %v8483_v51, %v8507_v39  ;;  %v962_v8 = vadd.f32 %v947_v21, %v842_v26  ;;  %v1317_v48 = vadd.f32 %v1302_v15, %v1139_v31  ;;  %v4370_v50 = vpop.eup %4369  ;;  %v8512_v26 = vld [vmem:[#allocation80_spill] sm:$0xff] }
 0x64a   :  { %v7054_v3 = vpop.permute.xlu1 %2727  ;;  %v843_v5 = vadd.f32 %v8489_v28, %v783_v53  ;;  %v1303_v42 = vsel %vm8509_vm5, %v8496_v36, %v8508_v45  ;;  %v1422_v0 = vsel %vm1416_vm13, %v8511_v6, %v8510_v54  ;;  %4379 = vrcp.f32 %v3093_v1  ;;  %v8513_v31 = vld [vmem:[#allocation48_spill] sm:$0xff]  ;;  %v8516_v6 = vld [vmem:[#allocation129_spill] sm:$0xff] }
 0x64b   :  { %v7056_v20 = vpop.permute.xlu0 %2135  ;;  %4256 = vrot.lane.b32.xlu1 %v4255_v44, %s4593_s30  ;;  %v1006_v51 = vsel %vm520_vm3, %v8500_v38, %v8506_v61  ;;  %v1020_v58 = vadd.f32 %v1005_v29, %v863_v59  ;;  %v1140_v21 = vadd.f32 %v1125_v13, %v962_v8  ;;  %v1377_v15 = vadd.f32 %v1362_v33, %v1317_v48  ;;  %v8515_v27 = vld [vmem:[#allocation104_spill] sm:$0xff]  ;;  %v8517_v44 = vld [vmem:[#allocation131_spill] sm:$0xff]  ;;  %v8518_v48 = vld [vmem:[#allocation109_spill] sm:$0xff] }
 0x64c   :  { %vm8514_vm6 = vcmask 1031168   ;;  %v963_v53 = vadd.f32 %v8495_v37, %v843_v5  ;;  %v1363_v1 = vsel %vm1356_vm12, %v8504_v52, %v8515_v27  ;;  %v1595_v39 = vsel %vm1590_vm14, %v8517_v44, %v8516_v6  ;;  %v8519_v5 = vld [vmem:[#allocation175_spill] sm:$0xff] }
 0x64d   :  { %v4372_v28 = vpop.eup %4371  ;;  %v1183_v36 = vsel %vm8514_vm6, %v8513_v31, %v8512_v26  ;;  %v1318_v34 = vadd.f32 %v1303_v42, %v1140_v21  ;;  %v1437_v38 = vadd.f32 %v1422_v0, %v1377_v15  ;;  %v2998_v8 = vmul.f32 %v4370_v50, %v6834_v63  ;;  %v8520_v31 = vld [vmem:[#allocation146_spill] sm:$0xff]  ;;  %vm8523_vm5 = vmmov %vm8514_vm6 }
 0x64e   :  { %v3001_v59 = vmul.f32 %v4372_v28, %v6911_v62  ;;  %v7081_v29 = vpop.permute.xlu1 %2133  ;;  %v4374_v33 = vpop.eup %4373  ;;  %v1021_v37 = vadd.f32 %v1006_v51, %v864_v49  ;;  %v1141_v61 = vadd.f32 %v8502_v9, %v963_v53  ;;  %v1423_v52 = vsel %vm1416_vm13, %v8510_v54, %v8518_v48  ;;  %v8522_v28 = vld [vmem:[#allocation49_spill] sm:$0xff]  ;;  %v8524_v51 = vld [vmem:[#allocation132_spill] sm:$0xff]  ;;  %v8525_v53 = vld [vmem:[#allocation183_spill] sm:$0xff] }
 0x64f   :  { %v7083_v13 = vpop.permute.xlu0 %2787  ;;  %vm8521_vm4 = vcmask 695296   ;;  %v4376_v0 = vpop.eup %4375  ;;  %v1198_v63 = vadd.f32 %v1183_v36, %v1020_v58  ;;  %v1378_v50 = vadd.f32 %v1363_v1, %v1318_v34  ;;  %v1610_v62 = vadd.f32 %v1595_v39, %v1437_v38  ;;  %v8528_v38 = vld [vmem:[#allocation30_spill] sm:$0xff] }
 0x650   :  { %v1770_v42 = vsel %vm8521_vm4, %v8520_v31, %v8519_v5  ;;  %v4260_v21 = vpack.i.bf16 %v3001_v59, %v2998_v8  ;;  %v1184_v49 = vsel %vm8523_vm5, %v8512_v26, %v8522_v28  ;;  %v1319_v9 = vadd.f32 %v8508_v45, %v1141_v61  ;;  %vm8527_vm6 = vmmov %vm8521_vm4 }
 0x651   :  { %v4378_v15 = vpop.eup %4377  ;;  %v1596_v54 = vsel %vm1590_vm14, %v8516_v6, %v8524_v51  ;;  %v1964_v44 = vsel %vm1959_vm2, %v8420_v60, %v8525_v53  ;;  %v1438_v31 = vadd.f32 %v1423_v52, %v1378_v50  ;;  %v1786_v58 = vadd.f32 %v1770_v42, %v1610_v62  ;;  %v8526_v6 = vld [vmem:[#allocation176_spill] sm:$0xff]  ;;  %v8530_v50 = vld [vmem:[#allocation71_spill] sm:$0xff] }
 0x652   :  { %v3113_v34 = vmul.f32 %v4374_v33, %v6876_v22  ;;  %v3116_v39 = vmul.f32 %v4378_v15, %v6933_v41  ;;  %v7104_v36 = vpop.permute.xlu1 %2671  ;;  %4261 = vrot.lane.b32.xlu0 %v4260_v21, %s4592_s29  ;;  %v1200_v45 = vadd.f32 %v8522_v28, %v1022_v25  ;;  %v1379_v26 = vadd.f32 %v8515_v27, %v1319_v9  ;;  %v8529_v25 = vld [vmem:[#allocation184_spill] sm:$0xff]  ;;  %v8531_v21 = vld [vmem:[#allocation19_spill] sm:$0xff] }
 0x653   :  { %v7106_v1 = vpop.permute.xlu0 %1831  ;;  %v1771_v60 = vsel %vm8527_vm6, %v8519_v5, %v8526_v6  ;;  %v2024_v22 = vsel %vm2019_vm1, %v8422_v10, %v8528_v38  ;;  %v1611_v8 = vadd.f32 %v1596_v54, %v1438_v31  ;;  %v1980_v41 = vadd.f32 %v1964_v44, %v1786_v58 }
 0x654   :  { %v4265_v59 = vpack.i.bf16 %v3116_v39, %v3113_v34  ;;  %v3002_v33 = vmul.f32 %v4376_v0, %v6914_v14  ;;  %v4380_v61 = vpop.eup %4379  ;;  %v1199_v52 = vadd.f32 %v1184_v49, %v1021_v37  ;;  %v1439_v42 = vadd.f32 %v8518_v48, %v1379_v26  ;;  %v8532_v37 = vld [vmem:[#allocation117_spill] sm:$0xff]  ;;  %v8536_v39 = vld [vmem:[#allocation116_spill] sm:$0xff]  ;;  %v8538_v26 = vld [vmem:[#allocation70_spill] sm:$0xff] }
 0x655   :  { %v1965_v27 = vsel %vm1959_vm2, %v8525_v53, %v8529_v25  ;;  %v2084_v5 = vsel %vm2079_vm0, %v8424_v12, %v8530_v50  ;;  %v1787_v62 = vadd.f32 %v1771_v60, %v1611_v8  ;;  %v1772_v10 = vsel %vm8521_vm4, %v8526_v6, %v8531_v21  ;;  %v8533_v12 = vld [vmem:[#allocation32_spill] sm:$0xff]  ;;  %v8534_v53 = vld [vmem:[#allocation34_spill] sm:$0xff]  ;;  %v8535_v34 = vld [vmem:[#allocation113_spill] sm:$0xff] }
 0x656   :  { %v2040_v15 = vadd.f32 %v2024_v22, %v1980_v41  ;;  %v7128_v28 = vpop.permute.xlu1 %2789  ;;  %4266 = vrot.lane.b32.xlu1 %v4265_v59, %s4593_s30  ;;  %3022 = vrot.lane.b32.xlu0 %v3002_v33, %s4592_s29  ;;  %v7135_v48 = vadd.f32 %v8532_v37, %v1200_v45  ;;  %v1612_v0 = vadd.f32 %v8524_v51, %v1439_v42  ;;  %vm8537_vm5 = vcmask 883712   ;;  %v8540_v59 = vld [vmem:[#allocation138_spill] sm:$0xff]  ;;  %v8541_v33 = vld [vmem:[#allocation137_spill] sm:$0xff] }
 0x657   :  { %v7131_v14 = vpop.permute.xlu0 %2313  ;;  %v2025_v49 = vsel %vm2019_vm1, %v8528_v38, %v8533_v12  ;;  %v2262_v9 = vsel %vm2257_vm11, %v8426_v56, %v6716_v11  ;;  %v1981_v54 = vadd.f32 %v1965_v27, %v1787_v62  ;;  %v1966_v44 = vsel %vm1959_vm2, %v8529_v25, %v8534_v53  ;;  %vm8539_vm6 = vmmov %vm8537_vm5 }
 0x658   :  { %v2100_v31 = vadd.f32 %v2084_v5, %v2040_v15  ;;  %v3117_v58 = vmul.f32 %v4380_v61, %v6936_v23  ;;  %v1481_v51 = vsel %vm8537_vm5, %v8536_v39, %v8535_v34  ;;  %v1788_v45 = vadd.f32 %v1772_v10, %v1612_v0 }
 0x659   :  { %v2085_v6 = vsel %vm2079_vm0, %v8530_v50, %v8538_v26  ;;  %v2440_v56 = vsel %vm2435_vm10, %v8429_v46, %v6871_v24  ;;  %v1482_v60 = vsel %vm8539_vm6, %v8535_v34, %v8532_v37  ;;  %v2041_v38 = vadd.f32 %v2025_v49, %v1981_v54 }
 0x65a   :  { %v2278_v22 = vadd.f32 %v2262_v9, %v2100_v31  ;;  %v2026_v23 = vsel %vm2019_vm1, %v8533_v12, %v6742_v30  ;;  %v2312_v8 = vpop.permute.xlu1 %2311  ;;  %3137 = vrot.lane.b32.xlu1 %v3117_v58, %s4593_s30  ;;  %vm8542_vm2 = vcmask 875520   ;;  %v1982_v46 = vadd.f32 %v1966_v44, %v1788_v45  ;;  %v8544_v9 = vld [vmem:[#allocation21_spill] sm:$0xff] }
 0x65b   :  { %v7164_v41 = vpop.permute.xlu0 %2847  ;;  %v1649_v61 = vsel %vm8542_vm2, %v8541_v33, %v8540_v59  ;;  %v2263_v42 = vsel %vm2257_vm11, %v6716_v11, %v6781_v4  ;;  %v2618_v25 = vsel %vm2613_vm8, %v8432_v18, %v6916_v2  ;;  %v1496_v27 = vadd.f32 %v1481_v51, %v1198_v63  ;;  %vm8543_vm1 = vmmov %vm8542_vm2  ;;  %v8547_v51 = vld [vmem:[#allocation42_spill] sm:$0xff] }
 0x65c   :  { %v2101_v30 = vadd.f32 %v2085_v6, %v2041_v38  ;;  %v2086_v50 = vsel %vm2079_vm0, %v8538_v26, %v6809_v19  ;;  %v2456_v5 = vadd.f32 %v2440_v56, %v2278_v22  ;;  %v2042_v62 = vadd.f32 %v2026_v23, %v1982_v46  ;;  %v8548_v56 = vld [vmem:[#allocation39_spill] sm:$0xff]  ;;  %v8549_v38 = vld [vmem:[#allocation73_spill] sm:$0xff] }
 0x65d   :  { %v2441_v21 = vsel %vm2435_vm10, %v6871_v24, %v6838_v16  ;;  %v1650_v11 = vsel %vm8543_vm1, %v8540_v59, %v6940_v47  ;;  %v2678_v18 = vsel %vm2673_vm7, %v8438_v32, %v6967_v40  ;;  %v1497_v63 = vadd.f32 %v1482_v60, %v1199_v52 }
 0x65e   :  { %v1664_v10 = vadd.f32 %v1649_v61, %v1496_v27  ;;  %v2279_v15 = vadd.f32 %v2263_v42, %v2101_v30  ;;  %v2634_v37 = vadd.f32 %v2618_v25, %v2456_v5  ;;  %v7187_v0 = vpop.permute.xlu1 %2731  ;;  %v2102_v12 = vadd.f32 %v2086_v50, %v2042_v62  ;;  %v8551_v61 = vld [vmem:[#allocation31_spill] sm:$0xff] }
 0x65f   :  { %v2138_v19 = vpop.permute.xlu0 %2137  ;;  %v1837_v24 = vsel %vm940_vm9, %v8441_v7, %v6988_v35  ;;  %v1838_v49 = vsel %vm940_vm9, %v6988_v35, %v7028_v17  ;;  %v2738_v32 = vsel %vm2733_vm15, %v8544_v9, %v7054_v3  ;;  %v1665_v54 = vadd.f32 %v1650_v11, %v1497_v63  ;;  %v8545_v7 = vld [vmem:[#allocation37_spill] sm:$0xff]  ;;  %v8552_v25 = vld [vmem:[#allocation43_spill] sm:$0xff] }
 0x660   :  { %v2457_v52 = vadd.f32 %v2441_v21, %v2279_v15  ;;  %v2619_v53 = vsel %vm2613_vm8, %v6916_v2, %v6965_v43  ;;  %v2694_v44 = vadd.f32 %v2678_v18, %v2634_v37  ;;  %v2264_v31 = vsel %vm2257_vm11, %v6781_v4, %v6938_v55  ;;  %v8553_v11 = vld [vmem:[#allocation41_spill] sm:$0xff] }
 0x661   :  { %v2143_v58 = vsel %vm1356_vm12, %v8545_v7, %v7081_v29  ;;  %v2144_v35 = vsel %vm1356_vm12, %v7081_v29, %v7056_v20  ;;  %vm8546_vm0 = vcmask 375808   ;;  %v1853_v39 = vadd.f32 %v1837_v24, %v1664_v10  ;;  %v8557_v24 = vld [vmem:[#allocation65_spill] sm:$0xff] }
 0x662   :  { %v2798_v34 = vsel %vm8546_vm0, %v6689_v57, %v7083_v13  ;;  %v2679_v2 = vsel %vm2673_vm7, %v6967_v40, %v8547_v51  ;;  %v1854_v45 = vadd.f32 %v1838_v49, %v1665_v54  ;;  %v2754_v26 = vadd.f32 %v2738_v32, %v2694_v44  ;;  %v7216_v4 = vpop.permute.xlu1 %2849  ;;  %vm8556_vm4 = vmmov %vm8546_vm0  ;;  %v8558_v32 = vld [vmem:[#allocation28_spill] sm:$0xff] }
 0x663   :  { %v2492_v55 = vpop.permute.xlu0 %2491  ;;  %v2635_v6 = vadd.f32 %v2619_v53, %v2457_v52  ;;  %v2321_v60 = vsel %vm1416_vm13, %v8548_v56, %v2312_v8  ;;  %v2322_v29 = vsel %vm1416_vm13, %v2312_v8, %v7131_v14  ;;  %vm8550_vm11 = vcmask 367616   ;;  %v8559_v53 = vld [vmem:[#allocation75_spill] sm:$0xff] }
 0x664   :  { %v2858_v57 = vsel %vm8550_vm11, %v8549_v38, %v7164_v41  ;;  %v2159_v22 = vadd.f32 %v2143_v58, %v1853_v39  ;;  %v2160_v23 = vadd.f32 %v2144_v35, %v1854_v45  ;;  %v2814_v59 = vadd.f32 %v2798_v34, %v2754_v26  ;;  %vm8560_vm5 = vmmov %vm8550_vm11 }
 0x665   :  { %v2280_v40 = vadd.f32 %v2264_v31, %v2102_v12  ;;  %v1666_v33 = vadd.f32 %v6940_v47, %v7135_v48  ;;  %v2442_v46 = vsel %vm2435_vm10, %v6838_v16, %v8551_v61  ;;  %v2695_v42 = vadd.f32 %v2679_v2, %v2635_v6  ;;  %v8554_v16 = vld [vmem:[#allocation74_spill] sm:$0xff] }
 0x666   :  { %v2739_v8 = vsel %vm2733_vm15, %v7054_v3, %v8552_v25  ;;  %v2337_v27 = vadd.f32 %v2321_v60, %v2159_v22  ;;  %v2338_v30 = vadd.f32 %v2322_v29, %v2160_v23  ;;  %v2874_v50 = vadd.f32 %v2858_v57, %v2814_v59  ;;  %v2490_v5 = vpop.permute.xlu1 %2489 }
 0x667   :  { %v2908_v62 = vpop.permute.xlu0 %2907  ;;  %v1839_v21 = vsel %vm940_vm9, %v7028_v17, %v7106_v1  ;;  %v2499_v47 = vsel %vm1590_vm14, %v8553_v11, %v2490_v5  ;;  %v2500_v48 = vsel %vm1590_vm14, %v2490_v5, %v2492_v55  ;;  %vm8555_vm10 = vcmask 359424  }
 0x668   :  { %v2918_v18 = vsel %vm8555_vm10, %v8554_v16, %v2908_v62  ;;  %v2799_v3 = vsel %vm8556_vm4, %v7083_v13, %v7128_v28  ;;  %v2515_v63 = vadd.f32 %v2499_v47, %v2337_v27  ;;  %v2516_v10 = vadd.f32 %v2500_v48, %v2338_v30 }
 0x669   :  { %v2934_v15 = vadd.f32 %v2918_v18, %v2874_v50  ;;  %v2458_v37 = vadd.f32 %v2442_v46, %v2280_v40  ;;  %v2755_v12 = vadd.f32 %v2739_v8, %v2695_v42  ;;  %v2145_v17 = vsel %vm1356_vm12, %v7056_v20, %v2138_v19 }
 0x66a   :  { %v1855_v1 = vadd.f32 %v1839_v21, %v1666_v33  ;;  %v7247_v49 = vadd.f32 %v8557_v24, %v2515_v63  ;;  %v7250_v9 = vadd.f32 %v8557_v24, %v2516_v10  ;;  %v2792_v54 = vpop.permute.xlu1 %2791  ;;  %v2620_v44 = vsel %vm2613_vm8, %v6965_v43, %v8559_v53  ;;  %vm8561_vm8 = vmmov %vm8555_vm10  ;;  %v8568_v53 = vld [vmem:[#allocation35_spill] sm:$0xff] }
 0x66b   :  { %v7253_v52 = vadd.f32 %v8558_v32, %v2934_v15  ;;  %v2316_v13 = vpop.permute.xlu0 %2315  ;;  %v2815_v31 = vadd.f32 %v2799_v3, %v2755_v12  ;;  %v2859_v20 = vsel %vm8560_vm5, %v7164_v41, %v7216_v4  ;;  %v2680_v39 = vsel %vm2673_vm7, %v8547_v51, %v7104_v36  ;;  %vm8562_vm7 = vmmov %vm8546_vm0  ;;  %v8565_v12 = vld [vmem:[#allocation25_spill] sm:$0xff] }
 0x66c   :  { %v2323_v19 = vsel %vm1416_vm13, %v7131_v14, %v2316_v13  ;;  %v2161_v7 = vadd.f32 %v2145_v17, %v1855_v1  ;;  %v4063_v58 = vmul.f32 -1.442695, %v7247_v49  ;;  %v4064_v35 = vmul.f32 -1.442695, %v7250_v9  ;;  %vm8564_vm6 = vmmov %vm8561_vm8  ;;  %v8566_v17 = vld [vmem:[#allocation13_spill] sm:$0xff] }
 0x66d   :  { %v4071_v34 = vmul.f32 -1.442695, %v7253_v52  ;;  %v2636_v43 = vadd.f32 %v2620_v44, %v2458_v37  ;;  %v2875_v2 = vadd.f32 %v2859_v20, %v2815_v31  ;;  %v2740_v14 = vsel %vm2733_vm15, %v8552_v25, %v7187_v0  ;;  %vm8563_vm15 = vmmov %vm8560_vm5  ;;  %v8569_v44 = vld [vmem:[#allocation17_spill] sm:$0xff] }
 0x66e   :  { %4381 = vpow2.f32 %v4063_v58  ;;  %v2339_v45 = vadd.f32 %v2323_v19, %v2161_v7  ;;  %v2910_v26 = vpop.permute.xlu1 %2909  ;;  %v2800_v36 = vsel %vm8562_vm7, %v7128_v28, %v2792_v54  ;;  %v1059_v1 = vsel %vm520_vm3, %v8566_v17, %v8565_v12  ;;  %v8571_v58 = vld [vmem:[#allocation14_spill] sm:$0xff] }
 0x66f   :  { %v2494_v41 = vpop.permute.xlu0 %2493  ;;  %4383 = vpow2.f32 %v4064_v35  ;;  %v2919_v6 = vsel %vm8561_vm8, %v2908_v62, %v2910_v26  ;;  %v2696_v60 = vadd.f32 %v2680_v39, %v2636_v43  ;;  %vm8570_vm2 = vcmask 1031168  }
 0x670   :  { %v2501_v56 = vsel %vm1590_vm14, %v2492_v55, %v2494_v41  ;;  %4385 = vpow2.f32 %v4071_v34  ;;  %v2935_v29 = vadd.f32 %v2919_v6, %v2875_v2  ;;  %v1237_v31 = vsel %vm8570_vm2, %v8569_v44, %v8568_v53  ;;  %v4534_v2 = vld [vmem:[%s7878_s0] sm:$0xff]  ;;  %v8573_v41 = vld [vmem:[#allocation118_spill] sm:$0xff]  ;;  %vm8576_vm0 = vmmov %vm8570_vm2 }
 0x671   :  { %v2517_v38 = vadd.f32 %v2501_v56, %v2339_v45  ;;  %v2756_v51 = vadd.f32 %v2740_v14, %v2696_v60  ;;  %v1060_v35 = vsel %vm520_vm3, %v8565_v12, %v8571_v58  ;;  %vm8574_vm1 = vcmask 883712   ;;  %v8575_v14 = vld [vmem:[#allocation18_spill] sm:$0xff]  ;;  %vm8581_vm10 = vmmov %vm8576_vm0  ;;  %v8583_v12 = vld [vmem:[#allocation123_spill] sm:$0xff] }
 0x672   :  { %v7277_v57 = vadd.f32 %v8558_v32, %v2935_v29  ;;  %v2852_v0 = vpop.permute.xlu1 %2851  ;;  %v1238_v6 = vsel %vm8576_vm0, %v8568_v53, %v8575_v14  ;;  %vm8579_vm11 = vmmov %vm8574_vm1  ;;  %vm8582_vm4 = vcmask 875520  }
 0x673   :  { %v7280_v22 = vadd.f32 %v8557_v24, %v2517_v38  ;;  %v7282_v23 = vpop.permute.xlu0 %1685  ;;  %v2860_v55 = vsel %vm8563_vm15, %v7216_v4, %v2852_v0  ;;  %v2816_v59 = vadd.f32 %v2800_v36, %v2756_v51  ;;  %v8577_v0 = vld [vmem:[#allocation26_spill] sm:$0xff]  ;;  %vm8584_vm5 = vmmov %vm8574_vm1 }
 0x674   :  { %v4072_v40 = vmul.f32 -1.442695, %v7277_v57  ;;  %vm8585_vm8 = vmmov %vm8582_vm4 }
 0x675   :  { %v4065_v33 = vmul.f32 -1.442695, %v7280_v22  ;;  %v2876_v28 = vadd.f32 %v2860_v55, %v2816_v59  ;;  %v1061_v55 = vsel %vm520_vm3, %v8571_v58, %v8577_v0  ;;  %vm8588_vm7 = vmmov %vm8576_vm0 }
 0x676   :  { %4387 = vpow2.f32 %v4072_v40  ;;  %v2912_v61 = vpop.permute.xlu1 %2911  ;;  %v8578_v40 = vld [vmem:[#allocation119_spill] sm:$0xff]  ;;  %vm8590_vm15 = vmmov %vm8574_vm1 }
 0x677   :  { %v7288_v46 = vpop.permute.xlu0 %1689  ;;  %4389 = vpow2.f32 %v4065_v33  ;;  %v2920_v42 = vsel %vm8564_vm6, %v2910_v26, %v2912_v61  ;;  %v8572_v26 = vld [vmem:[#allocation122_spill] sm:$0xff]  ;;  %v1537_v17 = vsel %vm8584_vm5, %v8578_v40, %v8583_v12  ;;  %vm8591_vm6 = vmmov %vm8582_vm4 }
 0x678   :  { %v4382_v25 = vpop.eup %4381  ;;  %v2936_v8 = vadd.f32 %v2920_v42, %v2876_v28  ;;  %v1536_v33 = vsel %vm8579_vm11, %v8572_v26, %v8578_v40  ;;  %v4535_v28 = vld [vmem:[%s7878_s0 + $0x8] sm:$0xff]  ;;  %vm8594_vm2 = vmmov %vm8576_vm0 }
 0x679   :  { %v4384_v27 = vpop.eup %4383  ;;  %v2979_v30 = vadd.f32 1.0, %v4382_v25  ;;  %vm8596_vm0 = vmmov %vm8582_vm4 }
 0x67a   :  { %v4386_v50 = vpop.eup %4385  ;;  %v2980_v5 = vadd.f32 1.0, %v4384_v27  ;;  %v7292_v4 = vadd.f32 %v8558_v32, %v2936_v8  ;;  %v7294_v62 = vpop.permute.xlu1 %1687  ;;  %v8567_v32 = vld [vmem:[#allocation5_spill] sm:$0xff]  ;;  %v8580_v8 = vld [vmem:[#allocation38_spill] sm:$0xff]  ;;  %vm8599_vm11 = vmmov %vm8594_vm2 }
 0x67b   :  { %v7296_v21 = vpop.permute.xlu0 %1886  ;;  %4391 = vrcp.f32 %v2979_v30  ;;  %v3094_v47 = vadd.f32 1.0, %v4386_v50  ;;  %v888_v54 = vmul.f32 0.0, %v8567_v32  ;;  %v889_v45 = vmul.f32 %v4534_v2, %v8567_v32  ;;  %vm8605_vm5 = vmmov %vm8594_vm2 }
 0x67c   :  { %4393 = vrcp.f32 %v2980_v5  ;;  %v4073_v11 = vmul.f32 -1.442695, %v7292_v4  ;;  %v890_v61 = vmul.f32 %v4535_v28, %v8567_v32  ;;  %v1239_v27 = vsel %vm8581_vm10, %v8575_v14, %v8580_v8  ;;  %vm8601_vm10 = vmmov %vm8574_vm1 }
 0x67d   :  { %v1074_v34 = vadd.f32 %v1059_v1, %v888_v54  ;;  %v1075_v38 = vadd.f32 %v1060_v35, %v889_v45  ;;  %v1699_v50 = vsel %vm8582_vm4, %v7282_v23, %v7294_v62  ;;  %vm8602_vm4 = vmmov %vm8596_vm0 }
 0x67e   :  { %4395 = vpow2.f32 %v4073_v11  ;;  %v1885_v48 = vpop.permute.xlu1 %1884  ;;  %v1076_v11 = vadd.f32 %v1061_v55, %v890_v61  ;;  %v8589_v61 = vld [vmem:[#allocation120_spill] sm:$0xff] }
 0x67f   :  { %v7299_v16 = vpop.permute.xlu0 %2182  ;;  %4397 = vrcp.f32 %v3094_v47  ;;  %v1252_v56 = vadd.f32 %v1237_v31, %v1074_v34  ;;  %v1253_v42 = vadd.f32 %v1238_v6, %v1075_v38  ;;  %v8587_v38 = vld [vmem:[#allocation20_spill] sm:$0xff] }
 0x680   :  { %v4388_v18 = vpop.eup %4387  ;;  %v1254_v54 = vadd.f32 %v1239_v27, %v1076_v11 }
 0x681   :  { %v4390_v3 = vpop.eup %4389  ;;  %v3095_v63 = vadd.f32 1.0, %v4388_v18  ;;  %v1551_v47 = vadd.f32 %v1536_v33, %v1253_v42  ;;  %v1538_v42 = vsel %vm8590_vm15, %v8583_v12, %v8589_v61  ;;  %vm8618_vm15 = vcmask 64512  }
 0x682   :  { %v2981_v10 = vadd.f32 1.0, %v4390_v3  ;;  %v7301_v15 = vpop.permute.xlu1 %1888  ;;  %v1552_v44 = vadd.f32 %v1537_v17, %v1254_v54  ;;  %v8593_v54 = vld [vmem:[#allocation40_spill] sm:$0xff] }
 0x683   :  { %v7303_v37 = vpop.permute.xlu0 %2186  ;;  %4399 = vrcp.f32 %v3095_v63  ;;  %v1901_v58 = vsel %vm940_vm9, %v7296_v21, %v7301_v15 }
 0x684   :  { %4401 = vrcp.f32 %v2981_v10 }
 0x685   :  { %v4392_v24 = vpop.eup %4391 }
 0x686   :  { %v4394_v13 = vpop.eup %4393  ;;  %v3003_v20 = vmul.f32 %v4392_v24, %v7247_v49  ;;  %v2185_v19 = vpop.permute.xlu1 %2184  ;;  %v1535_v49 = vsel %vm8574_vm1, %v8573_v41, %v8572_v26  ;;  %v1900_v24 = vsel %vm940_vm9, %v1885_v48, %v7296_v21 }
 0x687   :  { %v2361_v7 = vpop.permute.xlu0 %2360  ;;  %v3004_v39 = vmul.f32 %v4394_v13, %v7250_v9  ;;  %v1550_v59 = vadd.f32 %v1535_v49, %v1252_v56  ;;  %v1714_v13 = vadd.f32 %v1699_v50, %v1551_v47 }
 0x688   :  { %v4396_v43 = vpop.eup %4395 }
 0x689   :  { %v3096_v60 = vadd.f32 1.0, %v4396_v43  ;;  %v4270_v29 = vpack.i.bf16 %v3004_v39, %v3003_v20  ;;  %v4398_v51 = vpop.eup %4397  ;;  %v1713_v30 = vadd.f32 %v7282_v23, %v1550_v59  ;;  %v1916_v31 = vadd.f32 %v1900_v24, %v1714_v13 }
 0x68a   :  { %v7327_v9 = vpop.permute.xlu1 %3169  ;;  %v3118_v18 = vmul.f32 %v4398_v51, %v7253_v52  ;;  %v1700_v52 = vsel %vm8585_vm8, %v7294_v62, %v7288_v46  ;;  %v2199_v43 = vsel %vm1356_vm12, %v2185_v19, %v7303_v37  ;;  %v1240_v51 = vsel %vm8588_vm7, %v8580_v8, %v8587_v38  ;;  %vm8608_vm8 = vmmov %vm8596_vm0 }
 0x68b   :  { %v7329_v36 = vpop.permute.xlu0 %2364  ;;  %4403 = vrcp.f32 %v3096_v60  ;;  %4271 = vrot.lane.b32.xlu0 %v4270_v29, %s4592_s29  ;;  %v1915_v23 = vadd.f32 %v1885_v48, %v1713_v30  ;;  %v1715_v35 = vadd.f32 %v1700_v52, %v1552_v44  ;;  %v1241_v13 = vsel %vm8594_vm2, %v8587_v38, %v8593_v54 }
 0x68d   :  { %v4400_v25 = vpop.eup %4399  ;;  %v2213_v48 = vadd.f32 %v7299_v16, %v1915_v23  ;;  %v1917_v26 = vadd.f32 %v1901_v58, %v1715_v35 }
 0x68e   :  { %v4402_v5 = vpop.eup %4401  ;;  %v3119_v3 = vmul.f32 %v4400_v25, %v7277_v57  ;;  %v2363_v63 = vpop.permute.xlu1 %2362  ;;  %v2198_v57 = vsel %vm1356_vm12, %v7299_v16, %v2185_v19  ;;  %v8586_v16 = vld [vmem:[#allocation15_spill] sm:$0xff]  ;;  %v4536_v19 = vld [vmem:[%s7878_s0 + $0x10] sm:$0xff] }
 0x68f   :  { %v7351_v10 = vpop.permute.xlu0 %1693  ;;  %v3005_v1 = vmul.f32 %v4402_v5, %v7280_v22  ;;  %v2376_v62 = vsel %vm1416_vm13, %v2361_v7, %v2363_v63  ;;  %v2214_v34 = vadd.f32 %v2198_v57, %v1916_v31  ;;  %v2391_v2 = vadd.f32 %v2361_v7, %v2213_v48 }
 0x690   :  { %v4275_v53 = vpack.i.bf16 %v3119_v3, %v3118_v18  ;;  %v1062_v6 = vsel %vm520_vm3, %v8577_v0, %v8586_v16  ;;  %v2377_v21 = vsel %vm1416_vm13, %v2363_v63, %v7329_v36  ;;  %v2215_v7 = vadd.f32 %v2199_v43, %v1917_v26  ;;  %v8592_v63 = vld [vmem:[#allocation27_spill] sm:$0xff] }
 0x691   :  { %3028 = vrot.lane.b32.xlu0 %v3005_v1, %s4592_s29  ;;  %v2392_v41 = vadd.f32 %v2376_v62, %v2214_v34  ;;  %v1063_v12 = vsel %vm520_vm3, %v8586_v16, %v8592_v63 }
 0x692   :  { %v7365_v20 = vpop.permute.xlu1 %1691  ;;  %4276 = vrot.lane.b32.xlu1 %v4275_v53, %s4593_s30  ;;  %v2393_v59 = vadd.f32 %v2377_v21, %v2215_v7 }
 0x693   :  { %v2541_v22 = vpop.permute.xlu0 %2540  ;;  %v1701_v8 = vsel %vm8591_vm6, %v7288_v46, %v7365_v20  ;;  %v4537_v46 = vld [vmem:[%s7878_s0 + $0x18] sm:$0xff]  ;;  %v1702_v35 = vsel %vm8596_vm0, %v7365_v20, %v7351_v10  ;;  %vm8619_vm6 = vmmov %vm8618_vm15 }
 0x694   :  { %v892_v1 = vmul.f32 %v4537_v46, %v8567_v32  ;;  %vm8622_vm0 = vmmov %vm8619_vm6 }
 0x695   :  { %v4404_v39 = vpop.eup %4403 }
 0x696   :  { %v3120_v45 = vmul.f32 %v4404_v39, %v7292_v4  ;;  %v2539_v49 = vpop.permute.xlu1 %2538  ;;  %v891_v4 = vmul.f32 %v4536_v19, %v8567_v32  ;;  %v1078_v52 = vadd.f32 %v1063_v12, %v892_v1 }
 0x697   :  { %v1891_v14 = vpop.permute.xlu0 %1890  ;;  %v2554_v56 = vsel %vm1590_vm14, %v2539_v49, %v2541_v22  ;;  %v2569_v60 = vadd.f32 %v2539_v49, %v2391_v2  ;;  %v8597_v2 = vld [vmem:[#allocation16_spill] sm:$0xff] }
 0x698   :  { %v2570_v29 = vadd.f32 %v2554_v56, %v2392_v41  ;;  %3143 = vrot.lane.b32.xlu1 %v3120_v45, %s4593_s30  ;;  %v1077_v55 = vadd.f32 %v1062_v6, %v891_v4  ;;  %v1902_v17 = vsel %vm940_vm9, %v7301_v15, %v1891_v14  ;;  %v8595_v15 = vld [vmem:[#allocation124_spill] sm:$0xff]  ;;  %v1256_v58 = vadd.f32 %v1241_v13, %v1078_v52  ;;  %v8598_v6 = vld [vmem:[#allocation22_spill] sm:$0xff] }
 0x699   :  { %v3172_v0 = vadd.f32 %v7327_v9, %v2569_v60  ;;  %v1064_v45 = vsel %vm520_vm3, %v8592_v63, %v8597_v2  ;;  %v1242_v21 = vsel %vm8599_vm11, %v8593_v54, %v8598_v6  ;;  %vm8623_vm11 = vmmov %vm8622_vm0 }
 0x69a   :  { %v3173_v40 = vadd.f32 %v7327_v9, %v2570_v29  ;;  %v2543_v33 = vpop.permute.xlu1 %2542  ;;  %v1255_v30 = vadd.f32 %v1240_v51, %v1077_v55  ;;  %v8600_v29 = vld [vmem:[#allocation121_spill] sm:$0xff] }
 0x69b   :  { %v2189_v28 = vpop.permute.xlu0 %2188  ;;  %v3671_v25 = vpack.c.bf16 %v3172_v0, %v3172_v0  ;;  %v2555_v27 = vsel %vm1590_vm14, %v2541_v22, %v2543_v33  ;;  %v1539_v22 = vsel %vm8574_vm1, %v8589_v61, %v8595_v15  ;;  %v1540_v38 = vsel %vm8601_vm10, %v8595_v15, %v8600_v29  ;;  %vm8624_vm10 = vmmov %vm8622_vm0 }
 0x69c   :  { %v3672_v50 = vpack.c.bf16 %v3173_v40, %v3173_v40  ;;  %v2571_v5 = vadd.f32 %v2555_v27, %v2393_v59  ;;  %v1553_v11 = vadd.f32 %v1538_v42, %v1255_v30  ;;  %v2200_v53 = vsel %vm1356_vm12, %v7303_v37, %v2189_v28 }
 0x69d   :  { %3717 = vrot.lane.b32.xlu0 %v3671_v25, %s4592_s29  ;;  %v1554_v37 = vadd.f32 %v1539_v22, %v1256_v58  ;;  %v8603_v25 = vld [vmem:[#allocation29_spill] sm:$0xff] }
 0x69e   :  { %v3174_v47 = vadd.f32 %v7327_v9, %v2571_v5  ;;  %v1893_v18 = vpop.permute.xlu1 %1892  ;;  %3719 = vrot.lane.b32.xlu1 %v3672_v50, %s4592_s29  ;;  %v1716_v24 = vadd.f32 %v1701_v8, %v1553_v11  ;;  %v1065_v27 = vsel %vm520_vm3, %v8597_v2, %v8603_v25  ;;  %v4539_v5 = vld [vmem:[%s7878_s0 + $0x28] sm:$0xff]  ;;  %vm8607_vm3 = vmmov %vm8574_vm1 }
 0x69f   :  { %v2367_v3 = vpop.permute.xlu0 %2366  ;;  %v1903_v26 = vsel %vm940_vm9, %v1891_v14, %v1893_v18  ;;  %v1717_v16 = vadd.f32 %v1702_v35, %v1554_v37  ;;  %v4540_v35 = vld [vmem:[%s7878_s0 + $0x30] sm:$0xff] }
 0x6a0   :  { %v3673_v23 = vpack.c.bf16 %v3174_v47, %v3174_v47  ;;  %v1918_v57 = vadd.f32 %v1902_v17, %v1716_v24  ;;  %v2378_v48 = vsel %vm1416_vm13, %v7329_v36, %v2367_v3  ;;  %v4538_v36 = vld [vmem:[%s7878_s0 + $0x20] sm:$0xff]  ;;  %v8604_v47 = vld [vmem:[#allocation53_spill] sm:$0xff]  ;;  %v895_v37 = vmul.f32 %v4540_v35, %v8567_v32 }
 0x6a1   :  { %v893_v49 = vmul.f32 %v4538_v36, %v8567_v32  ;;  %v1919_v19 = vadd.f32 %v1903_v26, %v1717_v16  ;;  %v8606_v24 = vld [vmem:[#allocation125_spill] sm:$0xff] }
 0x6a2   :  { %v2191_v44 = vpop.permute.xlu1 %2190  ;;  %3721 = vrot.lane.b32.xlu0 %v3673_v23, %s4592_s29  ;;  %v2216_v62 = vadd.f32 %v2200_v53, %v1918_v57  ;;  %v1541_v23 = vsel %vm8607_vm3, %v8600_v29, %v8606_v24  ;;  %vm8627_vm3 = vmmov %vm8622_vm0 }
 0x6a3   :  { %v1696_v31 = vpop.permute.xlu0 %1695  ;;  %v2201_v56 = vsel %vm1356_vm12, %v2189_v28, %v2191_v44  ;;  %v1079_v60 = vadd.f32 %v1064_v45, %v893_v49 }
 0x6a4   :  { %v2394_v34 = vadd.f32 %v2378_v48, %v2216_v62  ;;  %v2217_v55 = vadd.f32 %v2201_v56, %v1919_v19  ;;  %v1703_v40 = vsel %vm8602_vm4, %v7351_v10, %v1696_v31  ;;  %v894_v10 = vmul.f32 %v4539_v5, %v8567_v32 }
 0x6a5   :  { %v1257_v0 = vadd.f32 %v1242_v21, %v1079_v60 }
 0x6a6   :  { %v2369_v39 = vpop.permute.xlu1 %2368  ;;  %v1080_v12 = vadd.f32 %v1065_v27, %v894_v10 }
 0x6a7   :  { %v2545_v43 = vpop.permute.xlu0 %2544  ;;  %v2379_v51 = vsel %vm1416_vm13, %v2367_v3, %v2369_v39  ;;  %v1243_v3 = vsel %vm8605_vm5, %v8598_v6, %v8604_v47 }
 0x6a8   :  { %v2556_v41 = vsel %vm1590_vm14, %v2543_v33, %v2545_v43  ;;  %v1555_v33 = vadd.f32 %v1540_v38, %v1257_v0  ;;  %v2395_v28 = vadd.f32 %v2379_v51, %v2217_v55  ;;  %v1258_v13 = vadd.f32 %v1243_v3, %v1080_v12 }
 0x6a9   :  { %v2572_v20 = vadd.f32 %v2556_v41, %v2394_v34 }
 0x6aa   :  { %v1698_v4 = vpop.permute.xlu1 %1697  ;;  %v1718_v8 = vadd.f32 %v1703_v40, %v1555_v33  ;;  %v1556_v15 = vadd.f32 %v1541_v23, %v1258_v13  ;;  %v33_v23 = vld [vmem:[%s7877_s5 + $0x48] sm:$0xff] }
 0x6ab   :  { %v3175_v14 = vadd.f32 %v7327_v9, %v2572_v20  ;;  %v1895_v7 = vpop.permute.xlu0 %1894  ;;  %v1704_v57 = vsel %vm8608_vm8, %v1696_v31, %v1698_v4 }
 0x6ac   :  { %v1904_v30 = vsel %vm940_vm9, %v1893_v18, %v1895_v7  ;;  %v1719_v34 = vadd.f32 %v1704_v57, %v1556_v15 }
 0x6ad   :  { %v3674_v59 = vpack.c.bf16 %v3175_v14, %v3175_v14  ;;  %v1920_v17 = vadd.f32 %v1904_v30, %v1718_v8 }
 0x6ae   :  { %v2547_v61 = vpop.permute.xlu1 %2546 }
 0x6af   :  { %3723 = vrot.lane.b32.xlu1 %v3674_v59, %s4592_s29  ;;  %v2193_v42 = vpop.permute.xlu0 %2192  ;;  %v2557_v50 = vsel %vm1590_vm14, %v2545_v43, %v2547_v61  ;;  %v1081_v43 = vadd.f32 %v8603_v25, %v895_v37  ;;  %v32_v37 = vld [vmem:[%s7877_s5 + $0x40] sm:$0xff] }
 0x6b0   :  { %v2573_v11 = vadd.f32 %v2557_v50, %v2395_v28  ;;  %v2202_v63 = vsel %vm1356_vm12, %v2191_v44, %v2193_v42 }
 0x6b1   :  { %v2218_v52 = vadd.f32 %v2202_v63, %v1920_v17  ;;  %v1259_v49 = vadd.f32 %v8604_v47, %v1081_v43  ;;  %v31_v47 = vld [vmem:[%s7877_s5 + $0x38] sm:$0xff] }
 0x6b2   :  { %v3176_v18 = vadd.f32 %v7327_v9, %v2573_v11  ;;  %v1897_v46 = vpop.permute.xlu1 %1896 }
 0x6b3   :  { %v2371_v1 = vpop.permute.xlu0 %2370  ;;  %v1905_v58 = vsel %vm940_vm9, %v1895_v7, %v1897_v46  ;;  %v1557_v6 = vadd.f32 %v8606_v24, %v1259_v49  ;;  %v30_v24 = vld [vmem:[%s7877_s5 + $0x30] sm:$0xff]  ;;  %v8614_v49 = vld [vmem:[#allocation11_spill] sm:$0xff] }
 0x6b4   :  { %v2380_v54 = vsel %vm1416_vm13, %v2369_v39, %v2371_v1  ;;  %v3675_v53 = vpack.c.bf16 %v3176_v18, %v3176_v18  ;;  %v1921_v2 = vadd.f32 %v1905_v58, %v1719_v34  ;;  %v8609_v58 = vld [vmem:[#allocation9_spill] sm:$0xff]  ;;  %v35_v34 = vld [vmem:[%s7877_s5 + $0x58] sm:$0xff] }
 0x6b5   :  { %v2396_v22 = vadd.f32 %v2380_v54, %v2218_v52  ;;  %v1720_v14 = vadd.f32 %v1698_v4, %v1557_v6  ;;  %v29_v4 = vld [vmem:[%s7877_s5 + $0x28] sm:$0xff]  ;;  %v8615_v6 = vmov 0  }
 0x6b6   :  { %v2195_v44 = vpop.permute.xlu1 %2194  ;;  %3725 = vrot.lane.b32.xlu0 %v3675_v53, %s4592_s29 }
 0x6b7   :  { %v2549_v48 = vpop.permute.xlu0 %2548  ;;  %v2203_v31 = vsel %vm1356_vm12, %v2193_v42, %v2195_v44 }
 0x6b8   :  { %v2558_v62 = vsel %vm1590_vm14, %v2547_v61, %v2549_v48  ;;  %v2219_v16 = vadd.f32 %v2203_v31, %v1921_v2 }
 0x6b9   :  { %v2574_v39 = vadd.f32 %v2558_v62, %v2396_v22  ;;  %v8610_v62 = vld [vmem:[#allocation12_spill] sm:$0xff] }
 0x6ba   :  { %v2373_v26 = vpop.permute.xlu1 %2372  ;;  %v3217_v35 = vpack.c.bf16 %v8610_v62, %v8609_v58 }
 0x6bb   :  { %v3177_v45 = vadd.f32 %v7327_v9, %v2574_v39  ;;  %v1899_v41 = vpop.permute.xlu0 %1898  ;;  %v2381_v36 = vsel %vm1416_vm13, %v2371_v1, %v2373_v26  ;;  %v4281_v39 = vld [vmem:[%s7882_s3] sm:$0xff]  }
 0x6bc   :  { %v2397_v32 = vadd.f32 %v2381_v36, %v2219_v16  ;;  %v1906_v60 = vsel %vm940_vm9, %v1897_v46, %v1899_v41  ;;  %vm3030_vm9 = vcmask 171008   ;;  %v8613_v36 = vld [vmem:[#allocation8_spill] sm:$0xff] }
 0x6bd   :  { %v3676_v20 = vpack.c.bf16 %v3177_v45, %v3177_v45  ;;  %v1922_v29 = vadd.f32 %v1906_v60, %v1720_v14  ;;  %v8611_v45 = vld [vmem:[#allocation7_spill] sm:$0xff]  ;;  %v3218_v16 = vpack.c.bf16 %v8614_v49, %v8613_v36 }
 0x6be   :  { %v2551_v21 = vpop.permute.xlu1 %2550 }
 0x6bf   :  { %3727 = vrot.lane.b32.xlu1 %v3676_v20, %s4592_s29  ;;  %v2375_v56 = vpop.permute.xlu0 %2374  ;;  %v2559_v19 = vsel %vm1590_vm14, %v2549_v48, %v2551_v21  ;;  %v34_v20 = vld [vmem:[%s7877_s5 + $0x50] sm:$0xff] }
 0x6c0   :  { %v2575_v7 = vadd.f32 %v2559_v19, %v2397_v32  ;;  %v2382_v33 = vsel %vm1416_vm13, %v2373_v26, %v2375_v56  ;;  %vm3256_vm13 = vcmask 261120   ;;  %v8612_v26 = vld [vmem:[#allocation10_spill] sm:$0xff]  ;;  %v36_v32 = vld [vmem:[%s7877_s5 + $0x60] sm:$0xff] }
 0x6c1   :  { %v3216_v41 = vpack.c.bf16 %v8612_v26, %v8611_v45 }
 0x6c2   :  { %v3178_v38 = vadd.f32 %v7327_v9, %v2575_v7  ;;  %v2197_v51 = vpop.permute.xlu1 %2196 }
 0x6c3   :  { %v2204_v0 = vsel %vm1356_vm12, %v2195_v44, %v2197_v51  ;;  %v4252_v40 = vpop.permute.xlu0 %4251  ;;  %vm3145_vm12 = vcmask 343040  }
 0x6c4   :  { %v3677_v55 = vpack.c.bf16 %v3178_v38, %v3178_v38  ;;  %v2220_v59 = vadd.f32 %v2204_v0, %v1922_v29  ;;  %v4254_v27 = vunpack.i.h.bf16 %v4252_v40  ;;  %v4253_v30 = vunpack.i.l.bf16 %v4252_v40 }
 0x6c6   :  { %v2553_v28 = vpop.permute.xlu1 %2552  ;;  %v2398_v61 = vadd.f32 %v2382_v33, %v2220_v59  ;;  %3729 = vrot.lane.b32.xlu0 %v3677_v55, %s4592_s29  ;;  %v3032_v12 = vsel %vm3030_vm9, %v4253_v30, %v4254_v27 }
 0x6c7   :  { %v2560_v42 = vsel %vm1590_vm14, %v2551_v21, %v2553_v28  ;;  %v4262_v5 = vpop.permute.xlu0 %4261  ;;  %v4282_v21 = vld [vmem:[%s7882_s3 + $0x8] sm:$0xff]   ;;  %vm8616_vm14 = vcmask 1043456  }
 0x6c8   :  { %v2576_v25 = vadd.f32 %v2560_v42, %v2398_v61  ;;  %v4263_v63 = vunpack.i.l.bf16 %v4262_v5  ;;  %v4264_v13 = vunpack.i.h.bf16 %v4262_v5  ;;  %vm8617_vm7 = vmmov %vm8616_vm14 }
 0x6c9   :  { %vm8620_vm2 = vmmov %vm8617_vm7 }
 0x6ca   :  { %v3179_v50 = vadd.f32 %v7327_v9, %v2576_v25  ;;  %v4257_v10 = vpop.permute.xlu1 %4256  ;;  %3228 = vperm.xlu0 %4248, %v29_v4   ;;  %v3031_v53 = vsel %vm3030_vm9, %v4263_v63, %v4253_v30  ;;  %v3033_v43 = vsel %vm3030_vm9, %v4254_v27, %v4264_v13  ;;  %vm8621_vm1 = vmmov %vm8620_vm2 }
 0x6cb   :  { %v4259_v8 = vunpack.i.h.bf16 %v4257_v10  ;;  %v4258_v11 = vunpack.i.l.bf16 %v4257_v10  ;;  %v3023_v54 = vpop.permute.xlu0 %3022  ;;  %vm8625_vm4 = vmmov %vm8621_vm1 }
 0x6cc   :  { %v3678_v3 = vpack.c.bf16 %v3179_v50, %v3179_v50  ;;  %v3034_v22 = vsel %vm3030_vm9, %v4264_v13, %v3023_v54  ;;  %vm8626_vm5 = vmmov %vm8621_vm1 }
 0x6cd   :  { %v3147_v17 = vsel %vm3145_vm12, %v4258_v11, %v4259_v8  ;;  %vm8628_vm8 = vmmov %vm8621_vm1 }
 0x6ce   :  { %v4267_v18 = vpop.permute.xlu1 %4266  ;;  %3731 = vrot.lane.b32.xlu1 %v3678_v3, %s4592_s29  ;;  %3238 = vperm.xlu0 %4248, %v31_v47   ;;  %v3220_v9 = vpack.c.bf16 %v3147_v17, %v3032_v12 }
 0x6cf   :  { %v4269_v46 = vunpack.i.h.bf16 %v4267_v18  ;;  %v4268_v1 = vunpack.i.l.bf16 %v4267_v18 }
 0x6d0   :  { %3265 = vmatprep.subr.bf16.mxu0 %v3220_v9 }
 0x6d1   :  { %v3146_v52 = vsel %vm3145_vm12, %v4268_v1, %v4258_v11  ;;  %v3148_v44 = vsel %vm3145_vm12, %v4259_v8, %v4269_v46  ;;  %v4283_v8 = vld [vmem:[%s7880_s2 + $0x8] sm:$0xff]   ;;  %v4284_v11 = vld [vmem:[%s7880_s2 + $0x10] sm:$0xff]  }
 0x6d2   :  { %v3219_v57 = vpack.c.bf16 %v3146_v52, %v3031_v53  ;;  %v3138_v15 = vpop.permute.xlu1 %3137  ;;  %3233 = vperm.xlu1 %4249, %v30_v24   ;;  %3681 = vperm.xlu0 %4248, %v33_v23   ;;  %v3221_v2 = vpack.c.bf16 %v3148_v44, %v3033_v43 }
 0x6d3   :  { %v3149_v48 = vsel %vm3145_vm12, %v4269_v46, %v3138_v15 }
 0x6d4   :  { %v3222_v31 = vpack.c.bf16 %v3149_v48, %v3034_v22  ;;  %3266 = vmatpush1.bf16.msra.mxu0 %v3219_v57 }
 0x6d5   :  { %3369 = vmatprep.subr.bf16.mxu0 %v3217_v35 }
 0x6d6   :  { %3243 = vperm.xlu1 %4249, %v32_v37   ;;  %3691 = vperm.xlu0 %4248, %v35_v34  }
 0x6d7   :  { %3318 = vmatprep.subr.bf16.mxu1 %v3222_v31  ;;  %4076 = vmatmul.mubr.msk.bf16.vlgmr.msra.gmra.mrb[8].mxu0 %vm3256_vm13, %v4281_v39 }
 0x6d8   :  { %3319 = vmatpush1.bf16.msra.mxu1 %v3221_v2  ;;  %3370 = vmatpush1.bf16.msra.mxu0 %v3216_v41 }
 0x6d9   :  { %4140 = vmatprep.subr.bf16.mxu1 %v3218_v16  ;;  %3305 = vmatprep.mubr.bf16.mxu0 %v8615_v6 }
 0x6da   :  { %3686 = vperm.xlu1 %4249, %v34_v20  }
 0x6db   :  { %4078 = vmatmul.mubr.msk.bf16.vlgmr.msra.gmra.mrb[8].mxu1 %vm3256_vm13, %v4281_v39 }
 0x6dc   :  { %4141 = vmatpush3.bf16.msra.mxu1 %v3218_v16  ;;  %3358 = vmatprep.mubr.bf16.mxu1 %v8615_v6 }
 0x6de   :  { %3696 = vperm.xlu1 %4249, %v36_v32  }
 0x6df   :  { %4077 = vmatmul.mubr.msk.bf16.gmra.mrb[12].mxu0 %vm3256_vm13, %v4282_v21 }
 0x6e0   :  { %3401 = vmatprep.mubr.bf16.mxu0 %v8615_v6 }
 0x6e3   :  { %4079 = vmatmul.mubr.msk.bf16.gmra.mrb[12].mxu1 %vm3256_vm13, %v4282_v21 }
 0x6e4   :  { %4144 = vmatprep.mubr.msk.bf16.mxu1 %vm3256_vm13, %v4281_v39 }
 0x6fd   :  { %v4272_v56 = vpop.permute.xlu0 %4271 }
 0x6fe   :  { %v4274_v60 = vunpack.i.h.bf16 %v4272_v56  ;;  %v4273_v19 = vunpack.i.l.bf16 %v4272_v56 }
 0x700   :  { %v3035_v38 = vsel %vm3030_vm9, %v3023_v54, %v4273_v19  ;;  %v3036_v0 = vsel %vm3030_vm9, %v4273_v19, %v4274_v60 }
 0x703   :  { %v3029_v59 = vpop.permute.xlu0 %3028 }
 0x704   :  { %v4277_v14 = vpop.permute.xlu1 %4276  ;;  %v3037_v61 = vsel %vm3030_vm9, %v4274_v60, %v3029_v59 }
 0x705   :  { %v4279_v7 = vunpack.i.h.bf16 %v4277_v14  ;;  %v4278_v29 = vunpack.i.l.bf16 %v4277_v14 }
 0x707   :  { %v3150_v51 = vsel %vm3145_vm12, %v3138_v15, %v4278_v29  ;;  %v3151_v55 = vsel %vm3145_vm12, %v4278_v29, %v4279_v7 }
 0x708   :  { %v3223_v40 = vpack.c.bf16 %v3150_v51, %v3035_v38  ;;  %v3224_v33 = vpack.c.bf16 %v3151_v55, %v3036_v0 }
 0x70a   :  { %v3144_v28 = vpop.permute.xlu1 %3143  ;;  %3371 = vmatprep.subr.bf16.mxu0 %v3224_v33 }
 0x70b   :  { %v3152_v42 = vsel %vm3145_vm12, %v4279_v7, %v3144_v28  ;;  %3372 = vmatpush1.bf16.msra.mxu0 %v3223_v40  ;;  %vm8629_vm12 = vmmov %vm8621_vm1 }
 0x70c   :  { %v3225_v4 = vpack.c.bf16 %v3152_v42, %v3037_v61 }
 0x70e   :  { %4080 = vmatmul.mubr.msk.bf16.vlgmr.msra.gmra.mrb[16].mxu0 %vm3256_vm13, %v4281_v39  ;;  %4142 = vmatprep.subr.bf16.mxu1 %v3225_v4 }
 0x70f   :  { %v3718_v25 = vpop.permute.xlu0 %3717  ;;  %4143 = vmatpush3.bf16.msra.mxu1 %v3225_v4  ;;  %3411 = vmatprep.mubr.bf16.mxu0 %v8615_v6 }
 0x710   :  { %v3720_v27 = vpop.permute.xlu1 %3719 }
 0x711   :  { %v3734_v30 = vsel %vm3030_vm9, %v3718_v25, %v3720_v27 }
 0x712   :  { %4145 = vmatmul.mubr.msk.bf16.vlgmr.msra.gmra.mrb[16].mxu1 %vm3256_vm13, %v4282_v21  ;;  %v3748_v10 = vsel %vm8616_vm14, %v3734_v30, 0  ;;  %vm8631_vm14 = vmmov %vm8622_vm0 }
 0x713   :  { %3800 = vmatprep.mubr.bf16.mxu1 %v8615_v6 }
 0x714   :  { %v3722_v50 = vpop.permute.xlu0 %3721 }
 0x715   :  { %v3735_v5 = vsel %vm3030_vm9, %v3720_v27, %v3722_v50 }
 0x716   :  { %4081 = vmatmul.mubr.msk.bf16.gmra.mrb[20].mxu0 %vm3256_vm13, %v4282_v21  ;;  %4114 = vmatprep.subr.msk.bf16.mxu1 %vm8617_vm7, %v3735_v5  ;;  %vm8630_vm13 = vmmov %vm8622_vm0 }
 0x717   :  { %3769 = vmatpush1.bf16.msra.mxu1 %v3748_v10  ;;  %3853 = vmatprep.mubr.bf16.mxu0 %v8615_v6 }
 0x71a   :  { %4115 = vmatmul.mubr.msk.bf16.vlgmr.msra.gmra.mrb[20].mxu1 %vm8618_vm15, %v4283_v8 }
 0x71b   :  { %3810 = vmatprep.mubr.bf16.mxu1 %v8615_v6 }
 0x721   :  { %v3724_v47 = vpop.permute.xlu1 %3723 }
 0x722   :  { %4116 = vmatmul.mubr.msk.bf16.gmra.mrb[24].mxu1 %vm8619_vm6, %v4284_v11  ;;  %v3736_v3 = vsel %vm3030_vm9, %v3722_v50, %v3724_v47 }
 0x723   :  { %3906 = vmatprep.mubr.bf16.mxu1 %v8615_v6  ;;  %v3754_v17 = vsel %vm8620_vm2, %v3736_v3, 0 }
 0x728   :  { %v3726_v63 = vpop.permute.xlu0 %3725 }
 0x729   :  { %v3737_v12 = vsel %vm3030_vm9, %v3724_v47, %v3726_v63 }
 0x72a   :  { %4117 = vmatprep.subr.msk.bf16.mxu0 %vm8621_vm1, %v3737_v12 }
 0x72b   :  { %3822 = vmatpush1.bf16.msra.mxu0 %v3754_v17 }
 0x72e   :  { %4118 = vmatmul.mubr.msk.bf16.vlgmr.msra.gmra.mrb[24].mxu0 %vm8622_vm0, %v4283_v8 }
 0x72f   :  { %3863 = vmatprep.mubr.bf16.mxu0 %v8615_v6 }
 0x731   :  { %v3728_v18 = vpop.permute.xlu1 %3727 }
 0x732   :  { %v3738_v9 = vsel %vm3030_vm9, %v3726_v63, %v3728_v18 }
 0x733   :  { %v3760_v24 = vsel %vm8625_vm4, %v3738_v9, 0 }
 0x736   :  { %4119 = vmatmul.mubr.msk.bf16.gmra.mrb[28].mxu0 %vm8623_vm11, %v4284_v11 }
 0x737   :  { %4150 = vmatprep.mubr.msk.bf16.mxu0 %vm8624_vm10, %v4283_v8 }
 0x738   :  { %v3730_v46 = vpop.permute.xlu0 %3729 }
 0x739   :  { %v3739_v1 = vsel %vm3030_vm9, %v3728_v18, %v3730_v46 }
 0x73a   :  { %4120 = vmatprep.subr.msk.bf16.mxu1 %vm8626_vm5, %v3739_v1 }
 0x73b   :  { %3875 = vmatpush1.bf16.msra.mxu1 %v3760_v24 }
 0x73e   :  { %4121 = vmatmul.mubr.msk.bf16.vlgmr.msra.gmra.mrb[28].mxu1 %vm8627_vm3, %v4283_v8 }
 0x73f   :  { %3916 = vmatprep.mubr.bf16.mxu1 %v8615_v6 }
 0x740   :  { %v3732_v23 = vpop.permute.xlu1 %3731 }
 0x741   :  { %v3740_v54 = vsel %vm3030_vm9, %v3730_v46, %v3732_v23 }
 0x742   :  { %v3766_v13 = vsel %vm8628_vm8, %v3740_v54, 0  ;;  %4154 = vmatprep.subr.msk.bf16.mxu0 %vm8629_vm12, %v3740_v54 }
 0x743   :  { %4149 = vmatpush3.bf16.msra.mxu0 %v3766_v13 }
 0x746   :  { %4122 = vmatmul.mubr.msk.bf16.gmra.mrb[32].mxu1 %vm8630_vm13, %v4284_v11  ;;  %4151 = vmatmul.mubr.msk.bf16.vlgmr.msra.gmra.mrb[32].mxu0 %vm8631_vm14, %v4284_v11 }
 0x749   :  { %v7591_v45 = vpop.permute.xlu0 %3228 }
 0x74d   :  { %v7617_v19 = vpop.permute.xlu0 %3238 }
 0x751   :  { %v7596_v41 = vpop.permute.xlu1 %3233 }
 0x755   :  { %v7625_v29 = vpop.permute.xlu1 %3243 }
 0x7aa   :  { %v3297_v53 = vpop.f32.mrb[8].mxu0 }
 0x7ab   :  { %v3299_v52 = vpop.f32.mrb[9].mxu0  ;;  %v7594_v26 = vadd.f32 %v3297_v53, %v7591_v45 }
 0x7ac   :  { %v3301_v57 = vpop.f32.mrb[10].mxu0  ;;  %v7599_v36 = vadd.f32 %v3299_v52, %v7591_v45 }
 0x7ad   :  { %v3303_v15 = vpop.f32.mrb[11].mxu0  ;;  %v7602_v49 = vadd.f32 %v3301_v57, %v7596_v41  ;;  %v4084_v20 = vmul.f32 -1.442695, %v7594_v26 }
 0x7ae   :  { %v3350_v22 = vpop.f32.mrb[8].mxu1  ;;  %v7605_v16 = vadd.f32 %v3303_v15, %v7596_v41  ;;  %v4085_v6 = vmul.f32 -1.442695, %v7599_v36 }
 0x7af   :  { %v3352_v44 = vpop.f32.mrb[9].mxu1  ;;  %v4091_v32 = vmul.f32 -1.442695, %v7602_v49  ;;  %v7612_v56 = vadd.f32 %v3350_v22, %v7591_v45  ;;  %4405 = vpow2.f32 %v4084_v20 }
 0x7b0   :  { %v3354_v48 = vpop.f32.mrb[10].mxu1  ;;  %v4092_v21 = vmul.f32 -1.442695, %v7605_v16  ;;  %v7615_v60 = vadd.f32 %v3352_v44, %v7591_v45  ;;  %4407 = vpow2.f32 %v4085_v6 }
 0x7b1   :  { %v3356_v58 = vpop.f32.mrb[11].mxu1  ;;  %v7620_v14 = vadd.f32 %v3354_v48, %v7596_v41  ;;  %4409 = vpow2.f32 %v4091_v32  ;;  %v4086_v38 = vmul.f32 -1.442695, %v7612_v56 }
 0x7b2   :  { %v3307_v62 = vpop.f32.mrb[12].mxu0  ;;  %4411 = vpow2.f32 %v4092_v21  ;;  %v4087_v0 = vmul.f32 -1.442695, %v7615_v60  ;;  %v7640_v33 = vadd.f32 %v3356_v58, %v7596_v41 }
 0x7b3   :  { %v3309_v35 = vpop.f32.mrb[13].mxu0  ;;  %v7623_v7 = vadd.f32 %v3307_v62, %v7617_v19  ;;  %v4093_v59 = vmul.f32 -1.442695, %v7620_v14  ;;  %4413 = vpow2.f32 %v4086_v38 }
 0x7b4   :  { %v3311_v37 = vpop.f32.mrb[14].mxu0  ;;  %v7629_v51 = vadd.f32 %v3309_v35, %v7617_v19  ;;  %4415 = vpow2.f32 %v4087_v0  ;;  %v4094_v30 = vmul.f32 -1.442695, %v7640_v33 }
 0x7b5   :  { %v3313_v34 = vpop.f32.mrb[15].mxu0  ;;  %v7633_v55 = vadd.f32 %v3311_v37, %v7625_v29  ;;  %v4098_v28 = vmul.f32 -1.442695, %v7623_v7  ;;  %4417 = vpow2.f32 %v4093_v59 }
 0x7b6   :  { %v3360_v39 = vpop.f32.mrb[12].mxu1  ;;  %v7637_v40 = vadd.f32 %v3313_v34, %v7625_v29  ;;  %v4099_v61 = vmul.f32 -1.442695, %v7629_v51 }
 0x7b7   :  { %v7585_v31 = vpop.f32.mrb[13].mxu1  ;;  %v7645_v42 = vadd.f32 %v3360_v39, %v7617_v19  ;;  %v4105_v4 = vmul.f32 -1.442695, %v7633_v55  ;;  %4419 = vpow2.f32 %v4098_v28 }
 0x7b8   :  { %v7587_v43 = vpop.f32.mrb[14].mxu1  ;;  %v4106_v25 = vmul.f32 -1.442695, %v7637_v40  ;;  %4421 = vpow2.f32 %v4099_v61  ;;  %v7653_v35 = vadd.f32 %v7585_v31, %v7617_v19 }
 0x7b9   :  { %v7589_v2 = vpop.f32.mrb[15].mxu1  ;;  %v4406_v27 = vpop.eup %4405  ;;  %v4100_v5 = vmul.f32 -1.442695, %v7645_v42  ;;  %4423 = vpow2.f32 %v4105_v4  ;;  %v7657_v39 = vadd.f32 %v7587_v43, %v7625_v29 }
 0x7ba   :  { %v4408_v50 = vpop.eup %4407  ;;  %v3555_v11 = vadd.f32 1.0, %v4406_v27  ;;  %4425 = vpow2.f32 %v4106_v25  ;;  %v7661_v21 = vadd.f32 %v7589_v2, %v7625_v29  ;;  %v4101_v61 = vmul.f32 -1.442695, %v7653_v35 }
 0x7bb   :  { %v4410_v10 = vpop.eup %4409  ;;  %v3556_v47 = vadd.f32 1.0, %v4408_v50  ;;  %4427 = vpow2.f32 %v4094_v30  ;;  %v4107_v25 = vmul.f32 -1.442695, %v7657_v39 }
 0x7bc   :  { %v4412_v8 = vpop.eup %4411  ;;  %v3562_v3 = vadd.f32 1.0, %v4410_v10  ;;  %4429 = vpow2.f32 %v4100_v5  ;;  %v4108_v2 = vmul.f32 -1.442695, %v7661_v21 }
 0x7bd   :  { %v3563_v63 = vadd.f32 1.0, %v4412_v8  ;;  %v4414_v12 = vpop.eup %4413  ;;  %4431 = vrcp.f32 %v3555_v11 }
 0x7be   :  { %v4416_v17 = vpop.eup %4415  ;;  %4433 = vrcp.f32 %v3556_v47  ;;  %v3557_v46 = vadd.f32 1.0, %v4414_v12 }
 0x7bf   :  { %v4418_v18 = vpop.eup %4417  ;;  %4435 = vrcp.f32 %v3562_v3  ;;  %v3558_v24 = vadd.f32 1.0, %v4416_v17  ;;  %v7677_v3 = vpop.permute.xlu0 %3681 }
 0x7c0   :  { %4437 = vrcp.f32 %v3563_v63  ;;  %v3564_v13 = vadd.f32 1.0, %v4418_v18 }
 0x7c1   :  { %v4420_v9 = vpop.eup %4419  ;;  %4439 = vrcp.f32 %v3557_v46 }
 0x7c2   :  { %v4422_v1 = vpop.eup %4421  ;;  %v3569_v57 = vadd.f32 1.0, %v4420_v9  ;;  %4441 = vrcp.f32 %v3558_v24 }
 0x7c3   :  { %v4424_v54 = vpop.eup %4423  ;;  %v3570_v44 = vadd.f32 1.0, %v4422_v1  ;;  %4443 = vrcp.f32 %v3564_v13 }
 0x7c4   :  { %v4426_v52 = vpop.eup %4425  ;;  %v3576_v62 = vadd.f32 1.0, %v4424_v54  ;;  %4445 = vrcp.f32 %v3569_v57 }
 0x7c5   :  { %v4428_v22 = vpop.eup %4427  ;;  %v3577_v34 = vadd.f32 1.0, %v4426_v52  ;;  %4447 = vrcp.f32 %v3570_v44 }
 0x7c6   :  { %v4430_v58 = vpop.eup %4429  ;;  %v3565_v32 = vadd.f32 1.0, %v4428_v22  ;;  %4449 = vrcp.f32 %v3576_v62 }
 0x7c7   :  { %v4432_v6 = vpop.eup %4431  ;;  %v3571_v31 = vadd.f32 1.0, %v4430_v58  ;;  %4451 = vrcp.f32 %v3577_v34 }
 0x7c8   :  { %v4434_v0 = vpop.eup %4433  ;;  %4453 = vrcp.f32 %v3565_v32  ;;  %v3639_v10 = vmul.f32 %v4432_v6, %v7594_v26 }
 0x7c9   :  { %v4436_v28 = vpop.eup %4435  ;;  %v3640_v8 = vmul.f32 %v4434_v0, %v7599_v36  ;;  %4455 = vrcp.f32 %v3571_v31 }
 0x7ca   :  { %v4438_v43 = vpop.eup %4437  ;;  %v3646_v63 = vmul.f32 %v4436_v28, %v7602_v49  ;;  %4457 = vpow2.f32 %v4101_v61  ;;  %v7693_v49 = vpop.permute.xlu1 %3686 }
 0x7cb   :  { %v3647_v12 = vmul.f32 %v4438_v43, %v7605_v16  ;;  %v7684_v9 = vpop.eup %4439  ;;  %4459 = vpow2.f32 %v4107_v25  ;;  %v7736_v43 = vpop.permute.xlu0 %3691 }
 0x7cc   :  { %v7691_v24 = vpop.eup %4441  ;;  %4461 = vpow2.f32 %v4108_v2 }
 0x7e1   :  { %v3403_v23 = vpop.f32.mrb[16].mxu0 }
 0x7e2   :  { %v3405_v53 = vpop.f32.mrb[17].mxu0  ;;  %v7666_v27 = vadd.f32 %v3403_v23, %v7591_v45 }
 0x7e3   :  { %v3407_v15 = vpop.f32.mrb[18].mxu0  ;;  %v7670_v50 = vadd.f32 %v3405_v53, %v7591_v45  ;;  %v7700_v53 = vpop.eup %4443 }
 0x7e4   :  { %v3409_v48 = vpop.f32.mrb[19].mxu0  ;;  %v7675_v11 = vadd.f32 %v3407_v15, %v7596_v41  ;;  %v4088_v26 = vmul.f32 -1.442695, %v7666_v27 }
 0x7e5   :  { %v4146_v37 = vpop.f32.mrb[16].mxu1  ;;  %v7682_v17 = vadd.f32 %v3409_v48, %v7596_v41  ;;  %v4089_v16 = vmul.f32 -1.442695, %v7670_v50  ;;  %v4446_v48 = vpop.eup %4445 }
 0x7e6   :  { %v3456_v20 = vpop.f32.mrb[17].mxu1  ;;  %v7688_v36 = vadd.f32 %v4146_v37, %v7617_v19  ;;  %v4095_v52 = vmul.f32 -1.442695, %v7675_v11  ;;  %v4448_v34 = vpop.eup %4447  ;;  %4463 = vpow2.f32 %v4088_v26  ;;  %v3653_v28 = vmul.f32 %v4446_v48, %v7623_v7 }
 0x7e7   :  { %v4147_v38 = vpop.f32.mrb[18].mxu1  ;;  %v7697_v23 = vadd.f32 %v3456_v20, %v7591_v45  ;;  %v4096_v58 = vmul.f32 -1.442695, %v7682_v17  ;;  %4465 = vpow2.f32 %v4089_v16  ;;  %v3654_v25 = vmul.f32 %v4448_v34, %v7629_v51 }
 0x7e8   :  { %v3459_v59 = vpop.f32.mrb[19].mxu1  ;;  %v7704_v57 = vadd.f32 %v4147_v38, %v7625_v29  ;;  %v4104_v20 = vmul.f32 -1.442695, %v7688_v36  ;;  %v4450_v38 = vpop.eup %4449  ;;  %4467 = vpow2.f32 %v4095_v52 }
 0x7e9   :  { %v3413_v4 = vpop.f32.mrb[20].mxu0  ;;  %v7709_v45 = vadd.f32 %v3459_v59, %v7596_v41  ;;  %v4090_v41 = vmul.f32 -1.442695, %v7697_v23  ;;  %v4452_v59 = vpop.eup %4451  ;;  %4469 = vpow2.f32 %v4096_v58 }
 0x7ea   :  { %v3415_v30 = vpop.f32.mrb[21].mxu0  ;;  %v7714_v6 = vadd.f32 %v3413_v4, %v7617_v19  ;;  %v4111_v61 = vmul.f32 -1.442695, %v7704_v57  ;;  %4471 = vpow2.f32 %v4104_v20 }
 0x7eb   :  { %v3417_v5 = vpop.f32.mrb[22].mxu0  ;;  %v7721_v0 = vadd.f32 %v3415_v30, %v7617_v19  ;;  %v7734_v19 = vpop.eup %4453  ;;  %v4097_v30 = vmul.f32 -1.442695, %v7709_v45  ;;  %4473 = vpow2.f32 %v4090_v41 }
 0x7ec   :  { %v3419_v47 = vpop.f32.mrb[23].mxu0  ;;  %v7729_v4 = vadd.f32 %v3417_v5, %v7625_v29  ;;  %v7746_v5 = vpop.eup %4455  ;;  %4475 = vpow2.f32 %v4111_v61  ;;  %v3641_v61 = vmul.f32 %v7684_v9, %v7612_v56 }
 0x7ed   :  { %v3802_v18 = vpop.f32.mrb[20].mxu1  ;;  %v7741_v7 = vadd.f32 %v3419_v47, %v7625_v29  ;;  %v3661_v29 = vmul.f32 %v4452_v59, %v7637_v40  ;;  %v4103_v47 = vmul.f32 -1.442695, %v7721_v0  ;;  %4477 = vpow2.f32 %v4097_v30 }
 0x7ee   :  { %v3803_v46 = vadd.f32 %v3802_v18, %v7677_v3  ;;  %v3804_v1 = vpop.f32.mrb[21].mxu1  ;;  %v7751_v18 = vpop.permute.xlu1 %3696 }
 0x7ef   :  { %v3805_v54 = vadd.f32 %v3804_v1, %v7677_v3  ;;  %v3806_v13 = vpop.f32.mrb[22].mxu1 }
 0x7f0   :  { %v3976_v15 = vadd.f32 %v3803_v46, %v3639_v10  ;;  %v3807_v22 = vadd.f32 %v3806_v13, %v7693_v49  ;;  %v3808_v44 = vpop.f32.mrb[23].mxu1  ;;  %v3660_v10 = vmul.f32 %v4450_v38, %v7633_v55  ;;  %v4109_v55 = vmul.f32 -1.442695, %v7729_v4 }
 0x7f1   :  { %v3977_v62 = vadd.f32 %v3805_v54, %v3640_v8  ;;  %v3809_v37 = vadd.f32 %v3808_v44, %v7693_v49  ;;  %v4102_v8 = vmul.f32 -1.442695, %v7714_v6 }
 0x7f2   :  { %4004 = vst [vmem:[%s7883_s6] sm:$0xff] %v3976_v15  ;;  %v3983_v32 = vadd.f32 %v3807_v22, %v3646_v63  ;;  %v4110_v15 = vmul.f32 -1.442695, %v7741_v7 }
 0x7f3   :  { %4005 = vst [vmem:[%s7883_s6 + $0x8] sm:$0xff] %v3977_v62  ;;  %v3984_v31 = vadd.f32 %v3809_v37, %v3647_v12  ;;  %v4458_v12 = vpop.eup %4457  ;;  %4479 = vpow2.f32 %v4102_v8  ;;  %v3648_v8 = vmul.f32 %v7700_v53, %v7620_v14 }
 0x7f4   :  { %4011 = vst [vmem:[%s7883_s6 + $0x38] sm:$0xff] %v3983_v32  ;;  %v4460_v1 = vpop.eup %4459  ;;  %v3572_v44 = vadd.f32 1.0, %v4458_v12  ;;  %4481 = vpow2.f32 %v4103_v47  ;;  %v3649_v47 = vmul.f32 %v7734_v19, %v7640_v33 }
 0x7f5   :  { %4012 = vst [vmem:[%s7883_s6 + $0x40] sm:$0xff] %v3984_v31  ;;  %v3812_v2 = vpop.f32.mrb[24].mxu1  ;;  %v4462_v52 = vpop.eup %4461  ;;  %v3578_v58 = vadd.f32 1.0, %v4460_v1  ;;  %4483 = vpow2.f32 %v4109_v55 }
 0x7f6   :  { %v3813_v51 = vadd.f32 %v3812_v2, %v7736_v43  ;;  %v3814_v63 = vpop.f32.mrb[25].mxu1  ;;  %v4464_v37 = vpop.eup %4463  ;;  %v3579_v34 = vadd.f32 1.0, %v4462_v52  ;;  %4485 = vpow2.f32 %v4110_v15 }
 0x7f7   :  { %v3815_v26 = vadd.f32 %v3814_v63, %v7736_v43  ;;  %v3816_v46 = vpop.f32.mrb[26].mxu1  ;;  %v4466_v20 = vpop.eup %4465  ;;  %4487 = vrcp.f32 %v3572_v44  ;;  %v3559_v41 = vadd.f32 1.0, %v4464_v37 }
 0x7f8   :  { %v3990_v16 = vadd.f32 %v3813_v51, %v3653_v28  ;;  %v3817_v54 = vadd.f32 %v3816_v46, %v7751_v18  ;;  %v3818_v13 = vpop.f32.mrb[27].mxu1  ;;  %v4468_v32 = vpop.eup %4467  ;;  %4489 = vrcp.f32 %v3578_v58  ;;  %v3560_v59 = vadd.f32 1.0, %v4466_v20 }
 0x7f9   :  { %v3991_v22 = vadd.f32 %v3815_v26, %v3654_v25  ;;  %v3819_v40 = vadd.f32 %v3818_v13, %v7751_v18  ;;  %v4470_v38 = vpop.eup %4469  ;;  %4491 = vrcp.f32 %v3579_v34  ;;  %v3566_v25 = vadd.f32 1.0, %v4468_v32 }
 0x7fa   :  { %4018 = vst [vmem:[%s7883_s6 + $0x70] sm:$0xff] %v3990_v16  ;;  %v3997_v48 = vadd.f32 %v3817_v54, %v3660_v10  ;;  %v4472_v31 = vpop.eup %4471  ;;  %v3642_v10 = vmul.f32 %v7691_v24, %v7615_v60  ;;  %v3567_v51 = vadd.f32 1.0, %v4470_v38  ;;  %4493 = vrcp.f32 %v3559_v41 }
 0x7fb   :  { %4019 = vst [vmem:[%s7883_s6 + $0x78] sm:$0xff] %v3991_v22  ;;  %v3998_v62 = vadd.f32 %v3819_v40, %v3661_v29  ;;  %v4474_v28 = vpop.eup %4473  ;;  %v3575_v26 = vadd.f32 1.0, %v4472_v31  ;;  %4495 = vrcp.f32 %v3560_v59  ;;  %v3655_v34 = vmul.f32 %v7746_v5, %v7645_v42 }
 0x7fc   :  { %4025 = vst [vmem:[%s7883_s6 + $0xa8] sm:$0xff] %v3997_v48  ;;  %v4476_v2 = vpop.eup %4475  ;;  %v3561_v1 = vadd.f32 1.0, %v4474_v28  ;;  %4497 = vrcp.f32 %v3566_v25 }
 0x7fd   :  { %4026 = vst [vmem:[%s7883_s6 + $0xb0] sm:$0xff] %v3998_v62  ;;  %v4478_v29 = vpop.eup %4477  ;;  %v3582_v55 = vadd.f32 1.0, %v4476_v2  ;;  %4499 = vrcp.f32 %v3567_v51 }
 0x7fe   :  { %v4480_v46 = vpop.eup %4479  ;;  %v3568_v33 = vadd.f32 1.0, %v4478_v29  ;;  %4501 = vrcp.f32 %v3575_v26 }
 0x7ff   :  { %v4482_v53 = vpop.eup %4481  ;;  %v3573_v15 = vadd.f32 1.0, %v4480_v46  ;;  %4503 = vrcp.f32 %v3561_v1 }
 0x800   :  { %v4484_v13 = vpop.eup %4483  ;;  %v3574_v44 = vadd.f32 1.0, %v4482_v53  ;;  %4505 = vrcp.f32 %v3582_v55 }
 0x801   :  { %v3855_v30 = vpop.f32.mrb[24].mxu0  ;;  %v4486_v52 = vpop.eup %4485  ;;  %v3580_v58 = vadd.f32 1.0, %v4484_v13  ;;  %4507 = vrcp.f32 %v3568_v33 }
 0x802   :  { %v3856_v63 = vadd.f32 %v3855_v30, %v7677_v3  ;;  %v3857_v12 = vpop.f32.mrb[25].mxu0  ;;  %v4488_v40 = vpop.eup %4487  ;;  %v3581_v20 = vadd.f32 1.0, %v4486_v52  ;;  %4509 = vrcp.f32 %v3573_v15 }
 0x803   :  { %v3858_v56 = vadd.f32 %v3857_v12, %v7677_v3  ;;  %v3859_v9 = vpop.f32.mrb[26].mxu0  ;;  %v4490_v48 = vpop.eup %4489  ;;  %v3656_v41 = vmul.f32 %v4488_v40, %v7653_v35  ;;  %4511 = vrcp.f32 %v3574_v44 }
 0x804   :  { %v3978_v60 = vadd.f32 %v3856_v63, %v3641_v61  ;;  %v3860_v24 = vadd.f32 %v3859_v9, %v7693_v49  ;;  %v3861_v14 = vpop.f32.mrb[27].mxu0  ;;  %v4492_v37 = vpop.eup %4491  ;;  %v3662_v28 = vmul.f32 %v4490_v48, %v7657_v39  ;;  %4513 = vrcp.f32 %v3580_v58 }
 0x805   :  { %v3979_v16 = vadd.f32 %v3858_v56, %v3642_v10  ;;  %v3862_v54 = vadd.f32 %v3861_v14, %v7693_v49  ;;  %v4494_v2 = vpop.eup %4493  ;;  %v3663_v42 = vmul.f32 %v4492_v37, %v7661_v21  ;;  %4515 = vrcp.f32 %v3581_v20 }
 0x806   :  { %4006 = vst [vmem:[%s7883_s6 + $0x10] sm:$0xff] %v3978_v60  ;;  %v3985_v19 = vadd.f32 %v3860_v24, %v3648_v8  ;;  %v4496_v8 = vpop.eup %4495 }
 0x807   :  { %4007 = vst [vmem:[%s7883_s6 + $0x18] sm:$0xff] %v3979_v16  ;;  %v3986_v22 = vadd.f32 %v3862_v54, %v3649_v47  ;;  %v4498_v39 = vpop.eup %4497  ;;  %v3643_v47 = vmul.f32 %v4494_v2, %v7666_v27  ;;  %v3644_v46 = vmul.f32 %v4496_v8, %v7670_v50 }
 0x808   :  { %4013 = vst [vmem:[%s7883_s6 + $0x48] sm:$0xff] %v3985_v19  ;;  %v4500_v63 = vpop.eup %4499  ;;  %v3650_v14 = vmul.f32 %v4498_v39, %v7675_v11 }
 0x809   :  { %4014 = vst [vmem:[%s7883_s6 + $0x50] sm:$0xff] %v3986_v22  ;;  %v3865_v62 = vpop.f32.mrb[28].mxu0  ;;  %v4502_v21 = vpop.eup %4501  ;;  %v3651_v13 = vmul.f32 %v4500_v63, %v7682_v17 }
 0x80a   :  { %v3866_v32 = vadd.f32 %v3865_v62, %v7736_v43  ;;  %v3867_v38 = vpop.f32.mrb[29].mxu0  ;;  %v4504_v29 = vpop.eup %4503  ;;  %v3659_v17 = vmul.f32 %v4502_v21, %v7688_v36 }
 0x80b   :  { %v3868_v31 = vadd.f32 %v3867_v38, %v7736_v43  ;;  %v3869_v59 = vpop.f32.mrb[30].mxu0  ;;  %v4506_v9 = vpop.eup %4505  ;;  %v3645_v22 = vmul.f32 %v4504_v29, %v7697_v23 }
 0x80c   :  { %v3992_v61 = vadd.f32 %v3866_v32, %v3655_v34  ;;  %v3870_v25 = vadd.f32 %v3869_v59, %v7751_v18  ;;  %v3871_v30 = vpop.f32.mrb[31].mxu0  ;;  %v4508_v24 = vpop.eup %4507  ;;  %v3666_v40 = vmul.f32 %v4506_v9, %v7704_v57 }
 0x80d   :  { %v3993_v5 = vadd.f32 %v3868_v31, %v3656_v41  ;;  %v3872_v10 = vadd.f32 %v3871_v30, %v7751_v18  ;;  %v4510_v54 = vpop.eup %4509  ;;  %v3652_v44 = vmul.f32 %v4508_v24, %v7709_v45 }
 0x80e   :  { %4020 = vst [vmem:[%s7883_s6 + $0x80] sm:$0xff] %v3992_v61  ;;  %v3999_v35 = vadd.f32 %v3870_v25, %v3662_v28  ;;  %v4512_v19 = vpop.eup %4511  ;;  %v3657_v62 = vmul.f32 %v4510_v54, %v7714_v6 }
 0x80f   :  { %4021 = vst [vmem:[%s7883_s6 + $0x88] sm:$0xff] %v3993_v5  ;;  %v4000_v51 = vadd.f32 %v3872_v10, %v3663_v42  ;;  %v4514_v52 = vpop.eup %4513  ;;  %v3658_v37 = vmul.f32 %v4512_v19, %v7721_v0 }
 0x810   :  { %4027 = vst [vmem:[%s7883_s6 + $0xb8] sm:$0xff] %v3999_v35  ;;  %v4516_v15 = vpop.eup %4515  ;;  %v3664_v57 = vmul.f32 %v4514_v52, %v7729_v4 }
 0x811   :  { %4028 = vst [vmem:[%s7883_s6 + $0xc0] sm:$0xff] %v4000_v51  ;;  %v3908_v12 = vpop.f32.mrb[28].mxu1  ;;  %v3665_v45 = vmul.f32 %v4516_v15, %v7741_v7 }
 0x812   :  { %v3909_v26 = vadd.f32 %v3908_v12, %v7677_v3  ;;  %v3910_v56 = vpop.f32.mrb[29].mxu1 }
 0x813   :  { %v3911_v1 = vadd.f32 %v3910_v56, %v7677_v3  ;;  %v3912_v60 = vpop.f32.mrb[30].mxu1 }
 0x814   :  { %v3980_v53 = vadd.f32 %v3909_v26, %v3643_v47  ;;  %v3913_v55 = vadd.f32 %v3912_v60, %v7693_v49  ;;  %v3914_v16 = vpop.f32.mrb[31].mxu1 }
 0x815   :  { %v3981_v27 = vadd.f32 %v3911_v1, %v3644_v46  ;;  %v3915_v33 = vadd.f32 %v3914_v16, %v7693_v49 }
 0x816   :  { %4008 = vst [vmem:[%s7883_s6 + $0x20] sm:$0xff] %v3980_v53  ;;  %v3987_v50 = vadd.f32 %v3913_v55, %v3650_v14 }
 0x817   :  { %4009 = vst [vmem:[%s7883_s6 + $0x28] sm:$0xff] %v3981_v27  ;;  %v3988_v11 = vadd.f32 %v3915_v33, %v3651_v13 }
 0x818   :  { %4015 = vst [vmem:[%s7883_s6 + $0x58] sm:$0xff] %v3987_v50 }
 0x819   :  { %4016 = vst [vmem:[%s7883_s6 + $0x60] sm:$0xff] %v3988_v11  ;;  %v3918_v48 = vpop.f32.mrb[32].mxu1  ;;  %v4152_v58 = vpop.f32.mrb[32].mxu0 }
 0x81a   :  { %v3919_v34 = vadd.f32 %v3918_v48, %v7736_v43  ;;  %v3970_v36 = vadd.f32 %v4152_v58, %v7736_v43  ;;  %v3920_v20 = vpop.f32.mrb[33].mxu1  ;;  %v3961_v23 = vpop.f32.mrb[33].mxu0 }
 0x81b   :  { %v3921_v32 = vadd.f32 %v3920_v20, %v7736_v43  ;;  %v3962_v38 = vadd.f32 %v3961_v23, %v7677_v3  ;;  %v3922_v41 = vpop.f32.mrb[34].mxu1  ;;  %v4153_v31 = vpop.f32.mrb[34].mxu0 }
 0x81c   :  { %v3994_v59 = vadd.f32 %v3919_v34, %v3657_v62  ;;  %v3996_v6 = vadd.f32 %v3970_v36, %v3659_v17  ;;  %v3923_v0 = vadd.f32 %v3922_v41, %v7751_v18  ;;  %v3973_v28 = vadd.f32 %v4153_v31, %v7751_v18  ;;  %v3924_v61 = vpop.f32.mrb[35].mxu1  ;;  %v3964_v25 = vpop.f32.mrb[35].mxu0 }
 0x81d   :  { %v3995_v30 = vadd.f32 %v3921_v32, %v3658_v37  ;;  %v3982_v2 = vadd.f32 %v3962_v38, %v3645_v22  ;;  %v3925_v4 = vadd.f32 %v3924_v61, %v7751_v18  ;;  %v3965_v7 = vadd.f32 %v3964_v25, %v7693_v49 }
 0x81e   :  { %4022 = vst [vmem:[%s7883_s6 + $0x90] sm:$0xff] %v3994_v59  ;;  %4024 = vst [vmem:[%s7883_s6 + $0xa0] sm:$0xff] %v3996_v6  ;;  %v4001_v3 = vadd.f32 %v3923_v0, %v3664_v57  ;;  %v4003_v43 = vadd.f32 %v3973_v28, %v3666_v40 }
 0x81f   :  { %4023 = vst [vmem:[%s7883_s6 + $0x98] sm:$0xff] %v3995_v30  ;;  %4010 = vst [vmem:[%s7883_s6 + $0x30] sm:$0xff] %v3982_v2  ;;  %v4002_v18 = vadd.f32 %v3925_v4, %v3665_v45  ;;  %v3989_v49 = vadd.f32 %v3965_v7, %v3652_v44 }
 0x820   :  { %4029 = vst [vmem:[%s7883_s6 + $0xc8] sm:$0xff] %v4001_v3  ;;  %4031 = vst [vmem:[%s7883_s6 + $0xd8] sm:$0xff] %v4003_v43 }
 0x821   :  { %4030 = vst [vmem:[%s7883_s6 + $0xd0] sm:$0xff] %v4002_v18  ;;  %4017 = vst [vmem:[%s7883_s6 + $0x68] sm:$0xff] %v3989_v49 }

</bundles_post_ra>
